<compile_context>
chip_gen: v6e
topology: v6e:2x2x1
jax: 0.10.0
libtpu: 0.0.40
codegen_flags: <defaults>
</compile_context>

<pallas_src>
import jax
import jax.numpy as jnp
from jax.experimental import pallas as pl
from jax.experimental.pallas import tpu as pltpu

# ----------------------------- configuration -----------------------------
IMG_SIZE = 16        # clip_imsize == cfg_imsize
PATCH = 8
IN_CH = 3
V_WIDTH = 32         # visual transformer width
V_HEADS = 4
N_PATCH = (IMG_SIZE // PATCH) ** 2     # 4

T_WIDTH = 32         # ctx_dim == dmx_dim == ln_final.weight.shape[0]
T_HEADS = 4
CTX_LEN = 16         # context length (77 in real CLIP, small here)
VOCAB = 100

N_CLS = 3
N_CTX = 2            # cfg.TRAINER.DOCOOP2.N_CTX
N_DMX = 2            # == N_CTX in the module
EMBED_DIM = 32       # joint image/text embedding dim

VMEM_SPEC = pl.BlockSpec(memory_space=pltpu.MemorySpace.VMEM)


# --------------------- in-kernel helpers (values, f32) ---------------------
def _ln(x, g, b, eps=1e-5):
    """LayerNorm over the last dim. x: (N, D); g/b: (1, D)."""
    mu = jnp.mean(x, axis=-1, keepdims=True)
    xc = x - mu
    var = jnp.mean(xc * xc, axis=-1, keepdims=True)
    return xc * jax.lax.rsqrt(var + eps) * g + b


def _mm(x, w, b=None):
    """Shared-weight 2-D matmul on the MXU: (N, K) f32 @ (K, M) bf16 -> (N, M) f32."""
    y = jnp.dot(x.astype(w.dtype), w, preferred_element_type=jnp.float32)
    if b is not None:
        y = y + b
    return y


def _l2norm(x, eps=1e-12):
    # rsqrt goes to the (otherwise idle) EUP slot; eps is a deliberate tiny
    # deviation from CLIP's x.norm() for numerical safety.
    return x * jax.lax.rsqrt(jnp.sum(x * x, axis=-1, keepdims=True) + eps)


def _residual_block(x, n_heads, mask, blk):
    """CLIP ResidualAttentionBlock on a flattened (N = B*S, D) activation.

    `mask` is an additive (N, N) block-diagonal (+causal) mask that keeps the
    flattened batch elements from attending to each other, so attention is
    head-batched (H leading dim) with no per-head loop and no lane re-layout.
    """
    (ln1_g, ln1_b, w_qkv, b_qkv, wo_h, bo,
     ln2_g, ln2_b, w_fc, b_fc, w_pr, b_pr) = tuple(r[...] for r in blk)
    n, d = x.shape
    dh = d // n_heads
    scale = dh ** -0.5

    h = _ln(x, ln1_g, ln1_b)
    qkv = _mm(h, w_qkv, b_qkv)                        # ONE (N, 3D) MXU matmul

    def split_heads(base):                            # (H, N, dh), outer-dim stack
        return jnp.stack(
            [qkv[:, base + i * dh: base + (i + 1) * dh] for i in range(n_heads)],
            axis=0)

    q = split_heads(0)
    k = split_heads(d)
    v = split_heads(2 * d)

    sc = jnp.einsum('hqd,hkd->hqk',
                    q.astype(jnp.bfloat16), k.astype(jnp.bfloat16),
                    preferred_element_type=jnp.float32) * scale       # (H, N, N)
    sc = sc + mask[None, :, :]
    sc = sc - jnp.max(sc, axis=-1, keepdims=True)
    p = jnp.exp(sc)
    p = p * pl.reciprocal(jnp.sum(p, axis=-1, keepdims=True), approx=True)
    o = jnp.einsum('hqk,hkd->hqd',
                   p.astype(jnp.bfloat16), v.astype(jnp.bfloat16),
                   preferred_element_type=jnp.float32)                # (H, N, dh)

    # out-projection folded per head: concat_h(o_h) @ wo == sum_h o_h @ wo[h]
    attn = jnp.einsum('hqd,hde->hqe', o.astype(jnp.bfloat16), wo_h,
                      preferred_element_type=jnp.float32)             # (H, N, D)
    x = x + jnp.sum(attn, axis=0) + bo                # residual (VPU adds)

    h = _ln(x, ln2_g, ln2_b)
    h = _mm(h, w_fc, b_fc)                            # (N, 4D=128) lane-dense
    h = h * jax.nn.sigmoid(1.702 * h)                 # QuickGELU
    return x + _mm(h, w_pr, b_pr)                     # residual


# ------------------------------ fused kernel ------------------------------
def _make_clip_kernel(bsz, rows_out):
    """grid=(2,): step 0 = vision encoder, step 1 = text encoder."""

    def kernel(*refs):
        vis_tok, patch_w, vis_pos, vpre_g, vpre_b = refs[0:5]
        vblk = refs[5:17]
        vmask, vpost_g, vpost_b, vproj, selv = refs[17:22]
        prom, tpos = refs[22:24]
        tblk = refs[24:36]
        tmask, tfin_g, tfin_b, selt, tproj = refs[36:41]
        o_ref = refs[41]

        pid = pl.program_id(0)

        @pl.when(pid == 0)
        def _vision():
            # patch embed (CLS row is all-zero pixels; class_emb folded into pos[0])
            x = _mm(vis_tok[...], patch_w[...]) + vis_pos[...]         # (N_vis, D)
            x = _ln(x, vpre_g[...], vpre_b[...])
            x = _residual_block(x, V_HEADS, vmask[...], vblk)
            # CLS rows via one-hot select matmul (f32, exact row copy)
            cls = jnp.dot(selv[...], x, preferred_element_type=jnp.float32)
            cls = _ln(cls, vpost_g[...], vpost_b[...])
            feats = _l2norm(_mm(cls, vproj[...]))                      # (B, E)
            o_ref[0, :bsz, :] = feats
            if rows_out > bsz:
                o_ref[0, bsz:, :] = jnp.zeros((rows_out - bsz, EMBED_DIM), jnp.float32)

        @pl.when(pid == 1)
        def _text():
            x = prom[...] + tpos[...]                                  # (N_txt, D)
            x = _residual_block(x, T_HEADS, tmask[...], tblk)
            x = _ln(x, tfin_g[...], tfin_b[...])
            # EOT pooling as a one-hot select matmul
            pooled = jnp.dot(selt[...], x, preferred_element_type=jnp.float32)
            feats = _l2norm(_mm(pooled, tproj[...]))                   # (N_CLS, E)
            o_ref[0, :N_CLS, :] = feats
            if rows_out > N_CLS:
                o_ref[0, N_CLS:, :] = jnp.zeros((rows_out - N_CLS, EMBED_DIM), jnp.float32)

    return kernel


# ------------------------------ wrapper glue ------------------------------
_BLOCK_KEYS = ('ln1_g', 'ln1_b', 'w_qkv', 'b_qkv', 'wo', 'bo',
               'ln2_g', 'ln2_b', 'w_fc', 'b_fc', 'w_proj', 'b_proj')


def _block_args(blk, n_heads):
    """Per-block kernel args; weight matrices bf16, wo pre-split per head."""
    bf16 = jnp.bfloat16
    d = blk['wo'].shape[0]
    dh = d // n_heads
    return (blk['ln1_g'], blk['ln1_b'],
            blk['w_qkv'].astype(bf16), blk['b_qkv'],
            blk['wo'].reshape(n_heads, dh, d).astype(bf16), blk['bo'],
            blk['ln2_g'], blk['ln2_b'],
            blk['w_fc'].astype(bf16), blk['b_fc'],
            blk['w_proj'].astype(bf16), blk['b_proj'])


def _attention_mask(n_batch, seq, causal):
    """Additive (N, N) mask: block-diagonal over flattened batch (+causal)."""
    n = n_batch * seq
    idx = jnp.arange(n)
    same = (idx[:, None] // seq) == (idx[None, :] // seq)
    ok = jnp.logical_and(same, idx[None, :] <= idx[:, None]) if causal else same
    return jnp.where(ok, 0.0, -1e9).astype(jnp.float32)


def custom_clip_forward(p, buffers, image, tokenized_prompts):
    f32, bf16 = jnp.float32, jnp.bfloat16
    bsz = image.shape[0]
    g = IMG_SIZE // PATCH
    din = IN_CH * PATCH * PATCH
    s_vis = g * g + 1
    n_vis = bsz * s_vis
    n_txt = N_CLS * CTX_LEN
    rows_out = max(bsz, N_CLS)

    # ---- vision glue: patch unfold == conv1(stride=kernel=PATCH, no bias) ----
    patches = image.reshape(bsz, IN_CH, g, PATCH, g, PATCH)
    patches = patches.transpose(0, 2, 4, 1, 3, 5).reshape(bsz, g * g, din)
    tokens = jnp.concatenate([jnp.zeros((bsz, 1, din), f32), patches], axis=1)
    tokens = tokens.reshape(n_vis, din)
    vis_pos = p['vis_pos'].at[0].add(p['class_emb'])      # fold class_emb into pos[0]
    vis_pos_full = jnp.tile(vis_pos, (bsz, 1))            # (n_vis, D)
    cls_rows = jnp.arange(bsz) * s_vis
    sel_v = (jnp.arange(n_vis)[None, :] == cls_rows[:, None]).astype(f32)
    vis_mask = _attention_mask(bsz, s_vis, causal=False)

    # ---- prompt learner (class_token_position == 'end') ----
    ctx = jnp.broadcast_to(p['prompt_concat'][None], (N_CLS, N_CTX + N_DMX, T_WIDTH))
    prompts = jnp.concatenate([buffers['token_prefix'], ctx, buffers['token_suffix']], axis=1)
    prompts_flat = prompts.reshape(n_txt, T_WIDTH)
    txt_pos_full = jnp.tile(p['txt_pos'], (N_CLS, 1))
    eot_rows = jnp.arange(N_CLS) * CTX_LEN + jnp.argmax(tokenized_prompts, axis=-1)
    sel_t = (jnp.arange(n_txt)[None, :] == eot_rows[:, None]).astype(f32)
    txt_mask = _attention_mask(N_CLS, CTX_LEN, causal=True)

    vargs = (tokens, p['patch_w'].astype(bf16), vis_pos_full,
             p['ln_pre_g'], p['ln_pre_b'],
             *_block_args(p['vis_block'], V_HEADS),
             vis_mask, p['ln_post_g'], p['ln_post_b'],
             p['vis_proj'].astype(bf16), sel_v)
    targs = (prompts_flat, txt_pos_full,
             *_block_args(p['txt_block'], T_HEADS),
             txt_mask, p['ln_final_g'], p['ln_final_b'],
             sel_t, p['text_proj'].astype(bf16))
    args = vargs + targs

    out = pl.pallas_call(
        _make_clip_kernel(bsz, rows_out),
        out_shape=jax.ShapeDtypeStruct((2, rows_out, EMBED_DIM), f32),
        grid=(2,),
        in_specs=[VMEM_SPEC] * len(args),
        out_specs=pl.BlockSpec((1, rows_out, EMBED_DIM), lambda i: (i, 0, 0)),
        compiler_params=pltpu.CompilerParams(dimension_semantics=("parallel",)),
    )(*args)

    image_features = out[0, :bsz, :]       # already L2-normalized
    text_features = out[1, :N_CLS, :]      # already L2-normalized
    return image_features, text_features


# ------------------------------ initialization ------------------------------
def init_block(key, d, d_mlp):
    ks = jax.random.split(key, 4)
    s = 0.02
    return dict(
        ln1_g=jnp.ones((1, d), jnp.float32), ln1_b=jnp.zeros((1, d), jnp.float32),
        w_qkv=s * jax.random.normal(ks[0], (d, 3 * d), jnp.float32),
        b_qkv=jnp.zeros((1, 3 * d), jnp.float32),
        wo=s * jax.random.normal(ks[1], (d, d), jnp.float32),
        bo=jnp.zeros((1, d), jnp.float32),
        ln2_g=jnp.ones((1, d), jnp.float32), ln2_b=jnp.zeros((1, d), jnp.float32),
        w_fc=s * jax.random.normal(ks[2], (d, d_mlp), jnp.float32),
        b_fc=jnp.zeros((1, d_mlp), jnp.float32),
        w_proj=s * jax.random.normal(ks[3], (d_mlp, d), jnp.float32),
        b_proj=jnp.zeros((1, d), jnp.float32),
    )


def init_model(key):
    ks = jax.random.split(key, 12)
    s = 0.02
    p = {}
    # visual encoder (CLIP ViT)
    p['patch_w'] = s * jax.random.normal(ks[0], (IN_CH * PATCH * PATCH, V_WIDTH), jnp.float32)
    p['class_emb'] = s * jax.random.normal(ks[1], (V_WIDTH,), jnp.float32)
    p['vis_pos'] = s * jax.random.normal(ks[2], (N_PATCH + 1, V_WIDTH), jnp.float32)
    p['ln_pre_g'] = jnp.ones((1, V_WIDTH), jnp.float32)
    p['ln_pre_b'] = jnp.zeros((1, V_WIDTH), jnp.float32)
    p['vis_block'] = init_block(ks[3], V_WIDTH, 4 * V_WIDTH)
    p['ln_post_g'] = jnp.ones((1, V_WIDTH), jnp.float32)
    p['ln_post_b'] = jnp.zeros((1, V_WIDTH), jnp.float32)
    p['vis_proj'] = s * jax.random.normal(ks[4], (V_WIDTH, EMBED_DIM), jnp.float32)
    # text encoder
    p['tok_emb'] = s * jax.random.normal(ks[5], (VOCAB, T_WIDTH), jnp.float32)
    p['txt_pos'] = s * jax.random.normal(ks[6], (CTX_LEN, T_WIDTH), jnp.float32)
    p['txt_block'] = init_block(ks[7], T_WIDTH, 4 * T_WIDTH)
    p['ln_final_g'] = jnp.ones((1, T_WIDTH), jnp.float32)
    p['ln_final_b'] = jnp.zeros((1, T_WIDTH), jnp.float32)
    p['text_proj'] = s * jax.random.normal(ks[8], (T_WIDTH, EMBED_DIM), jnp.float32)
    # prompt learner (CSC=False branch): ctx, dmx ~ N(0, 0.02); concat = cat(ctx, dmx)
    ctx = s * jax.random.normal(ks[9], (N_CTX, T_WIDTH), jnp.float32)
    dmx = s * jax.random.normal(ks[10], (N_DMX, T_WIDTH), jnp.float32)
    p['prompt_concat'] = jnp.concatenate([ctx, dmx], axis=0)
    return p


def build_tokenized_prompts():
    # TODO(synk): real CLIP BPE tokenization of "X X X X <classname>." has no
    # Pallas/JAX equivalent; tokens are built deterministically here instead.
    sot, eot = 1, VOCAB - 1
    name_lens = [1, 2, 3]
    rows = []
    for i, nl in enumerate(name_lens):
        row = [sot] + [2] * (N_CTX + N_DMX) + [10 + i + j for j in range(nl)] + [3, eot]
        row = row + [0] * (CTX_LEN - len(row))
        rows.append(row[:CTX_LEN])
    return jnp.array(rows, dtype=jnp.int32)


# ----------------------------------- main -----------------------------------
if __name__ == "__main__":
    key = jax.random.PRNGKey(0)
    k_model, k_img = jax.random.split(key)

    params = init_model(k_model)
    tokenized_prompts = build_tokenized_prompts()                 # (N_CLS, CTX_LEN)

    # register_buffer('token_prefix'/'token_suffix') from token_embedding(prompts)
    embedding = params['tok_emb'][tokenized_prompts]              # (N_CLS, CTX_LEN, T_WIDTH)
    buffers = {
        'token_prefix': embedding[:, :1, :],
        'token_suffix': embedding[:, 1 + N_CTX + N_DMX:, :],
    }

    image = jax.random.normal(k_img, (2, IN_CH, IMG_SIZE, IMG_SIZE), jnp.float32)

    fwd = jax.jit(custom_clip_forward)
    image_features, text_features = fwd(params, buffers, image, tokenized_prompts)
    jax.block_until_ready((image_features, text_features))

    assert image_features.shape == (2, EMBED_DIM)
    assert text_features.shape == (N_CLS, EMBED_DIM)
    # features are unit-norm
    assert jnp.allclose(jnp.linalg.norm(image_features, axis=-1), 1.0, atol=1e-4)
    assert jnp.allclose(jnp.linalg.norm(text_features, axis=-1), 1.0, atol=1e-4)

    print("KERNEL_OK")
</pallas_src>

<mosaic_0001>
module attributes {stable_mosaic.version = 11 : i64} {
  func.func @kernel(%arg0: i32, %arg1: memref<10x192xf32, #tpu.memory_space<vmem>>, %arg2: memref<192x32xbf16, #tpu.memory_space<vmem>>, %arg3: memref<10x32xf32, #tpu.memory_space<vmem>>, %arg4: memref<1x32xf32, #tpu.memory_space<vmem>>, %arg5: memref<1x32xf32, #tpu.memory_space<vmem>>, %arg6: memref<1x32xf32, #tpu.memory_space<vmem>>, %arg7: memref<1x32xf32, #tpu.memory_space<vmem>>, %arg8: memref<32x96xbf16, #tpu.memory_space<vmem>>, %arg9: memref<1x96xf32, #tpu.memory_space<vmem>>, %arg10: memref<4x8x32xbf16, #tpu.memory_space<vmem>>, %arg11: memref<1x32xf32, #tpu.memory_space<vmem>>, %arg12: memref<1x32xf32, #tpu.memory_space<vmem>>, %arg13: memref<1x32xf32, #tpu.memory_space<vmem>>, %arg14: memref<32x128xbf16, #tpu.memory_space<vmem>>, %arg15: memref<1x128xf32, #tpu.memory_space<vmem>>, %arg16: memref<128x32xbf16, #tpu.memory_space<vmem>>, %arg17: memref<1x32xf32, #tpu.memory_space<vmem>>, %arg18: memref<10x10xf32, #tpu.memory_space<vmem>>, %arg19: memref<1x32xf32, #tpu.memory_space<vmem>>, %arg20: memref<1x32xf32, #tpu.memory_space<vmem>>, %arg21: memref<32x32xbf16, #tpu.memory_space<vmem>>, %arg22: memref<2x10xf32, #tpu.memory_space<vmem>>, %arg23: memref<48x32xf32, #tpu.memory_space<vmem>>, %arg24: memref<48x32xf32, #tpu.memory_space<vmem>>, %arg25: memref<1x32xf32, #tpu.memory_space<vmem>>, %arg26: memref<1x32xf32, #tpu.memory_space<vmem>>, %arg27: memref<32x96xbf16, #tpu.memory_space<vmem>>, %arg28: memref<1x96xf32, #tpu.memory_space<vmem>>, %arg29: memref<4x8x32xbf16, #tpu.memory_space<vmem>>, %arg30: memref<1x32xf32, #tpu.memory_space<vmem>>, %arg31: memref<1x32xf32, #tpu.memory_space<vmem>>, %arg32: memref<1x32xf32, #tpu.memory_space<vmem>>, %arg33: memref<32x128xbf16, #tpu.memory_space<vmem>>, %arg34: memref<1x128xf32, #tpu.memory_space<vmem>>, %arg35: memref<128x32xbf16, #tpu.memory_space<vmem>>, %arg36: memref<1x32xf32, #tpu.memory_space<vmem>>, %arg37: memref<48x48xf32, #tpu.memory_space<vmem>>, %arg38: memref<1x32xf32, #tpu.memory_space<vmem>>, %arg39: memref<1x32xf32, #tpu.memory_space<vmem>>, %arg40: memref<3x48xf32, #tpu.memory_space<vmem>>, %arg41: memref<32x32xbf16, #tpu.memory_space<vmem>>, %arg42: memref<1x3x32xf32, #tpu.memory_space<vmem>>) attributes {dimension_semantics = [#tpu.dimension_semantics<parallel>], iteration_bounds = array<i64: 2>, scalar_prefetch = 0 : i64, scratch_operands = 0 : i64, tpu.core_type = #tpu.core_type<tc>, window_params = [{pipeline_mode = #tpu.pipeline_mode<synchronous>, transform_indices = @transform_0, window_bounds = array<i64: 10, 192>}, {pipeline_mode = #tpu.pipeline_mode<synchronous>, transform_indices = @transform_1, window_bounds = array<i64: 192, 32>}, {pipeline_mode = #tpu.pipeline_mode<synchronous>, transform_indices = @transform_2, window_bounds = array<i64: 10, 32>}, {pipeline_mode = #tpu.pipeline_mode<synchronous>, transform_indices = @transform_3, window_bounds = array<i64: 1, 32>}, {pipeline_mode = #tpu.pipeline_mode<synchronous>, transform_indices = @transform_4, window_bounds = array<i64: 1, 32>}, {pipeline_mode = #tpu.pipeline_mode<synchronous>, transform_indices = @transform_5, window_bounds = array<i64: 1, 32>}, {pipeline_mode = #tpu.pipeline_mode<synchronous>, transform_indices = @transform_6, window_bounds = array<i64: 1, 32>}, {pipeline_mode = #tpu.pipeline_mode<synchronous>, transform_indices = @transform_7, window_bounds = array<i64: 32, 96>}, {pipeline_mode = #tpu.pipeline_mode<synchronous>, transform_indices = @transform_8, window_bounds = array<i64: 1, 96>}, {pipeline_mode = #tpu.pipeline_mode<synchronous>, transform_indices = @transform_9, window_bounds = array<i64: 4, 8, 32>}, {pipeline_mode = #tpu.pipeline_mode<synchronous>, transform_indices = @transform_10, window_bounds = array<i64: 1, 32>}, {pipeline_mode = #tpu.pipeline_mode<synchronous>, transform_indices = @transform_11, window_bounds = array<i64: 1, 32>}, {pipeline_mode = #tpu.pipeline_mode<synchronous>, transform_indices = @transform_12, window_bounds = array<i64: 1, 32>}, {pipeline_mode = #tpu.pipeline_mode<synchronous>, transform_indices = @transform_13, window_bounds = array<i64: 32, 128>}, {pipeline_mode = #tpu.pipeline_mode<synchronous>, transform_indices = @transform_14, window_bounds = array<i64: 1, 128>}, {pipeline_mode = #tpu.pipeline_mode<synchronous>, transform_indices = @transform_15, window_bounds = array<i64: 128, 32>}, {pipeline_mode = #tpu.pipeline_mode<synchronous>, transform_indices = @transform_16, window_bounds = array<i64: 1, 32>}, {pipeline_mode = #tpu.pipeline_mode<synchronous>, transform_indices = @transform_17, window_bounds = array<i64: 10, 10>}, {pipeline_mode = #tpu.pipeline_mode<synchronous>, transform_indices = @transform_18, window_bounds = array<i64: 1, 32>}, {pipeline_mode = #tpu.pipeline_mode<synchronous>, transform_indices = @transform_19, window_bounds = array<i64: 1, 32>}, {pipeline_mode = #tpu.pipeline_mode<synchronous>, transform_indices = @transform_20, window_bounds = array<i64: 32, 32>}, {pipeline_mode = #tpu.pipeline_mode<synchronous>, transform_indices = @transform_21, window_bounds = array<i64: 2, 10>}, {pipeline_mode = #tpu.pipeline_mode<synchronous>, transform_indices = @transform_22, window_bounds = array<i64: 48, 32>}, {pipeline_mode = #tpu.pipeline_mode<synchronous>, transform_indices = @transform_23, window_bounds = array<i64: 48, 32>}, {pipeline_mode = #tpu.pipeline_mode<synchronous>, transform_indices = @transform_24, window_bounds = array<i64: 1, 32>}, {pipeline_mode = #tpu.pipeline_mode<synchronous>, transform_indices = @transform_25, window_bounds = array<i64: 1, 32>}, {pipeline_mode = #tpu.pipeline_mode<synchronous>, transform_indices = @transform_26, window_bounds = array<i64: 32, 96>}, {pipeline_mode = #tpu.pipeline_mode<synchronous>, transform_indices = @transform_27, window_bounds = array<i64: 1, 96>}, {pipeline_mode = #tpu.pipeline_mode<synchronous>, transform_indices = @transform_28, window_bounds = array<i64: 4, 8, 32>}, {pipeline_mode = #tpu.pipeline_mode<synchronous>, transform_indices = @transform_29, window_bounds = array<i64: 1, 32>}, {pipeline_mode = #tpu.pipeline_mode<synchronous>, transform_indices = @transform_30, window_bounds = array<i64: 1, 32>}, {pipeline_mode = #tpu.pipeline_mode<synchronous>, transform_indices = @transform_31, window_bounds = array<i64: 1, 32>}, {pipeline_mode = #tpu.pipeline_mode<synchronous>, transform_indices = @transform_32, window_bounds = array<i64: 32, 128>}, {pipeline_mode = #tpu.pipeline_mode<synchronous>, transform_indices = @transform_33, window_bounds = array<i64: 1, 128>}, {pipeline_mode = #tpu.pipeline_mode<synchronous>, transform_indices = @transform_34, window_bounds = array<i64: 128, 32>}, {pipeline_mode = #tpu.pipeline_mode<synchronous>, transform_indices = @transform_35, window_bounds = array<i64: 1, 32>}, {pipeline_mode = #tpu.pipeline_mode<synchronous>, transform_indices = @transform_36, window_bounds = array<i64: 48, 48>}, {pipeline_mode = #tpu.pipeline_mode<synchronous>, transform_indices = @transform_37, window_bounds = array<i64: 1, 32>}, {pipeline_mode = #tpu.pipeline_mode<synchronous>, transform_indices = @transform_38, window_bounds = array<i64: 1, 32>}, {pipeline_mode = #tpu.pipeline_mode<synchronous>, transform_indices = @transform_39, window_bounds = array<i64: 3, 48>}, {pipeline_mode = #tpu.pipeline_mode<synchronous>, transform_indices = @transform_40, window_bounds = array<i64: 32, 32>}, {transform_indices = @transform_41, window_bounds = array<i64: 1, 3, 32>}]} {
    %c0_i32 = arith.constant 0 : i32
    %0 = arith.cmpi eq, %arg0, %c0_i32 : i32
    %1 = arith.extui %0 : i1 to i32
    %c0_i32_0 = arith.constant 0 : i32
    %2 = arith.cmpi ne, %1, %c0_i32_0 : i32
    scf.if %2 {
      %c0 = arith.constant 0 : index
      %c0_2 = arith.constant 0 : index
      %6 = vector.load %arg1[%c0, %c0_2] : memref<10x192xf32, #tpu.memory_space<vmem>>, vector<10x192xf32>
      %c0_3 = arith.constant 0 : index
      %c0_4 = arith.constant 0 : index
      %7 = vector.load %arg2[%c0_3, %c0_4] : memref<192x32xbf16, #tpu.memory_space<vmem>>, vector<192x32xbf16>
      %8 = arith.truncf %6 : vector<10x192xf32> to vector<10x192xbf16>
      %cst = arith.constant dense<0.000000e+00> : vector<10x32xf32>
      %9 = tpu.matmul %8, %7, %cst {dimension_numbers = #tpu.dot_dimension_numbers<[1], [0], [0], [1], [0, 0, 1, 1], [], []>} : vector<10x192xbf16>, vector<192x32xbf16>, vector<10x32xf32> -> vector<10x32xf32>
      %c0_5 = arith.constant 0 : index
      %c0_6 = arith.constant 0 : index
      %10 = vector.load %arg3[%c0_5, %c0_6] : memref<10x32xf32, #tpu.memory_space<vmem>>, vector<10x32xf32>
      %11 = arith.addf %9, %10 : vector<10x32xf32>
      %c0_7 = arith.constant 0 : index
      %c0_8 = arith.constant 0 : index
      %12 = vector.load %arg4[%c0_7, %c0_8] : memref<1x32xf32, #tpu.memory_space<vmem>>, vector<1x32xf32>
      %c0_9 = arith.constant 0 : index
      %c0_10 = arith.constant 0 : index
      %13 = vector.load %arg5[%c0_9, %c0_10] : memref<1x32xf32, #tpu.memory_space<vmem>>, vector<1x32xf32>
      %cst_11 = arith.constant dense<0.000000e+00> : vector<10xf32>
      %14 = vector.multi_reduction <add>, %11, %cst_11 [1] : vector<10x32xf32> to vector<10xf32>
      %15 = vector.shape_cast %14 : vector<10xf32> to vector<10x1xf32>
      %cst_12 = arith.constant 3.200000e+01 : f32
      %16 = vector.broadcast %cst_12 : f32 to vector<10x1xf32>
      %17 = arith.divf %15, %16 : vector<10x1xf32>
      %18 = vector.broadcast %17 : vector<10x1xf32> to vector<10x32xf32>
      %19 = arith.subf %11, %18 : vector<10x32xf32>
      %20 = arith.mulf %19, %19 : vector<10x32xf32>
      %cst_13 = arith.constant dense<0.000000e+00> : vector<10xf32>
      %21 = vector.multi_reduction <add>, %20, %cst_13 [1] : vector<10x32xf32> to vector<10xf32>
      %22 = vector.shape_cast %21 : vector<10xf32> to vector<10x1xf32>
      %cst_14 = arith.constant 3.200000e+01 : f32
      %23 = vector.broadcast %cst_14 : f32 to vector<10x1xf32>
      %24 = arith.divf %22, %23 : vector<10x1xf32>
      %cst_15 = arith.constant 9.99999974E-6 : f32
      %25 = vector.broadcast %cst_15 : f32 to vector<10x1xf32>
      %26 = arith.addf %24, %25 : vector<10x1xf32>
      %27 = math.rsqrt %26 : vector<10x1xf32>
      %28 = vector.broadcast %27 : vector<10x1xf32> to vector<10x32xf32>
      %29 = arith.mulf %19, %28 : vector<10x32xf32>
      %30 = vector.broadcast %12 : vector<1x32xf32> to vector<10x32xf32>
      %31 = arith.mulf %29, %30 : vector<10x32xf32>
      %32 = vector.broadcast %13 : vector<1x32xf32> to vector<10x32xf32>
      %33 = arith.addf %31, %32 : vector<10x32xf32>
      %c0_16 = arith.constant 0 : index
      %c0_17 = arith.constant 0 : index
      %34 = vector.load %arg18[%c0_16, %c0_17] : memref<10x10xf32, #tpu.memory_space<vmem>>, vector<10x10xf32>
      %c0_18 = arith.constant 0 : index
      %c0_19 = arith.constant 0 : index
      %35 = vector.load %arg6[%c0_18, %c0_19] : memref<1x32xf32, #tpu.memory_space<vmem>>, vector<1x32xf32>
      %c0_20 = arith.constant 0 : index
      %c0_21 = arith.constant 0 : index
      %36 = vector.load %arg7[%c0_20, %c0_21] : memref<1x32xf32, #tpu.memory_space<vmem>>, vector<1x32xf32>
      %c0_22 = arith.constant 0 : index
      %c0_23 = arith.constant 0 : index
      %37 = vector.load %arg8[%c0_22, %c0_23] : memref<32x96xbf16, #tpu.memory_space<vmem>>, vector<32x96xbf16>
      %c0_24 = arith.constant 0 : index
      %c0_25 = arith.constant 0 : index
      %38 = vector.load %arg9[%c0_24, %c0_25] : memref<1x96xf32, #tpu.memory_space<vmem>>, vector<1x96xf32>
      %c0_26 = arith.constant 0 : index
      %c0_27 = arith.constant 0 : index
      %c0_28 = arith.constant 0 : index
      %39 = vector.load %arg10[%c0_26, %c0_27, %c0_28] : memref<4x8x32xbf16, #tpu.memory_space<vmem>>, vector<4x8x32xbf16>
      %c0_29 = arith.constant 0 : index
      %c0_30 = arith.constant 0 : index
      %40 = vector.load %arg11[%c0_29, %c0_30] : memref<1x32xf32, #tpu.memory_space<vmem>>, vector<1x32xf32>
      %c0_31 = arith.constant 0 : index
      %c0_32 = arith.constant 0 : index
      %41 = vector.load %arg12[%c0_31, %c0_32] : memref<1x32xf32, #tpu.memory_space<vmem>>, vector<1x32xf32>
      %c0_33 = arith.constant 0 : index
      %c0_34 = arith.constant 0 : index
      %42 = vector.load %arg13[%c0_33, %c0_34] : memref<1x32xf32, #tpu.memory_space<vmem>>, vector<1x32xf32>
      %c0_35 = arith.constant 0 : index
      %c0_36 = arith.constant 0 : index
      %43 = vector.load %arg14[%c0_35, %c0_36] : memref<32x128xbf16, #tpu.memory_space<vmem>>, vector<32x128xbf16>
      %c0_37 = arith.constant 0 : index
      %c0_38 = arith.constant 0 : index
      %44 = vector.load %arg15[%c0_37, %c0_38] : memref<1x128xf32, #tpu.memory_space<vmem>>, vector<1x128xf32>
      %c0_39 = arith.constant 0 : index
      %c0_40 = arith.constant 0 : index
      %45 = vector.load %arg16[%c0_39, %c0_40] : memref<128x32xbf16, #tpu.memory_space<vmem>>, vector<128x32xbf16>
      %c0_41 = arith.constant 0 : index
      %c0_42 = arith.constant 0 : index
      %46 = vector.load %arg17[%c0_41, %c0_42] : memref<1x32xf32, #tpu.memory_space<vmem>>, vector<1x32xf32>
      %cst_43 = arith.constant dense<0.000000e+00> : vector<10xf32>
      %47 = vector.multi_reduction <add>, %33, %cst_43 [1] : vector<10x32xf32> to vector<10xf32>
      %48 = vector.shape_cast %47 : vector<10xf32> to vector<10x1xf32>
      %cst_44 = arith.constant 3.200000e+01 : f32
      %49 = vector.broadcast %cst_44 : f32 to vector<10x1xf32>
      %50 = arith.divf %48, %49 : vector<10x1xf32>
      %51 = vector.broadcast %50 : vector<10x1xf32> to vector<10x32xf32>
      %52 = arith.subf %33, %51 : vector<10x32xf32>
      %53 = arith.mulf %52, %52 : vector<10x32xf32>
      %cst_45 = arith.constant dense<0.000000e+00> : vector<10xf32>
      %54 = vector.multi_reduction <add>, %53, %cst_45 [1] : vector<10x32xf32> to vector<10xf32>
      %55 = vector.shape_cast %54 : vector<10xf32> to vector<10x1xf32>
      %cst_46 = arith.constant 3.200000e+01 : f32
      %56 = vector.broadcast %cst_46 : f32 to vector<10x1xf32>
      %57 = arith.divf %55, %56 : vector<10x1xf32>
      %cst_47 = arith.constant 9.99999974E-6 : f32
      %58 = vector.broadcast %cst_47 : f32 to vector<10x1xf32>
      %59 = arith.addf %57, %58 : vector<10x1xf32>
      %60 = math.rsqrt %59 : vector<10x1xf32>
      %61 = vector.broadcast %60 : vector<10x1xf32> to vector<10x32xf32>
      %62 = arith.mulf %52, %61 : vector<10x32xf32>
      %63 = vector.broadcast %35 : vector<1x32xf32> to vector<10x32xf32>
      %64 = arith.mulf %62, %63 : vector<10x32xf32>
      %65 = vector.broadcast %36 : vector<1x32xf32> to vector<10x32xf32>
      %66 = arith.addf %64, %65 : vector<10x32xf32>
      %67 = arith.truncf %66 : vector<10x32xf32> to vector<10x32xbf16>
      %cst_48 = arith.constant dense<0.000000e+00> : vector<10x96xf32>
      %68 = tpu.matmul %67, %37, %cst_48 {dimension_numbers = #tpu.dot_dimension_numbers<[1], [0], [0], [1], [0, 0, 1, 1], [], []>} : vector<10x32xbf16>, vector<32x96xbf16>, vector<10x96xf32> -> vector<10x96xf32>
      %69 = vector.broadcast %38 : vector<1x96xf32> to vector<10x96xf32>
      %70 = arith.addf %68, %69 : vector<10x96xf32>
      %71 = vector.extract_strided_slice %70 {offsets = [0, 0], sizes = [10, 8], strides = [1, 1]} : vector<10x96xf32> to vector<10x8xf32>
      %72 = vector.extract_strided_slice %70 {offsets = [0, 8], sizes = [10, 8], strides = [1, 1]} : vector<10x96xf32> to vector<10x8xf32>
      %73 = vector.extract_strided_slice %70 {offsets = [0, 16], sizes = [10, 8], strides = [1, 1]} : vector<10x96xf32> to vector<10x8xf32>
      %74 = vector.extract_strided_slice %70 {offsets = [0, 24], sizes = [10, 8], strides = [1, 1]} : vector<10x96xf32> to vector<10x8xf32>
      %75 = vector.shape_cast %71 : vector<10x8xf32> to vector<1x10x8xf32>
      %76 = vector.shape_cast %72 : vector<10x8xf32> to vector<1x10x8xf32>
      %77 = vector.shape_cast %73 : vector<10x8xf32> to vector<1x10x8xf32>
      %78 = vector.shape_cast %74 : vector<10x8xf32> to vector<1x10x8xf32>
      %79 = tpu.concatenate %75, %76, %77, %78 in 0 : vector<1x10x8xf32>, vector<1x10x8xf32>, vector<1x10x8xf32>, vector<1x10x8xf32> -> vector<4x10x8xf32>
      %80 = vector.extract_strided_slice %70 {offsets = [0, 32], sizes = [10, 8], strides = [1, 1]} : vector<10x96xf32> to vector<10x8xf32>
      %81 = vector.extract_strided_slice %70 {offsets = [0, 40], sizes = [10, 8], strides = [1, 1]} : vector<10x96xf32> to vector<10x8xf32>
      %82 = vector.extract_strided_slice %70 {offsets = [0, 48], sizes = [10, 8], strides = [1, 1]} : vector<10x96xf32> to vector<10x8xf32>
      %83 = vector.extract_strided_slice %70 {offsets = [0, 56], sizes = [10, 8], strides = [1, 1]} : vector<10x96xf32> to vector<10x8xf32>
      %84 = vector.shape_cast %80 : vector<10x8xf32> to vector<1x10x8xf32>
      %85 = vector.shape_cast %81 : vector<10x8xf32> to vector<1x10x8xf32>
      %86 = vector.shape_cast %82 : vector<10x8xf32> to vector<1x10x8xf32>
      %87 = vector.shape_cast %83 : vector<10x8xf32> to vector<1x10x8xf32>
      %88 = tpu.concatenate %84, %85, %86, %87 in 0 : vector<1x10x8xf32>, vector<1x10x8xf32>, vector<1x10x8xf32>, vector<1x10x8xf32> -> vector<4x10x8xf32>
      %89 = vector.extract_strided_slice %70 {offsets = [0, 64], sizes = [10, 8], strides = [1, 1]} : vector<10x96xf32> to vector<10x8xf32>
      %90 = vector.extract_strided_slice %70 {offsets = [0, 72], sizes = [10, 8], strides = [1, 1]} : vector<10x96xf32> to vector<10x8xf32>
      %91 = vector.extract_strided_slice %70 {offsets = [0, 80], sizes = [10, 8], strides = [1, 1]} : vector<10x96xf32> to vector<10x8xf32>
      %92 = vector.extract_strided_slice %70 {offsets = [0, 88], sizes = [10, 8], strides = [1, 1]} : vector<10x96xf32> to vector<10x8xf32>
      %93 = vector.shape_cast %89 : vector<10x8xf32> to vector<1x10x8xf32>
      %94 = vector.shape_cast %90 : vector<10x8xf32> to vector<1x10x8xf32>
      %95 = vector.shape_cast %91 : vector<10x8xf32> to vector<1x10x8xf32>
      %96 = vector.shape_cast %92 : vector<10x8xf32> to vector<1x10x8xf32>
      %97 = tpu.concatenate %93, %94, %95, %96 in 0 : vector<1x10x8xf32>, vector<1x10x8xf32>, vector<1x10x8xf32>, vector<1x10x8xf32> -> vector<4x10x8xf32>
      %98 = arith.truncf %79 : vector<4x10x8xf32> to vector<4x10x8xbf16>
      %99 = arith.truncf %88 : vector<4x10x8xf32> to vector<4x10x8xbf16>
      "tpu.trace_start"() <{level = 10 : i32, message = "hqd,hkd->hqk"}> : () -> ()
      %cst_49 = arith.constant dense<0.000000e+00> : vector<4x10x10xf32>
      %100 = tpu.matmul %98, %99, %cst_49 {dimension_numbers = #tpu.dot_dimension_numbers<[2], [2], [1], [1], [0, 0, 0, 1, 1, 1], [0], [0]>} : vector<4x10x8xbf16>, vector<4x10x8xbf16>, vector<4x10x10xf32> -> vector<4x10x10xf32>
      "tpu.trace_stop"() : () -> ()
      %cst_50 = arith.constant 0.353553385 : f32
      %101 = vector.broadcast %cst_50 : f32 to vector<4x10x10xf32>
      %102 = arith.mulf %100, %101 : vector<4x10x10xf32>
      %103 = vector.shape_cast %34 : vector<10x10xf32> to vector<1x10x10xf32>
      %104 = vector.broadcast %103 : vector<1x10x10xf32> to vector<4x10x10xf32>
      %105 = arith.addf %102, %104 : vector<4x10x10xf32>
      %cst_51 = arith.constant dense<0xFF800000> : vector<4x10xf32>
      %106 = vector.multi_reduction <maximumf>, %105, %cst_51 [2] : vector<4x10x10xf32> to vector<4x10xf32>
      %107 = vector.shape_cast %106 : vector<4x10xf32> to vector<4x10x1xf32>
      %108 = vector.broadcast %107 : vector<4x10x1xf32> to vector<4x10x10xf32>
      %109 = arith.subf %105, %108 : vector<4x10x10xf32>
      %110 = math.exp %109 : vector<4x10x10xf32>
      %cst_52 = arith.constant dense<0.000000e+00> : vector<4x10xf32>
      %111 = vector.multi_reduction <add>, %110, %cst_52 [2] : vector<4x10x10xf32> to vector<4x10xf32>
      %112 = vector.shape_cast %111 : vector<4x10xf32> to vector<4x10x1xf32>
      %113 = tpu.reciprocal %112 {approx = true} : vector<4x10x1xf32> -> vector<4x10x1xf32>
      %114 = vector.broadcast %113 : vector<4x10x1xf32> to vector<4x10x10xf32>
      %115 = arith.mulf %110, %114 : vector<4x10x10xf32>
      %116 = arith.truncf %115 : vector<4x10x10xf32> to vector<4x10x10xbf16>
      %117 = arith.truncf %97 : vector<4x10x8xf32> to vector<4x10x8xbf16>
      "tpu.trace_start"() <{level = 10 : i32, message = "hqk,hkd->hqd"}> : () -> ()
      %cst_53 = arith.constant dense<0.000000e+00> : vector<4x10x8xf32>
      %118 = tpu.matmul %116, %117, %cst_53 {dimension_numbers = #tpu.dot_dimension_numbers<[2], [1], [1], [2], [0, 0, 0, 1, 1, 2], [0], [0]>} : vector<4x10x10xbf16>, vector<4x10x8xbf16>, vector<4x10x8xf32> -> vector<4x10x8xf32>
      "tpu.trace_stop"() : () -> ()
      %119 = arith.truncf %118 : vector<4x10x8xf32> to vector<4x10x8xbf16>
      "tpu.trace_start"() <{level = 10 : i32, message = "hqd,hde->hqe"}> : () -> ()
      %cst_54 = arith.constant dense<0.000000e+00> : vector<4x10x32xf32>
      %120 = tpu.matmul %119, %39, %cst_54 {dimension_numbers = #tpu.dot_dimension_numbers<[2], [1], [1], [2], [0, 0, 0, 1, 1, 2], [0], [0]>} : vector<4x10x8xbf16>, vector<4x8x32xbf16>, vector<4x10x32xf32> -> vector<4x10x32xf32>
      "tpu.trace_stop"() : () -> ()
      %cst_55 = arith.constant dense<0.000000e+00> : vector<10x32xf32>
      %121 = vector.multi_reduction <add>, %120, %cst_55 [0] : vector<4x10x32xf32> to vector<10x32xf32>
      %122 = arith.addf %33, %121 : vector<10x32xf32>
      %123 = vector.broadcast %40 : vector<1x32xf32> to vector<10x32xf32>
      %124 = arith.addf %122, %123 : vector<10x32xf32>
      %cst_56 = arith.constant dense<0.000000e+00> : vector<10xf32>
      %125 = vector.multi_reduction <add>, %124, %cst_56 [1] : vector<10x32xf32> to vector<10xf32>
      %126 = vector.shape_cast %125 : vector<10xf32> to vector<10x1xf32>
      %cst_57 = arith.constant 3.200000e+01 : f32
      %127 = vector.broadcast %cst_57 : f32 to vector<10x1xf32>
      %128 = arith.divf %126, %127 : vector<10x1xf32>
      %129 = vector.broadcast %128 : vector<10x1xf32> to vector<10x32xf32>
      %130 = arith.subf %124, %129 : vector<10x32xf32>
      %131 = arith.mulf %130, %130 : vector<10x32xf32>
      %cst_58 = arith.constant dense<0.000000e+00> : vector<10xf32>
      %132 = vector.multi_reduction <add>, %131, %cst_58 [1] : vector<10x32xf32> to vector<10xf32>
      %133 = vector.shape_cast %132 : vector<10xf32> to vector<10x1xf32>
      %cst_59 = arith.constant 3.200000e+01 : f32
      %134 = vector.broadcast %cst_59 : f32 to vector<10x1xf32>
      %135 = arith.divf %133, %134 : vector<10x1xf32>
      %cst_60 = arith.constant 9.99999974E-6 : f32
      %136 = vector.broadcast %cst_60 : f32 to vector<10x1xf32>
      %137 = arith.addf %135, %136 : vector<10x1xf32>
      %138 = math.rsqrt %137 : vector<10x1xf32>
      %139 = vector.broadcast %138 : vector<10x1xf32> to vector<10x32xf32>
      %140 = arith.mulf %130, %139 : vector<10x32xf32>
      %141 = vector.broadcast %41 : vector<1x32xf32> to vector<10x32xf32>
      %142 = arith.mulf %140, %141 : vector<10x32xf32>
      %143 = vector.broadcast %42 : vector<1x32xf32> to vector<10x32xf32>
      %144 = arith.addf %142, %143 : vector<10x32xf32>
      %145 = arith.truncf %144 : vector<10x32xf32> to vector<10x32xbf16>
      %cst_61 = arith.constant dense<0.000000e+00> : vector<10x128xf32>
      %146 = tpu.matmul %145, %43, %cst_61 {dimension_numbers = #tpu.dot_dimension_numbers<[1], [0], [0], [1], [0, 0, 1, 1], [], []>} : vector<10x32xbf16>, vector<32x128xbf16>, vector<10x128xf32> -> vector<10x128xf32>
      %147 = vector.broadcast %44 : vector<1x128xf32> to vector<10x128xf32>
      %148 = arith.addf %146, %147 : vector<10x128xf32>
      %cst_62 = arith.constant 1.702000e+00 : f32
      %149 = vector.broadcast %cst_62 : f32 to vector<10x128xf32>
      %150 = arith.mulf %149, %148 : vector<10x128xf32>
      %151 = arith.negf %150 : vector<10x128xf32>
      %152 = math.exp %151 : vector<10x128xf32>
      %cst_63 = arith.constant 1.000000e+00 : f32
      %153 = vector.broadcast %cst_63 : f32 to vector<10x128xf32>
      %154 = arith.addf %153, %152 : vector<10x128xf32>
      %155 = arith.divf %153, %154 : vector<10x128xf32>
      %156 = arith.mulf %148, %155 : vector<10x128xf32>
      %157 = arith.truncf %156 : vector<10x128xf32> to vector<10x128xbf16>
      %cst_64 = arith.constant dense<0.000000e+00> : vector<10x32xf32>
      %158 = tpu.matmul %157, %45, %cst_64 {dimension_numbers = #tpu.dot_dimension_numbers<[1], [0], [0], [1], [0, 0, 1, 1], [], []>} : vector<10x128xbf16>, vector<128x32xbf16>, vector<10x32xf32> -> vector<10x32xf32>
      %159 = vector.broadcast %46 : vector<1x32xf32> to vector<10x32xf32>
      %160 = arith.addf %158, %159 : vector<10x32xf32>
      %161 = arith.addf %124, %160 : vector<10x32xf32>
      %c0_65 = arith.constant 0 : index
      %c0_66 = arith.constant 0 : index
      %162 = vector.load %arg22[%c0_65, %c0_66] : memref<2x10xf32, #tpu.memory_space<vmem>>, vector<2x10xf32>
      %cst_67 = arith.constant dense<0.000000e+00> : vector<2x32xf32>
      %163 = tpu.matmul %162, %161, %cst_67 {dimension_numbers = #tpu.dot_dimension_numbers<[1], [0], [0], [1], [0, 0, 1, 1], [], []>} : vector<2x10xf32>, vector<10x32xf32>, vector<2x32xf32> -> vector<2x32xf32>
      %c0_68 = arith.constant 0 : index
      %c0_69 = arith.constant 0 : index
      %164 = vector.load %arg19[%c0_68, %c0_69] : memref<1x32xf32, #tpu.memory_space<vmem>>, vector<1x32xf32>
      %c0_70 = arith.constant 0 : index
      %c0_71 = arith.constant 0 : index
      %165 = vector.load %arg20[%c0_70, %c0_71] : memref<1x32xf32, #tpu.memory_space<vmem>>, vector<1x32xf32>
      %cst_72 = arith.constant dense<0.000000e+00> : vector<2xf32>
      %166 = vector.multi_reduction <add>, %163, %cst_72 [1] : vector<2x32xf32> to vector<2xf32>
      %167 = vector.shape_cast %166 : vector<2xf32> to vector<2x1xf32>
      %cst_73 = arith.constant 3.200000e+01 : f32
      %168 = vector.broadcast %cst_73 : f32 to vector<2x1xf32>
      %169 = arith.divf %167, %168 : vector<2x1xf32>
      %170 = vector.broadcast %169 : vector<2x1xf32> to vector<2x32xf32>
      %171 = arith.subf %163, %170 : vector<2x32xf32>
      %172 = arith.mulf %171, %171 : vector<2x32xf32>
      %cst_74 = arith.constant dense<0.000000e+00> : vector<2xf32>
      %173 = vector.multi_reduction <add>, %172, %cst_74 [1] : vector<2x32xf32> to vector<2xf32>
      %174 = vector.shape_cast %173 : vector<2xf32> to vector<2x1xf32>
      %cst_75 = arith.constant 3.200000e+01 : f32
      %175 = vector.broadcast %cst_75 : f32 to vector<2x1xf32>
      %176 = arith.divf %174, %175 : vector<2x1xf32>
      %cst_76 = arith.constant 9.99999974E-6 : f32
      %177 = vector.broadcast %cst_76 : f32 to vector<2x1xf32>
      %178 = arith.addf %176, %177 : vector<2x1xf32>
      %179 = math.rsqrt %178 : vector<2x1xf32>
      %180 = vector.broadcast %179 : vector<2x1xf32> to vector<2x32xf32>
      %181 = arith.mulf %171, %180 : vector<2x32xf32>
      %182 = vector.broadcast %164 : vector<1x32xf32> to vector<2x32xf32>
      %183 = arith.mulf %181, %182 : vector<2x32xf32>
      %184 = vector.broadcast %165 : vector<1x32xf32> to vector<2x32xf32>
      %185 = arith.addf %183, %184 : vector<2x32xf32>
      %c0_77 = arith.constant 0 : index
      %c0_78 = arith.constant 0 : index
      %186 = vector.load %arg21[%c0_77, %c0_78] : memref<32x32xbf16, #tpu.memory_space<vmem>>, vector<32x32xbf16>
      %187 = arith.truncf %185 : vector<2x32xf32> to vector<2x32xbf16>
      %cst_79 = arith.constant dense<0.000000e+00> : vector<2x32xf32>
      %188 = tpu.matmul %187, %186, %cst_79 {dimension_numbers = #tpu.dot_dimension_numbers<[1], [0], [0], [1], [0, 0, 1, 1], [], []>} : vector<2x32xbf16>, vector<32x32xbf16>, vector<2x32xf32> -> vector<2x32xf32>
      %189 = arith.mulf %188, %188 : vector<2x32xf32>
      %cst_80 = arith.constant dense<0.000000e+00> : vector<2xf32>
      %190 = vector.multi_reduction <add>, %189, %cst_80 [1] : vector<2x32xf32> to vector<2xf32>
      %191 = vector.shape_cast %190 : vector<2xf32> to vector<2x1xf32>
      %cst_81 = arith.constant 9.99999996E-13 : f32
      %192 = vector.broadcast %cst_81 : f32 to vector<2x1xf32>
      %193 = arith.addf %191, %192 : vector<2x1xf32>
      %194 = math.rsqrt %193 : vector<2x1xf32>
      %195 = vector.broadcast %194 : vector<2x1xf32> to vector<2x32xf32>
      %196 = arith.mulf %188, %195 : vector<2x32xf32>
      %c0_82 = arith.constant 0 : index
      %c0_83 = arith.constant 0 : index
      %c0_84 = arith.constant 0 : index
      %197 = vector.load %arg42[%c0_82, %c0_83, %c0_84] : memref<1x3x32xf32, #tpu.memory_space<vmem>>, vector<1x2x32xf32>
      %198 = vector.shape_cast %197 : vector<1x2x32xf32> to vector<2x32xf32>
      %199 = vector.shape_cast %196 : vector<2x32xf32> to vector<1x2x32xf32>
      tpu.vector_store %arg42[%c0_82, %c0_83, %c0_84], %199 {strides = array<i32>} : memref<1x3x32xf32, #tpu.memory_space<vmem>>, vector<1x2x32xf32>,
      %cst_85 = arith.constant 0.000000e+00 : f32
      %200 = vector.broadcast %cst_85 : f32 to vector<1x32xf32>
      %c0_86 = arith.constant 0 : index
      %c2 = arith.constant 2 : index
      %c0_87 = arith.constant 0 : index
      %201 = vector.load %arg42[%c0_86, %c2, %c0_87] : memref<1x3x32xf32, #tpu.memory_space<vmem>>, vector<1x1x32xf32>
      %202 = vector.shape_cast %201 : vector<1x1x32xf32> to vector<1x32xf32>
      %203 = vector.shape_cast %200 : vector<1x32xf32> to vector<1x1x32xf32>
      tpu.vector_store %arg42[%c0_86, %c2, %c0_87], %203 {strides = array<i32>} : memref<1x3x32xf32, #tpu.memory_space<vmem>>, vector<1x1x32xf32>,
    } else {
    }
    %c1_i32 = arith.constant 1 : i32
    %3 = arith.cmpi eq, %arg0, %c1_i32 : i32
    %4 = arith.extui %3 : i1 to i32
    %c0_i32_1 = arith.constant 0 : i32
    %5 = arith.cmpi ne, %4, %c0_i32_1 : i32
    scf.if %5 {
      %c0 = arith.constant 0 : index
      %c0_2 = arith.constant 0 : index
      %6 = vector.load %arg23[%c0, %c0_2] : memref<48x32xf32, #tpu.memory_space<vmem>>, vector<48x32xf32>
      %c0_3 = arith.constant 0 : index
      %c0_4 = arith.constant 0 : index
      %7 = vector.load %arg24[%c0_3, %c0_4] : memref<48x32xf32, #tpu.memory_space<vmem>>, vector<48x32xf32>
      %8 = arith.addf %6, %7 : vector<48x32xf32>
      %c0_5 = arith.constant 0 : index
      %c0_6 = arith.constant 0 : index
      %9 = vector.load %arg37[%c0_5, %c0_6] : memref<48x48xf32, #tpu.memory_space<vmem>>, vector<48x48xf32>
      %c0_7 = arith.constant 0 : index
      %c0_8 = arith.constant 0 : index
      %10 = vector.load %arg25[%c0_7, %c0_8] : memref<1x32xf32, #tpu.memory_space<vmem>>, vector<1x32xf32>
      %c0_9 = arith.constant 0 : index
      %c0_10 = arith.constant 0 : index
      %11 = vector.load %arg26[%c0_9, %c0_10] : memref<1x32xf32, #tpu.memory_space<vmem>>, vector<1x32xf32>
      %c0_11 = arith.constant 0 : index
      %c0_12 = arith.constant 0 : index
      %12 = vector.load %arg27[%c0_11, %c0_12] : memref<32x96xbf16, #tpu.memory_space<vmem>>, vector<32x96xbf16>
      %c0_13 = arith.constant 0 : index
      %c0_14 = arith.constant 0 : index
      %13 = vector.load %arg28[%c0_13, %c0_14] : memref<1x96xf32, #tpu.memory_space<vmem>>, vector<1x96xf32>
      %c0_15 = arith.constant 0 : index
      %c0_16 = arith.constant 0 : index
      %c0_17 = arith.constant 0 : index
      %14 = vector.load %arg29[%c0_15, %c0_16, %c0_17] : memref<4x8x32xbf16, #tpu.memory_space<vmem>>, vector<4x8x32xbf16>
      %c0_18 = arith.constant 0 : index
      %c0_19 = arith.constant 0 : index
      %15 = vector.load %arg30[%c0_18, %c0_19] : memref<1x32xf32, #tpu.memory_space<vmem>>, vector<1x32xf32>
      %c0_20 = arith.constant 0 : index
      %c0_21 = arith.constant 0 : index
      %16 = vector.load %arg31[%c0_20, %c0_21] : memref<1x32xf32, #tpu.memory_space<vmem>>, vector<1x32xf32>
      %c0_22 = arith.constant 0 : index
      %c0_23 = arith.constant 0 : index
      %17 = vector.load %arg32[%c0_22, %c0_23] : memref<1x32xf32, #tpu.memory_space<vmem>>, vector<1x32xf32>
      %c0_24 = arith.constant 0 : index
      %c0_25 = arith.constant 0 : index
      %18 = vector.load %arg33[%c0_24, %c0_25] : memref<32x128xbf16, #tpu.memory_space<vmem>>, vector<32x128xbf16>
      %c0_26 = arith.constant 0 : index
      %c0_27 = arith.constant 0 : index
      %19 = vector.load %arg34[%c0_26, %c0_27] : memref<1x128xf32, #tpu.memory_space<vmem>>, vector<1x128xf32>
      %c0_28 = arith.constant 0 : index
      %c0_29 = arith.constant 0 : index
      %20 = vector.load %arg35[%c0_28, %c0_29] : memref<128x32xbf16, #tpu.memory_space<vmem>>, vector<128x32xbf16>
      %c0_30 = arith.constant 0 : index
      %c0_31 = arith.constant 0 : index
      %21 = vector.load %arg36[%c0_30, %c0_31] : memref<1x32xf32, #tpu.memory_space<vmem>>, vector<1x32xf32>
      %cst = arith.constant dense<0.000000e+00> : vector<48xf32>
      %22 = vector.multi_reduction <add>, %8, %cst [1] : vector<48x32xf32> to vector<48xf32>
      %23 = vector.shape_cast %22 : vector<48xf32> to vector<48x1xf32>
      %cst_32 = arith.constant 3.200000e+01 : f32
      %24 = vector.broadcast %cst_32 : f32 to vector<48x1xf32>
      %25 = arith.divf %23, %24 : vector<48x1xf32>
      %26 = vector.broadcast %25 : vector<48x1xf32> to vector<48x32xf32>
      %27 = arith.subf %8, %26 : vector<48x32xf32>
      %28 = arith.mulf %27, %27 : vector<48x32xf32>
      %cst_33 = arith.constant dense<0.000000e+00> : vector<48xf32>
      %29 = vector.multi_reduction <add>, %28, %cst_33 [1] : vector<48x32xf32> to vector<48xf32>
      %30 = vector.shape_cast %29 : vector<48xf32> to vector<48x1xf32>
      %cst_34 = arith.constant 3.200000e+01 : f32
      %31 = vector.broadcast %cst_34 : f32 to vector<48x1xf32>
      %32 = arith.divf %30, %31 : vector<48x1xf32>
      %cst_35 = arith.constant 9.99999974E-6 : f32
      %33 = vector.broadcast %cst_35 : f32 to vector<48x1xf32>
      %34 = arith.addf %32, %33 : vector<48x1xf32>
      %35 = math.rsqrt %34 : vector<48x1xf32>
      %36 = vector.broadcast %35 : vector<48x1xf32> to vector<48x32xf32>
      %37 = arith.mulf %27, %36 : vector<48x32xf32>
      %38 = vector.broadcast %10 : vector<1x32xf32> to vector<48x32xf32>
      %39 = arith.mulf %37, %38 : vector<48x32xf32>
      %40 = vector.broadcast %11 : vector<1x32xf32> to vector<48x32xf32>
      %41 = arith.addf %39, %40 : vector<48x32xf32>
      %42 = arith.truncf %41 : vector<48x32xf32> to vector<48x32xbf16>
      %cst_36 = arith.constant dense<0.000000e+00> : vector<48x96xf32>
      %43 = tpu.matmul %42, %12, %cst_36 {dimension_numbers = #tpu.dot_dimension_numbers<[1], [0], [0], [1], [0, 0, 1, 1], [], []>} : vector<48x32xbf16>, vector<32x96xbf16>, vector<48x96xf32> -> vector<48x96xf32>
      %44 = vector.broadcast %13 : vector<1x96xf32> to vector<48x96xf32>
      %45 = arith.addf %43, %44 : vector<48x96xf32>
      %46 = vector.extract_strided_slice %45 {offsets = [0, 0], sizes = [48, 8], strides = [1, 1]} : vector<48x96xf32> to vector<48x8xf32>
      %47 = vector.extract_strided_slice %45 {offsets = [0, 8], sizes = [48, 8], strides = [1, 1]} : vector<48x96xf32> to vector<48x8xf32>
      %48 = vector.extract_strided_slice %45 {offsets = [0, 16], sizes = [48, 8], strides = [1, 1]} : vector<48x96xf32> to vector<48x8xf32>
      %49 = vector.extract_strided_slice %45 {offsets = [0, 24], sizes = [48, 8], strides = [1, 1]} : vector<48x96xf32> to vector<48x8xf32>
      %50 = vector.shape_cast %46 : vector<48x8xf32> to vector<1x48x8xf32>
      %51 = vector.shape_cast %47 : vector<48x8xf32> to vector<1x48x8xf32>
      %52 = vector.shape_cast %48 : vector<48x8xf32> to vector<1x48x8xf32>
      %53 = vector.shape_cast %49 : vector<48x8xf32> to vector<1x48x8xf32>
      %54 = tpu.concatenate %50, %51, %52, %53 in 0 : vector<1x48x8xf32>, vector<1x48x8xf32>, vector<1x48x8xf32>, vector<1x48x8xf32> -> vector<4x48x8xf32>
      %55 = vector.extract_strided_slice %45 {offsets = [0, 32], sizes = [48, 8], strides = [1, 1]} : vector<48x96xf32> to vector<48x8xf32>
      %56 = vector.extract_strided_slice %45 {offsets = [0, 40], sizes = [48, 8], strides = [1, 1]} : vector<48x96xf32> to vector<48x8xf32>
      %57 = vector.extract_strided_slice %45 {offsets = [0, 48], sizes = [48, 8], strides = [1, 1]} : vector<48x96xf32> to vector<48x8xf32>
      %58 = vector.extract_strided_slice %45 {offsets = [0, 56], sizes = [48, 8], strides = [1, 1]} : vector<48x96xf32> to vector<48x8xf32>
      %59 = vector.shape_cast %55 : vector<48x8xf32> to vector<1x48x8xf32>
      %60 = vector.shape_cast %56 : vector<48x8xf32> to vector<1x48x8xf32>
      %61 = vector.shape_cast %57 : vector<48x8xf32> to vector<1x48x8xf32>
      %62 = vector.shape_cast %58 : vector<48x8xf32> to vector<1x48x8xf32>
      %63 = tpu.concatenate %59, %60, %61, %62 in 0 : vector<1x48x8xf32>, vector<1x48x8xf32>, vector<1x48x8xf32>, vector<1x48x8xf32> -> vector<4x48x8xf32>
      %64 = vector.extract_strided_slice %45 {offsets = [0, 64], sizes = [48, 8], strides = [1, 1]} : vector<48x96xf32> to vector<48x8xf32>
      %65 = vector.extract_strided_slice %45 {offsets = [0, 72], sizes = [48, 8], strides = [1, 1]} : vector<48x96xf32> to vector<48x8xf32>
      %66 = vector.extract_strided_slice %45 {offsets = [0, 80], sizes = [48, 8], strides = [1, 1]} : vector<48x96xf32> to vector<48x8xf32>
      %67 = vector.extract_strided_slice %45 {offsets = [0, 88], sizes = [48, 8], strides = [1, 1]} : vector<48x96xf32> to vector<48x8xf32>
      %68 = vector.shape_cast %64 : vector<48x8xf32> to vector<1x48x8xf32>
      %69 = vector.shape_cast %65 : vector<48x8xf32> to vector<1x48x8xf32>
      %70 = vector.shape_cast %66 : vector<48x8xf32> to vector<1x48x8xf32>
      %71 = vector.shape_cast %67 : vector<48x8xf32> to vector<1x48x8xf32>
      %72 = tpu.concatenate %68, %69, %70, %71 in 0 : vector<1x48x8xf32>, vector<1x48x8xf32>, vector<1x48x8xf32>, vector<1x48x8xf32> -> vector<4x48x8xf32>
      %73 = arith.truncf %54 : vector<4x48x8xf32> to vector<4x48x8xbf16>
      %74 = arith.truncf %63 : vector<4x48x8xf32> to vector<4x48x8xbf16>
      "tpu.trace_start"() <{level = 10 : i32, message = "hqd,hkd->hqk"}> : () -> ()
      %cst_37 = arith.constant dense<0.000000e+00> : vector<4x48x48xf32>
      %75 = tpu.matmul %73, %74, %cst_37 {dimension_numbers = #tpu.dot_dimension_numbers<[2], [2], [1], [1], [0, 0, 0, 1, 1, 1], [0], [0]>} : vector<4x48x8xbf16>, vector<4x48x8xbf16>, vector<4x48x48xf32> -> vector<4x48x48xf32>
      "tpu.trace_stop"() : () -> ()
      %cst_38 = arith.constant 0.353553385 : f32
      %76 = vector.broadcast %cst_38 : f32 to vector<4x48x48xf32>
      %77 = arith.mulf %75, %76 : vector<4x48x48xf32>
      %78 = vector.shape_cast %9 : vector<48x48xf32> to vector<1x48x48xf32>
      %79 = vector.broadcast %78 : vector<1x48x48xf32> to vector<4x48x48xf32>
      %80 = arith.addf %77, %79 : vector<4x48x48xf32>
      %cst_39 = arith.constant dense<0xFF800000> : vector<4x48xf32>
      %81 = vector.multi_reduction <maximumf>, %80, %cst_39 [2] : vector<4x48x48xf32> to vector<4x48xf32>
      %82 = vector.shape_cast %81 : vector<4x48xf32> to vector<4x48x1xf32>
      %83 = vector.broadcast %82 : vector<4x48x1xf32> to vector<4x48x48xf32>
      %84 = arith.subf %80, %83 : vector<4x48x48xf32>
      %85 = math.exp %84 : vector<4x48x48xf32>
      %cst_40 = arith.constant dense<0.000000e+00> : vector<4x48xf32>
      %86 = vector.multi_reduction <add>, %85, %cst_40 [2] : vector<4x48x48xf32> to vector<4x48xf32>
      %87 = vector.shape_cast %86 : vector<4x48xf32> to vector<4x48x1xf32>
      %88 = tpu.reciprocal %87 {approx = true} : vector<4x48x1xf32> -> vector<4x48x1xf32>
      %89 = vector.broadcast %88 : vector<4x48x1xf32> to vector<4x48x48xf32>
      %90 = arith.mulf %85, %89 : vector<4x48x48xf32>
      %91 = arith.truncf %90 : vector<4x48x48xf32> to vector<4x48x48xbf16>
      %92 = arith.truncf %72 : vector<4x48x8xf32> to vector<4x48x8xbf16>
      "tpu.trace_start"() <{level = 10 : i32, message = "hqk,hkd->hqd"}> : () -> ()
      %cst_41 = arith.constant dense<0.000000e+00> : vector<4x48x8xf32>
      %93 = tpu.matmul %91, %92, %cst_41 {dimension_numbers = #tpu.dot_dimension_numbers<[2], [1], [1], [2], [0, 0, 0, 1, 1, 2], [0], [0]>} : vector<4x48x48xbf16>, vector<4x48x8xbf16>, vector<4x48x8xf32> -> vector<4x48x8xf32>
      "tpu.trace_stop"() : () -> ()
      %94 = arith.truncf %93 : vector<4x48x8xf32> to vector<4x48x8xbf16>
      "tpu.trace_start"() <{level = 10 : i32, message = "hqd,hde->hqe"}> : () -> ()
      %cst_42 = arith.constant dense<0.000000e+00> : vector<4x48x32xf32>
      %95 = tpu.matmul %94, %14, %cst_42 {dimension_numbers = #tpu.dot_dimension_numbers<[2], [1], [1], [2], [0, 0, 0, 1, 1, 2], [0], [0]>} : vector<4x48x8xbf16>, vector<4x8x32xbf16>, vector<4x48x32xf32> -> vector<4x48x32xf32>
      "tpu.trace_stop"() : () -> ()
      %cst_43 = arith.constant dense<0.000000e+00> : vector<48x32xf32>
      %96 = vector.multi_reduction <add>, %95, %cst_43 [0] : vector<4x48x32xf32> to vector<48x32xf32>
      %97 = arith.addf %8, %96 : vector<48x32xf32>
      %98 = vector.broadcast %15 : vector<1x32xf32> to vector<48x32xf32>
      %99 = arith.addf %97, %98 : vector<48x32xf32>
      %cst_44 = arith.constant dense<0.000000e+00> : vector<48xf32>
      %100 = vector.multi_reduction <add>, %99, %cst_44 [1] : vector<48x32xf32> to vector<48xf32>
      %101 = vector.shape_cast %100 : vector<48xf32> to vector<48x1xf32>
      %cst_45 = arith.constant 3.200000e+01 : f32
      %102 = vector.broadcast %cst_45 : f32 to vector<48x1xf32>
      %103 = arith.divf %101, %102 : vector<48x1xf32>
      %104 = vector.broadcast %103 : vector<48x1xf32> to vector<48x32xf32>
      %105 = arith.subf %99, %104 : vector<48x32xf32>
      %106 = arith.mulf %105, %105 : vector<48x32xf32>
      %cst_46 = arith.constant dense<0.000000e+00> : vector<48xf32>
      %107 = vector.multi_reduction <add>, %106, %cst_46 [1] : vector<48x32xf32> to vector<48xf32>
      %108 = vector.shape_cast %107 : vector<48xf32> to vector<48x1xf32>
      %cst_47 = arith.constant 3.200000e+01 : f32
      %109 = vector.broadcast %cst_47 : f32 to vector<48x1xf32>
      %110 = arith.divf %108, %109 : vector<48x1xf32>
      %cst_48 = arith.constant 9.99999974E-6 : f32
      %111 = vector.broadcast %cst_48 : f32 to vector<48x1xf32>
      %112 = arith.addf %110, %111 : vector<48x1xf32>
      %113 = math.rsqrt %112 : vector<48x1xf32>
      %114 = vector.broadcast %113 : vector<48x1xf32> to vector<48x32xf32>
      %115 = arith.mulf %105, %114 : vector<48x32xf32>
      %116 = vector.broadcast %16 : vector<1x32xf32> to vector<48x32xf32>
      %117 = arith.mulf %115, %116 : vector<48x32xf32>
      %118 = vector.broadcast %17 : vector<1x32xf32> to vector<48x32xf32>
      %119 = arith.addf %117, %118 : vector<48x32xf32>
      %120 = arith.truncf %119 : vector<48x32xf32> to vector<48x32xbf16>
      %cst_49 = arith.constant dense<0.000000e+00> : vector<48x128xf32>
      %121 = tpu.matmul %120, %18, %cst_49 {dimension_numbers = #tpu.dot_dimension_numbers<[1], [0], [0], [1], [0, 0, 1, 1], [], []>} : vector<48x32xbf16>, vector<32x128xbf16>, vector<48x128xf32> -> vector<48x128xf32>
      %122 = vector.broadcast %19 : vector<1x128xf32> to vector<48x128xf32>
      %123 = arith.addf %121, %122 : vector<48x128xf32>
      %cst_50 = arith.constant 1.702000e+00 : f32
      %124 = vector.broadcast %cst_50 : f32 to vector<48x128xf32>
      %125 = arith.mulf %124, %123 : vector<48x128xf32>
      %126 = arith.negf %125 : vector<48x128xf32>
      %127 = math.exp %126 : vector<48x128xf32>
      %cst_51 = arith.constant 1.000000e+00 : f32
      %128 = vector.broadcast %cst_51 : f32 to vector<48x128xf32>
      %129 = arith.addf %128, %127 : vector<48x128xf32>
      %130 = arith.divf %128, %129 : vector<48x128xf32>
      %131 = arith.mulf %123, %130 : vector<48x128xf32>
      %132 = arith.truncf %131 : vector<48x128xf32> to vector<48x128xbf16>
      %cst_52 = arith.constant dense<0.000000e+00> : vector<48x32xf32>
      %133 = tpu.matmul %132, %20, %cst_52 {dimension_numbers = #tpu.dot_dimension_numbers<[1], [0], [0], [1], [0, 0, 1, 1], [], []>} : vector<48x128xbf16>, vector<128x32xbf16>, vector<48x32xf32> -> vector<48x32xf32>
      %134 = vector.broadcast %21 : vector<1x32xf32> to vector<48x32xf32>
      %135 = arith.addf %133, %134 : vector<48x32xf32>
      %136 = arith.addf %99, %135 : vector<48x32xf32>
      %c0_53 = arith.constant 0 : index
      %c0_54 = arith.constant 0 : index
      %137 = vector.load %arg38[%c0_53, %c0_54] : memref<1x32xf32, #tpu.memory_space<vmem>>, vector<1x32xf32>
      %c0_55 = arith.constant 0 : index
      %c0_56 = arith.constant 0 : index
      %138 = vector.load %arg39[%c0_55, %c0_56] : memref<1x32xf32, #tpu.memory_space<vmem>>, vector<1x32xf32>
      %cst_57 = arith.constant dense<0.000000e+00> : vector<48xf32>
      %139 = vector.multi_reduction <add>, %136, %cst_57 [1] : vector<48x32xf32> to vector<48xf32>
      %140 = vector.shape_cast %139 : vector<48xf32> to vector<48x1xf32>
      %cst_58 = arith.constant 3.200000e+01 : f32
      %141 = vector.broadcast %cst_58 : f32 to vector<48x1xf32>
      %142 = arith.divf %140, %141 : vector<48x1xf32>
      %143 = vector.broadcast %142 : vector<48x1xf32> to vector<48x32xf32>
      %144 = arith.subf %136, %143 : vector<48x32xf32>
      %145 = arith.mulf %144, %144 : vector<48x32xf32>
      %cst_59 = arith.constant dense<0.000000e+00> : vector<48xf32>
      %146 = vector.multi_reduction <add>, %145, %cst_59 [1] : vector<48x32xf32> to vector<48xf32>
      %147 = vector.shape_cast %146 : vector<48xf32> to vector<48x1xf32>
      %cst_60 = arith.constant 3.200000e+01 : f32
      %148 = vector.broadcast %cst_60 : f32 to vector<48x1xf32>
      %149 = arith.divf %147, %148 : vector<48x1xf32>
      %cst_61 = arith.constant 9.99999974E-6 : f32
      %150 = vector.broadcast %cst_61 : f32 to vector<48x1xf32>
      %151 = arith.addf %149, %150 : vector<48x1xf32>
      %152 = math.rsqrt %151 : vector<48x1xf32>
      %153 = vector.broadcast %152 : vector<48x1xf32> to vector<48x32xf32>
      %154 = arith.mulf %144, %153 : vector<48x32xf32>
      %155 = vector.broadcast %137 : vector<1x32xf32> to vector<48x32xf32>
      %156 = arith.mulf %154, %155 : vector<48x32xf32>
      %157 = vector.broadcast %138 : vector<1x32xf32> to vector<48x32xf32>
      %158 = arith.addf %156, %157 : vector<48x32xf32>
      %c0_62 = arith.constant 0 : index
      %c0_63 = arith.constant 0 : index
      %159 = vector.load %arg40[%c0_62, %c0_63] : memref<3x48xf32, #tpu.memory_space<vmem>>, vector<3x48xf32>
      %cst_64 = arith.constant dense<0.000000e+00> : vector<3x32xf32>
      %160 = tpu.matmul %159, %158, %cst_64 {dimension_numbers = #tpu.dot_dimension_numbers<[1], [0], [0], [1], [0, 0, 1, 1], [], []>} : vector<3x48xf32>, vector<48x32xf32>, vector<3x32xf32> -> vector<3x32xf32>
      %c0_65 = arith.constant 0 : index
      %c0_66 = arith.constant 0 : index
      %161 = vector.load %arg41[%c0_65, %c0_66] : memref<32x32xbf16, #tpu.memory_space<vmem>>, vector<32x32xbf16>
      %162 = arith.truncf %160 : vector<3x32xf32> to vector<3x32xbf16>
      %cst_67 = arith.constant dense<0.000000e+00> : vector<3x32xf32>
      %163 = tpu.matmul %162, %161, %cst_67 {dimension_numbers = #tpu.dot_dimension_numbers<[1], [0], [0], [1], [0, 0, 1, 1], [], []>} : vector<3x32xbf16>, vector<32x32xbf16>, vector<3x32xf32> -> vector<3x32xf32>
      %164 = arith.mulf %163, %163 : vector<3x32xf32>
      %cst_68 = arith.constant dense<0.000000e+00> : vector<3xf32>
      %165 = vector.multi_reduction <add>, %164, %cst_68 [1] : vector<3x32xf32> to vector<3xf32>
      %166 = vector.shape_cast %165 : vector<3xf32> to vector<3x1xf32>
      %cst_69 = arith.constant 9.99999996E-13 : f32
      %167 = vector.broadcast %cst_69 : f32 to vector<3x1xf32>
      %168 = arith.addf %166, %167 : vector<3x1xf32>
      %169 = math.rsqrt %168 : vector<3x1xf32>
      %170 = vector.broadcast %169 : vector<3x1xf32> to vector<3x32xf32>
      %171 = arith.mulf %163, %170 : vector<3x32xf32>
      %c0_70 = arith.constant 0 : index
      %c0_71 = arith.constant 0 : index
      %c0_72 = arith.constant 0 : index
      %172 = vector.load %arg42[%c0_70, %c0_71, %c0_72] : memref<1x3x32xf32, #tpu.memory_space<vmem>>, vector<1x3x32xf32>
      %173 = vector.shape_cast %172 : vector<1x3x32xf32> to vector<3x32xf32>
      %174 = vector.shape_cast %171 : vector<3x32xf32> to vector<1x3x32xf32>
      tpu.vector_store %arg42[%c0_70, %c0_71, %c0_72], %174 {strides = array<i32>} : memref<1x3x32xf32, #tpu.memory_space<vmem>>, vector<1x3x32xf32>,
    } else {
    }
    return
  }
  func.func @transform_0(%arg0: i32) -> (i32, i32) {
    %c0_i32 = arith.constant 0 : i32
    %c0_i32_0 = arith.constant 0 : i32
    %c0_i32_1 = arith.constant 0 : i32
    return %c0_i32, %c0_i32_0 : i32, i32
  }
  func.func @transform_1(%arg0: i32) -> (i32, i32) {
    %c0_i32 = arith.constant 0 : i32
    %c0_i32_0 = arith.constant 0 : i32
    %c0_i32_1 = arith.constant 0 : i32
    return %c0_i32, %c0_i32_0 : i32, i32
  }
  func.func @transform_2(%arg0: i32) -> (i32, i32) {
    %c0_i32 = arith.constant 0 : i32
    %c0_i32_0 = arith.constant 0 : i32
    %c0_i32_1 = arith.constant 0 : i32
    return %c0_i32, %c0_i32_0 : i32, i32
  }
  func.func @transform_3(%arg0: i32) -> (i32, i32) {
    %c0_i32 = arith.constant 0 : i32
    %c0_i32_0 = arith.constant 0 : i32
    %c0_i32_1 = arith.constant 0 : i32
    return %c0_i32, %c0_i32_0 : i32, i32
  }
  func.func @transform_4(%arg0: i32) -> (i32, i32) {
    %c0_i32 = arith.constant 0 : i32
    %c0_i32_0 = arith.constant 0 : i32
    %c0_i32_1 = arith.constant 0 : i32
    return %c0_i32, %c0_i32_0 : i32, i32
  }
  func.func @transform_5(%arg0: i32) -> (i32, i32) {
    %c0_i32 = arith.constant 0 : i32
    %c0_i32_0 = arith.constant 0 : i32
    %c0_i32_1 = arith.constant 0 : i32
    return %c0_i32, %c0_i32_0 : i32, i32
  }
  func.func @transform_6(%arg0: i32) -> (i32, i32) {
    %c0_i32 = arith.constant 0 : i32
    %c0_i32_0 = arith.constant 0 : i32
    %c0_i32_1 = arith.constant 0 : i32
    return %c0_i32, %c0_i32_0 : i32, i32
  }
  func.func @transform_7(%arg0: i32) -> (i32, i32) {
    %c0_i32 = arith.constant 0 : i32
    %c0_i32_0 = arith.constant 0 : i32
    %c0_i32_1 = arith.constant 0 : i32
    return %c0_i32, %c0_i32_0 : i32, i32
  }
  func.func @transform_8(%arg0: i32) -> (i32, i32) {
    %c0_i32 = arith.constant 0 : i32
    %c0_i32_0 = arith.constant 0 : i32
    %c0_i32_1 = arith.constant 0 : i32
    return %c0_i32, %c0_i32_0 : i32, i32
  }
  func.func @transform_9(%arg0: i32) -> (i32, i32, i32) {
    %c0_i32 = arith.constant 0 : i32
    %c0_i32_0 = arith.constant 0 : i32
    %c0_i32_1 = arith.constant 0 : i32
    %c0_i32_2 = arith.constant 0 : i32
    return %c0_i32, %c0_i32_0, %c0_i32_1 : i32, i32, i32
  }
  func.func @transform_10(%arg0: i32) -> (i32, i32) {
    %c0_i32 = arith.constant 0 : i32
    %c0_i32_0 = arith.constant 0 : i32
    %c0_i32_1 = arith.constant 0 : i32
    return %c0_i32, %c0_i32_0 : i32, i32
  }
  func.func @transform_11(%arg0: i32) -> (i32, i32) {
    %c0_i32 = arith.constant 0 : i32
    %c0_i32_0 = arith.constant 0 : i32
    %c0_i32_1 = arith.constant 0 : i32
    return %c0_i32, %c0_i32_0 : i32, i32
  }
  func.func @transform_12(%arg0: i32) -> (i32, i32) {
    %c0_i32 = arith.constant 0 : i32
    %c0_i32_0 = arith.constant 0 : i32
    %c0_i32_1 = arith.constant 0 : i32
    return %c0_i32, %c0_i32_0 : i32, i32
  }
  func.func @transform_13(%arg0: i32) -> (i32, i32) {
    %c0_i32 = arith.constant 0 : i32
    %c0_i32_0 = arith.constant 0 : i32
    %c0_i32_1 = arith.constant 0 : i32
    return %c0_i32, %c0_i32_0 : i32, i32
  }
  func.func @transform_14(%arg0: i32) -> (i32, i32) {
    %c0_i32 = arith.constant 0 : i32
    %c0_i32_0 = arith.constant 0 : i32
    %c0_i32_1 = arith.constant 0 : i32
    return %c0_i32, %c0_i32_0 : i32, i32
  }
  func.func @transform_15(%arg0: i32) -> (i32, i32) {
    %c0_i32 = arith.constant 0 : i32
    %c0_i32_0 = arith.constant 0 : i32
    %c0_i32_1 = arith.constant 0 : i32
    return %c0_i32, %c0_i32_0 : i32, i32
  }
  func.func @transform_16(%arg0: i32) -> (i32, i32) {
    %c0_i32 = arith.constant 0 : i32
    %c0_i32_0 = arith.constant 0 : i32
    %c0_i32_1 = arith.constant 0 : i32
    return %c0_i32, %c0_i32_0 : i32, i32
  }
  func.func @transform_17(%arg0: i32) -> (i32, i32) {
    %c0_i32 = arith.constant 0 : i32
    %c0_i32_0 = arith.constant 0 : i32
    %c0_i32_1 = arith.constant 0 : i32
    return %c0_i32, %c0_i32_0 : i32, i32
  }
  func.func @transform_18(%arg0: i32) -> (i32, i32) {
    %c0_i32 = arith.constant 0 : i32
    %c0_i32_0 = arith.constant 0 : i32
    %c0_i32_1 = arith.constant 0 : i32
    return %c0_i32, %c0_i32_0 : i32, i32
  }
  func.func @transform_19(%arg0: i32) -> (i32, i32) {
    %c0_i32 = arith.constant 0 : i32
    %c0_i32_0 = arith.constant 0 : i32
    %c0_i32_1 = arith.constant 0 : i32
    return %c0_i32, %c0_i32_0 : i32, i32
  }
  func.func @transform_20(%arg0: i32) -> (i32, i32) {
    %c0_i32 = arith.constant 0 : i32
    %c0_i32_0 = arith.constant 0 : i32
    %c0_i32_1 = arith.constant 0 : i32
    return %c0_i32, %c0_i32_0 : i32, i32
  }
  func.func @transform_21(%arg0: i32) -> (i32, i32) {
    %c0_i32 = arith.constant 0 : i32
    %c0_i32_0 = arith.constant 0 : i32
    %c0_i32_1 = arith.constant 0 : i32
    return %c0_i32, %c0_i32_0 : i32, i32
  }
  func.func @transform_22(%arg0: i32) -> (i32, i32) {
    %c0_i32 = arith.constant 0 : i32
    %c0_i32_0 = arith.constant 0 : i32
    %c0_i32_1 = arith.constant 0 : i32
    return %c0_i32, %c0_i32_0 : i32, i32
  }
  func.func @transform_23(%arg0: i32) -> (i32, i32) {
    %c0_i32 = arith.constant 0 : i32
    %c0_i32_0 = arith.constant 0 : i32
    %c0_i32_1 = arith.constant 0 : i32
    return %c0_i32, %c0_i32_0 : i32, i32
  }
  func.func @transform_24(%arg0: i32) -> (i32, i32) {
    %c0_i32 = arith.constant 0 : i32
    %c0_i32_0 = arith.constant 0 : i32
    %c0_i32_1 = arith.constant 0 : i32
    return %c0_i32, %c0_i32_0 : i32, i32
  }
  func.func @transform_25(%arg0: i32) -> (i32, i32) {
    %c0_i32 = arith.constant 0 : i32
    %c0_i32_0 = arith.constant 0 : i32
    %c0_i32_1 = arith.constant 0 : i32
    return %c0_i32, %c0_i32_0 : i32, i32
  }
  func.func @transform_26(%arg0: i32) -> (i32, i32) {
    %c0_i32 = arith.constant 0 : i32
    %c0_i32_0 = arith.constant 0 : i32
    %c0_i32_1 = arith.constant 0 : i32
    return %c0_i32, %c0_i32_0 : i32, i32
  }
  func.func @transform_27(%arg0: i32) -> (i32, i32) {
    %c0_i32 = arith.constant 0 : i32
    %c0_i32_0 = arith.constant 0 : i32
    %c0_i32_1 = arith.constant 0 : i32
    return %c0_i32, %c0_i32_0 : i32, i32
  }
  func.func @transform_28(%arg0: i32) -> (i32, i32, i32) {
    %c0_i32 = arith.constant 0 : i32
    %c0_i32_0 = arith.constant 0 : i32
    %c0_i32_1 = arith.constant 0 : i32
    %c0_i32_2 = arith.constant 0 : i32
    return %c0_i32, %c0_i32_0, %c0_i32_1 : i32, i32, i32
  }
  func.func @transform_29(%arg0: i32) -> (i32, i32) {
    %c0_i32 = arith.constant 0 : i32
    %c0_i32_0 = arith.constant 0 : i32
    %c0_i32_1 = arith.constant 0 : i32
    return %c0_i32, %c0_i32_0 : i32, i32
  }
  func.func @transform_30(%arg0: i32) -> (i32, i32) {
    %c0_i32 = arith.constant 0 : i32
    %c0_i32_0 = arith.constant 0 : i32
    %c0_i32_1 = arith.constant 0 : i32
    return %c0_i32, %c0_i32_0 : i32, i32
  }
  func.func @transform_31(%arg0: i32) -> (i32, i32) {
    %c0_i32 = arith.constant 0 : i32
    %c0_i32_0 = arith.constant 0 : i32
    %c0_i32_1 = arith.constant 0 : i32
    return %c0_i32, %c0_i32_0 : i32, i32
  }
  func.func @transform_32(%arg0: i32) -> (i32, i32) {
    %c0_i32 = arith.constant 0 : i32
    %c0_i32_0 = arith.constant 0 : i32
    %c0_i32_1 = arith.constant 0 : i32
    return %c0_i32, %c0_i32_0 : i32, i32
  }
  func.func @transform_33(%arg0: i32) -> (i32, i32) {
    %c0_i32 = arith.constant 0 : i32
    %c0_i32_0 = arith.constant 0 : i32
    %c0_i32_1 = arith.constant 0 : i32
    return %c0_i32, %c0_i32_0 : i32, i32
  }
  func.func @transform_34(%arg0: i32) -> (i32, i32) {
    %c0_i32 = arith.constant 0 : i32
    %c0_i32_0 = arith.constant 0 : i32
    %c0_i32_1 = arith.constant 0 : i32
    return %c0_i32, %c0_i32_0 : i32, i32
  }
  func.func @transform_35(%arg0: i32) -> (i32, i32) {
    %c0_i32 = arith.constant 0 : i32
    %c0_i32_0 = arith.constant 0 : i32
    %c0_i32_1 = arith.constant 0 : i32
    return %c0_i32, %c0_i32_0 : i32, i32
  }
  func.func @transform_36(%arg0: i32) -> (i32, i32) {
    %c0_i32 = arith.constant 0 : i32
    %c0_i32_0 = arith.constant 0 : i32
    %c0_i32_1 = arith.constant 0 : i32
    return %c0_i32, %c0_i32_0 : i32, i32
  }
  func.func @transform_37(%arg0: i32) -> (i32, i32) {
    %c0_i32 = arith.constant 0 : i32
    %c0_i32_0 = arith.constant 0 : i32
    %c0_i32_1 = arith.constant 0 : i32
    return %c0_i32, %c0_i32_0 : i32, i32
  }
  func.func @transform_38(%arg0: i32) -> (i32, i32) {
    %c0_i32 = arith.constant 0 : i32
    %c0_i32_0 = arith.constant 0 : i32
    %c0_i32_1 = arith.constant 0 : i32
    return %c0_i32, %c0_i32_0 : i32, i32
  }
  func.func @transform_39(%arg0: i32) -> (i32, i32) {
    %c0_i32 = arith.constant 0 : i32
    %c0_i32_0 = arith.constant 0 : i32
    %c0_i32_1 = arith.constant 0 : i32
    return %c0_i32, %c0_i32_0 : i32, i32
  }
  func.func @transform_40(%arg0: i32) -> (i32, i32) {
    %c0_i32 = arith.constant 0 : i32
    %c0_i32_0 = arith.constant 0 : i32
    %c0_i32_1 = arith.constant 0 : i32
    return %c0_i32, %c0_i32_0 : i32, i32
  }
  func.func @transform_41(%arg0: i32) -> (i32, i32, i32) {
    %c0_i32 = arith.constant 0 : i32
    %c0_i32_0 = arith.constant 0 : i32
    %c0_i32_1 = arith.constant 0 : i32
    return %arg0, %c0_i32, %c0_i32_0 : i32, i32, i32
  }
}

</mosaic_0001>

<bundles_post_ra>
// kernel: tile.14
= control target key start
LH: loop header
LB: loop body
LE: loop exit
PB: predicated region body
PF: predicated region fallthrough
CT: control target
= control target key end

     0   :  { %vm3_vm0 = vcmask 261120   ;;  %s34_s0 = inlined_call_operand.vmem [shape: f32[2,5,32], index: 0, kind: input, shape index: {}]   ;;  %s35_s1 = inlined_call_operand.vmem [shape: f32[10,32], index: 1, kind: output, shape index: {}]  }
   0x1   :  { %v2_v0 = vld [vmem:[%s34_s0] sm:$0x1f]   ;;  %v10_v1 = vld [vmem:[%s34_s0 + $0x8] sm:$0x1f]  }
   0x2   :  { %4 = vst.msk [vmem:[%s35_s1] sm:$0x1f] %vm3_vm0, %v2_v0   ;;  %11 = vst.msk [vmem:[%s35_s1 + $0x5] sm:$0x1f] %vm3_vm0, %v10_v1  }

// kernel: custom_clip_forward.1
= control target key start
LH: loop header
LB: loop body
LE: loop exit
PB: predicated region body
PF: predicated region fallthrough
CT: control target
= control target key end

     0   :  { %s6103_s6 = smov 1   ;;  %s6104_s10 = smov 2   ;;  %s7437_s0 = inlined_call_operand.smem [shape: u32[42], index: -1, kind: input, shape index: {}] }
   0x1   :  { %s6167_s5 = sld [smem:[%s7437_s0]]   ;;  %s6105_s14 = smov 3  }
   0x2   :  { %s6172_s9 = sld [smem:[%s7437_s0 + %s6103_s6]]   ;;  %s6106_s18 = smov 4  }
   0x3   :  { %s6177_s13 = sld [smem:[%s7437_s0 + %s6104_s10]]   ;;  %s6107_s22 = smov 5  }
   0x4   :  { %s6182_s17 = sld [smem:[%s7437_s0 + %s6105_s14]]   ;;  %s6108_s26 = smov 6  }
   0x5   :  { %s6187_s21 = sld [smem:[%s7437_s0 + %s6106_s18]]   ;;  %s6109_s30 = smov 7  }
   0x6   :  { %s6192_s25 = sld [smem:[%s7437_s0 + %s6107_s22]]   ;;  %s6110_s4 = smov 8  }
   0x7   :  { %s6197_s29 = sld [smem:[%s7437_s0 + %s6108_s26]]   ;;  %s6111_s10 = smov 9  }
   0x8   :  { %s6202_s3 = sld [smem:[%s7437_s0 + %s6109_s30]]   ;;  %s6112_s15 = smov 10  }
   0x9   :  { %s6207_s8 = sld [smem:[%s7437_s0 + %s6110_s4]]   ;;  %s6113_s20 = smov 11  }
   0xa   :  { %s6212_s14 = sld [smem:[%s7437_s0 + %s6111_s10]]   ;;  %s6114_s26 = smov 12  }
   0xb   :  { %s6217_s19 = sld [smem:[%s7437_s0 + %s6112_s15]]   ;;  %s6115_s1 = smov 13  }
   0xc   :  { %s6222_s24 = sld [smem:[%s7437_s0 + %s6113_s20]]   ;;  %s6116_s7 = smov 14  }
   0xd   :  { %s6227_s30 = sld [smem:[%s7437_s0 + %s6114_s26]]   ;;  %s6117_s15 = smov 15  }
   0xe   :  { %s6232_s6 = sld [smem:[%s7437_s0 + %s6115_s1]]   ;;  %s6118_s22 = smov 16  }
   0xf   :  { %s6237_s12 = sld [smem:[%s7437_s0 + %s6116_s7]]   ;;  %s6119_s28 = smov 17  }
  0x10   :  { %s6242_s20 = sld [smem:[%s7437_s0 + %s6117_s15]]   ;;  %s6120_s7 = smov 18  }
  0x11   :  { %s6247_s27 = sld [smem:[%s7437_s0 + %s6118_s22]]   ;;  %s6121_s15 = smov 19  }
  0x12   :  { %s6252_s4 = sld [smem:[%s7437_s0 + %s6119_s28]]   ;;  %s6122_s22 = smov 20  }
  0x13   :  { %7447 = sst [smem:[#allocation2_spill]] %s6227_s30  ;;  %s6123_s28 = smov 21  }
  0x14   :  { %s6272_s30 = sld [smem:[%s7437_s0 + %s6123_s28]]   ;;  %s6127_s28 = smov 25  }
  0x15   :  { %7448 = sst [smem:[#allocation3_spill]] %s6237_s12 }
  0x16   :  { %7449 = sst [smem:[#allocation4_spill]] %s6242_s20 }
  0x17   :  { %7450 = sst [smem:[#allocation5_spill]] %s6247_s27 }
  0x18   :  { %s6257_s12 = sld [smem:[%s7437_s0 + %s6120_s7]]   ;;  %s6124_s7 = smov 22  }
  0x19   :  { %s6262_s20 = sld [smem:[%s7437_s0 + %s6121_s15]]   ;;  %s6125_s15 = smov 23  }
  0x1a   :  { %s6267_s27 = sld [smem:[%s7437_s0 + %s6122_s22]]   ;;  %s6126_s22 = smov 24  }
  0x1b   :  { %7454 = sst [smem:[#allocation9_spill]] %s6272_s30 }
  0x1c   :  { %s6292_s30 = sld [smem:[%s7437_s0 + %s6127_s28]]   ;;  %s6131_s28 = smov 29  }
  0x1e   :  { %7451 = sst [smem:[#allocation6_spill]] %s6257_s12 }
  0x1f   :  { %7452 = sst [smem:[#allocation7_spill]] %s6262_s20 }
  0x20   :  { %7453 = sst [smem:[#allocation8_spill]] %s6267_s27 }
  0x21   :  { %s6277_s12 = sld [smem:[%s7437_s0 + %s6124_s7]]   ;;  %s6128_s7 = smov 26  }
  0x22   :  { %s6282_s20 = sld [smem:[%s7437_s0 + %s6125_s15]]   ;;  %s6129_s15 = smov 27  }
  0x23   :  { %s6287_s27 = sld [smem:[%s7437_s0 + %s6126_s22]]   ;;  %s6130_s22 = smov 28  }
  0x24   :  { %7458 = sst [smem:[#allocation13_spill]] %s6292_s30 }
  0x25   :  { %s6312_s30 = sld [smem:[%s7437_s0 + %s6131_s28]]   ;;  %s6135_s28 = smov 33  }
  0x27   :  { %7455 = sst [smem:[#allocation10_spill]] %s6277_s12 }
  0x28   :  { %7456 = sst [smem:[#allocation11_spill]] %s6282_s20 }
  0x29   :  { %7457 = sst [smem:[#allocation12_spill]] %s6287_s27 }
  0x2a   :  { %s6297_s12 = sld [smem:[%s7437_s0 + %s6128_s7]]   ;;  %s6132_s7 = smov 30  }
  0x2b   :  { %s6302_s20 = sld [smem:[%s7437_s0 + %s6129_s15]]   ;;  %s6133_s15 = smov 31  }
  0x2c   :  { %s6307_s27 = sld [smem:[%s7437_s0 + %s6130_s22]]   ;;  %s6134_s22 = smov 32  }
  0x2d   :  { %7462 = sst [smem:[#allocation17_spill]] %s6312_s30 }
  0x2e   :  { %s6332_s30 = sld [smem:[%s7437_s0 + %s6135_s28]]   ;;  %s6139_s28 = smov 37  }
  0x30   :  { %7459 = sst [smem:[#allocation14_spill]] %s6297_s12 }
  0x31   :  { %7460 = sst [smem:[#allocation15_spill]] %s6302_s20 }
  0x32   :  { %7461 = sst [smem:[#allocation16_spill]] %s6307_s27 }
  0x33   :  { %s6317_s12 = sld [smem:[%s7437_s0 + %s6132_s7]]   ;;  %s6136_s7 = smov 34  }
  0x34   :  { %s6322_s20 = sld [smem:[%s7437_s0 + %s6133_s15]]   ;;  %s6137_s15 = smov 35  }
  0x35   :  { %s6327_s27 = sld [smem:[%s7437_s0 + %s6134_s22]]   ;;  %s6138_s22 = smov 36  }
  0x36   :  { %7466 = sst [smem:[#allocation21_spill]] %s6332_s30 }
  0x37   :  { %s6352_s30 = sld [smem:[%s7437_s0 + %s6139_s28]]   ;;  %s6143_s28 = smov 41  }
  0x39   :  { %7463 = sst [smem:[#allocation18_spill]] %s6317_s12 }
  0x3a   :  { %7464 = sst [smem:[#allocation19_spill]] %s6322_s20 }
  0x3b   :  { %7465 = sst [smem:[#allocation20_spill]] %s6327_s27 }
  0x3c   :  { %s6337_s12 = sld [smem:[%s7437_s0 + %s6136_s7]]   ;;  %s6140_s7 = smov 38  }
  0x3d   :  { %s6342_s20 = sld [smem:[%s7437_s0 + %s6137_s15]]   ;;  %s6141_s15 = smov 39  }
  0x3e   :  { %s6347_s27 = sld [smem:[%s7437_s0 + %s6138_s22]]   ;;  %s6142_s22 = smov 40  }
  0x3f   :  { %7470 = sst [smem:[#allocation25_spill]] %s6352_s30 }
  0x40   :  { %s6372_s30 = sld [smem:[%s7437_s0 + %s6143_s28]]  }
  0x42   :  { %7467 = sst [smem:[#allocation22_spill]] %s6337_s12 }
  0x43   :  { %7468 = sst [smem:[#allocation23_spill]] %s6342_s20 }
  0x44   :  { %7469 = sst [smem:[#allocation24_spill]] %s6347_s27 }
  0x45   :  { %s6357_s12 = sld [smem:[%s7437_s0 + %s6140_s7]]   ;;  %s6374_s7 = smov 0  }
  0x46   :  { %s6362_s20 = sld [smem:[%s7437_s0 + %s6141_s15]]  }
  0x47   :  { %s6367_s27 = sld [smem:[%s7437_s0 + %s6142_s22]]  }
  0x48 LB: > { %s6380_s10 = sadd.s32 4294967295, %s6101_s7   ;;  %p5033_p0 = scmp.ge.s32.totalorder %s6101_s7, 1  ;;  %s6101_s7 = sphi %s6374_s7, %s93_s7  }
  0x49   : > { %p1119_p1 = scmp.lt.s32.totalorder %s6101_s7, 3 }
  0x4b   : > { %p1120_p2 = pnand %p5033_p0, %p1119_p1 }
  0x4c   : > { %p1213_p3 = scmp.lt.s32.totalorder (!%p1120_p2), %s6380_s10, 1  ;;  %p5035_p4 = scmp.ne.s32.totalorder (!%p1120_p2), %s6380_s10, 0 }
  0x4d   : > { %1123 = sbr.rel (%p1120_p2) target bundleno = 7318 (0x1c96), region = 184 }
  0x52   : > { %s1214_s0 = scalar_select %p1213_p3, %s6380_s10, 1 }
  0x53   : > { %1221 = sbr.rel (%p5035_p4) target bundleno = 3938 (0xf62), region = 188  ;;  %s6147_s16 = smov (!%p5035_p4), 112  }
  0x54   : > { %s5034_s11 = sshll.u32 %s1214_s0, 2  ;;  %s6148_s18 = smov (!%p5035_p4), 120  }
  0x55   : > { %s6387_s15 = scalar_lea.vmem %s6372_s30, %s5034_s11  ;;  %s6149_s22 = smov (!%p5035_p4), 104  }
  0x56   : > { %s6150_s23 = smov (!%p5035_p4), 96   ;;  %s6151_s26 = smov (!%p5035_p4), 64  }
  0x57   : > { %s7471_s28 = sld [smem:[#allocation2_spill]] (!%p5035_p4) }
  0x58   : > { %v5796_v0 = vld [vmem:[%s6172_s9 + $0x38] sm:$0xff]   ;;  %v6144_v1 = vmov 0   ;;  %v5797_v2 = vld [vmem:[%s6172_s9 + $0x30] sm:$0xff]   ;;  %v5798_v3 = vld [vmem:[%s6172_s9 + $0x28] sm:$0xff]   ;;  %vm1326_vm0 = vcmask 523264   ;;  %vm1373_vm1 = vcmask 261120  }
  0x59   : > { %1330 = vmatprep.subr.bf16.mxu0 %v6144_v1  ;;  %v5799_v4 = vld [vmem:[%s6172_s9 + $0x20] sm:$0xff]   ;;  %v1223_v5 = vld [vmem:[%s6167_s5 + $0x8] sm:$0xff]  ;;  %v1225_v6 = vld [vmem:[%s6167_s5 + $0x18] sm:$0x3]  ;;  %vm1377_vm2 = vcmask 254976   ;;  %vm6146_vm3 = vmmov 0  }
  0x5a   : > { %1331 = vmatpush1.bf16.msra.mxu0 %v5796_v0  ;;  %v5800_v7 = vld [vmem:[%s6172_s9 + $0x18] sm:$0xff]   ;;  %v1251_v8 = vpack.c.bf16 %v1225_v6, %v1223_v5  ;;  %v5801_v9 = vld [vmem:[%s6172_s9 + $0x10] sm:$0xff]   ;;  %v5802_v10 = vld [vmem:[%s6172_s9 + $0x8] sm:$0xff]   ;;  %vm1588_vm4 = vcmask 64512   ;;  %vm1802_vm5 = vcmask 80896   ;;  %vm1806_vm6 = vcmask 74752  }
  0x5b   : > { %1332 = vmatprep.subr.bf16.mxu0 %v6144_v1  ;;  %v5803_v11 = vld [vmem:[%s6172_s9] sm:$0xff]   ;;  %v5804_v12 = vld [vmem:[%s6172_s9 + $0x58] sm:$0xff]   ;;  %v5805_v13 = vld [vmem:[%s6172_s9 + $0x50] sm:$0xff]   ;;  %vm1901_vm7 = vcmask 1044480   ;;  %vm2100_vm8 = vcmask 1043456   ;;  %s7472_s1 = sld [smem:[#allocation4_spill]] }
  0x5c   : > { %5048 = vmatprep.mubr.msk.bf16.mxu0 %vm1326_vm0, %v1251_v8  ;;  %v5806_v14 = vld [vmem:[%s6172_s9 + $0x48] sm:$0xff]   ;;  %v5807_v15 = vld [vmem:[%s6172_s9 + $0x40] sm:$0xff]   ;;  %v1224_v17 = vld [vmem:[%s6167_s5 + $0x10] sm:$0x3]  ;;  %s7473_s2 = sld [smem:[#allocation3_spill]]  ;;  %vm2533_vm9 = vcmask 1041408  }
  0x5d   : > { %v1222_v16 = vld [vmem:[%s6167_s5] sm:$0xff]  ;;  %v1253_v23 = vld [vmem:[%s6177_s13 + $0x8] sm:$0x3]  ;;  %s7474_s0 = sld [smem:[#allocation5_spill]]  ;;  %vm2704_vm10 = vcmask 253952  }
  0x5e   : > { %1333 = vmatpush1.bf16.msra.mxu0 %v5797_v2  ;;  %v1250_v18 = vpack.c.bf16 %v1224_v17, %v1222_v16  ;;  %v1252_v19 = vld [vmem:[%s6177_s13] sm:$0xff]  ;;  %s7475_s11 = sld [smem:[#allocation9_spill]] }
  0x5f   : > { %1334 = vmatprep.subr.bf16.mxu0 %v6144_v1  ;;  %v5049_v46 = vld [vmem:[%s6182_s17] ss:$0 sm:$0xff] }
  0x60   : > { %v5050_v48 = vld [vmem:[%s6187_s21] ss:$0 sm:$0xff] }
  0x61   : > { %v5809_v5 = vld [vmem:[%s6202_s3] sm:$0xff]  }
  0x62   : > { %1335 = vmatpush1.bf16.msra.mxu0 %v5798_v3  ;;  %v5808_v3 = vld [vmem:[%s6202_s3 + $0x8] sm:$0xff]  }
  0x63   : > { %1336 = vmatprep.subr.bf16.mxu0 %v6144_v1 }
  0x66   : > { %1337 = vmatpush1.bf16.msra.mxu0 %v5799_v4  ;;  %v6145_v4 = vmov 0.0  }
  0x67   : > { %1338 = vmatprep.subr.bf16.mxu0 %v6144_v1  ;;  %5311 = vmatprep.subr.bf16.mxu1 %v6145_v4  ;;  %2705 = vst.msk [vmem:[%s6387_s15 + $0x2] sm:$0x1] %vm2704_vm10, %v6145_v4 }
  0x68   : > { %5315 = vmatprep.mubr.msk.bf16.mxu1 %vm6146_vm3, %v6145_v4  ;;  %5312 = vmatpush3.bf16.msra.mxu1 %v5808_v3 }
  0x69   : > { %5313 = vmatprep.subr.bf16.mxu1 %v6145_v4 }
  0x6a   : > { %1339 = vmatpush1.bf16.msra.mxu0 %v5800_v7 }
  0x6b   : > { %1340 = vmatprep.subr.bf16.mxu0 %v6144_v1 }
  0x6c   : > { %5314 = vmatpush3.bf16.msra.mxu1 %v5809_v5 }
  0x6d   : > { %5319 = vmatprep.subr.bf16.mxu1 %v6145_v4 }
  0x6e   : > { %1341 = vmatpush1.bf16.msra.mxu0 %v5801_v9 }
  0x6f   : > { %1342 = vmatprep.subr.bf16.mxu0 %v6144_v1 }
  0x72   : > { %1343 = vmatpush1.bf16.msra.mxu0 %v5802_v10 }
  0x73   : > { %1344 = vmatprep.subr.bf16.mxu0 %v6144_v1 }
  0x76   : > { %1345 = vmatpush1.bf16.msra.mxu0 %v5803_v11 }
  0x77   : > { %1354 = vmatprep.subr.bf16.mxu0 %v6144_v1 }
  0x7a   : > { %1355 = vmatpush2.bf16.msra.mxu0 %v5804_v12 }
  0x7b   : > { %1356 = vmatprep.subr.bf16.mxu0 %v6144_v1 }
  0x7e   : > { %1357 = vmatpush2.bf16.msra.mxu0 %v5805_v13 }
  0x7f   : > { %1358 = vmatprep.subr.bf16.mxu0 %v6144_v1 }
  0x82   : > { %1359 = vmatpush2.bf16.msra.mxu0 %v5806_v14  ;;  %v5051_v14 = vld [vmem:[%s6192_s25] ss:$0 sm:$0xff] }
  0x83   : > { %1360 = vmatprep.subr.bf16.mxu0 %v6144_v1 }
  0x86   : > { %1361 = vmatpush2.bf16.msra.mxu0 %v5807_v15 }
  0x87   : > { %5361 = vmatprep.subr.bf16.mxu0 %v6145_v4 }
  0x89   : > { %1363 = vmatmul.mubr.bf16.vlgmr.msra.gmra.mxu0 %v1250_v18  ;;  %v5052_v18 = vld [vmem:[%s6197_s29] ss:$0 sm:$0xff] }
  0x8a   : > { %5363 = vmatprep.mubr.msk.bf16.mxu0 %vm6146_vm3, %v6145_v4 }
 0x149   : > { %v1364_v20 = vpop.f32.mrf.mxu0 }
 0x14a   : > { %v1365_v21 = vadd.f32 %v1364_v20, %v1252_v19 }
 0x14b   : > { %v1366_v22 = vpop.f32.mrf.mxu0 }
 0x14c   : > { %v1374_v24 = vsel %vm1373_vm1, %v1365_v21, 0.0 }
 0x14d   : > { %v1367_v25 = vpop.f32.mrf.mxu0  ;;  %1375 = vadd.xlane.f32.xlu0 %v1374_v24  ;;  %v5053_v24 = vld [vmem:[%s6207_s8] ss:$0 sm:$0xff] }
 0x14e   : > { %v1368_v26 = vadd.f32 %v1367_v25, %v1253_v23 }
 0x14f   : > { %v1369_v27 = vpop.f32.mrf.mxu0 }
 0x150   : > { %v1378_v28 = vsel %vm1377_vm2, %v1368_v26, 0.0 }
 0x151   : > { %1379 = vadd.xlane.f32.xlu0 %v1378_v28 }
 0x1d6   : > { %v1376_v29 = vpop.xlane.xlu0 %1375 }
 0x1d7   : > { %v1382_v30 = vmul.f32 0.03125, %v1376_v29 }
 0x1d9   : > { %v1384_v31 = vsub.f32 %v1365_v21, %v1382_v30 }
 0x1da   : > { %v1380_v32 = vpop.xlane.xlu0 %1379 }
 0x1db   : > { %v1383_v33 = vmul.f32 0.03125, %v1380_v32  ;;  %v1386_v34 = vmul.f32 %v1384_v31, %v1384_v31 }
 0x1dd   : > { %v1385_v35 = vsub.f32 %v1368_v26, %v1383_v33  ;;  %v1388_v36 = vsel %vm1373_vm1, %v1386_v34, 0.0 }
 0x1de   : > { %1389 = vadd.xlane.f32.xlu1 %v1388_v36 }
 0x1df   : > { %v1387_v37 = vmul.f32 %v1385_v35, %v1385_v35 }
 0x1e1   : > { %v1391_v38 = vsel %vm1377_vm2, %v1387_v37, 0.0 }
 0x1e2   : > { %1392 = vadd.xlane.f32.xlu1 %v1391_v38 }
 0x267   : > { %v1390_v39 = vpop.xlane.xlu1 %1389 }
 0x268   : > { %v1394_v40 = vmul.f32 0.03125, %v1390_v39 }
 0x26a   : > { %v1396_v41 = vadd.f32 1e-05, %v1394_v40 }
 0x26b   : > { %v1393_v42 = vpop.xlane.xlu1 %1392 }
 0x26c   : > { %5822 = vrsqrt.f32 %v1396_v41  ;;  %v1395_v43 = vmul.f32 0.03125, %v1393_v42 }
 0x26e   : > { %v1397_v44 = vadd.f32 1e-05, %v1395_v43 }
 0x270   : > { %5824 = vrsqrt.f32 %v1397_v44 }
 0x279   : > { %v5823_v45 = vpop.eup %5822 }
 0x27a   : > { %v1400_v47 = vmul.f32 %v5823_v45, %v1384_v31 }
 0x27c   : > { %v1408_v49 = vmul.f32 %v5049_v46, %v1400_v47 }
 0x27d   : > { %v5825_v50 = vpop.eup %5824 }
 0x27e   : > { %v6414_v51 = vadd.f32 %v5050_v48, %v1408_v49  ;;  %v1401_v52 = vmul.f32 %v5825_v50, %v1385_v35 }
 0x280   : > { %v1456_v53 = vsel %vm1373_vm1, %v6414_v51, 0.0  ;;  %v1409_v54 = vmul.f32 %v5049_v46, %v1401_v52 }
 0x281   : > { %1457 = vadd.xlane.f32.xlu0 %v1456_v53 }
 0x282   : > { %v6418_v55 = vadd.f32 %v5050_v48, %v1409_v54  ;;  %v1418_v54 = vld [vmem:[%s6252_s4] sm:$0xff] }
 0x284   : > { %v1459_v56 = vsel %vm1377_vm2, %v6418_v55, 0.0 }
 0x285   : > { %1460 = vadd.xlane.f32.xlu1 %v1459_v56 }
 0x30a   : > { %v1458_v57 = vpop.xlane.xlu0 %1457 }
 0x30b   : > { %v1462_v58 = vmul.f32 0.03125, %v1458_v57 }
 0x30d   : > { %v1464_v59 = vsub.f32 %v6414_v51, %v1462_v58 }
 0x30e   : > { %v1461_v60 = vpop.xlane.xlu1 %1460 }
 0x30f   : > { %v1463_v61 = vmul.f32 0.03125, %v1461_v60  ;;  %v1466_v62 = vmul.f32 %v1464_v59, %v1464_v59  ;;  %v1419_v60 = vld [vmem:[%s6252_s4 + $0x8] sm:$0x3] }
 0x311   : > { %v1465_v63 = vsub.f32 %v6418_v55, %v1463_v61  ;;  %v1468_v0 = vsel %vm1373_vm1, %v1466_v62, 0.0 }
 0x312   : > { %1469 = vadd.xlane.f32.xlu0 %v1468_v0 }
 0x313   : > { %v1467_v1 = vmul.f32 %v1465_v63, %v1465_v63 }
 0x315   : > { %v1471_v2 = vsel %vm1377_vm2, %v1467_v1, 0.0 }
 0x316   : > { %1472 = vadd.xlane.f32.xlu1 %v1471_v2 }
 0x39b   : > { %v1470_v6 = vpop.xlane.xlu0 %1469 }
 0x39c   : > { %v1474_v7 = vmul.f32 0.03125, %v1470_v6 }
 0x39e   : > { %v1476_v8 = vadd.f32 1e-05, %v1474_v7 }
 0x39f   : > { %v1473_v9 = vpop.xlane.xlu1 %1472 }
 0x3a0   : > { %5826 = vrsqrt.f32 %v1476_v8  ;;  %v1475_v10 = vmul.f32 0.03125, %v1473_v9 }
 0x3a2   : > { %v1477_v11 = vadd.f32 1e-05, %v1475_v10 }
 0x3a4   : > { %5828 = vrsqrt.f32 %v1477_v11 }
 0x3ad   : > { %v5827_v12 = vpop.eup %5826 }
 0x3ae   : > { %v1480_v13 = vmul.f32 %v5827_v12, %v1464_v59 }
 0x3b0   : > { %v1488_v17 = vmul.f32 %v5051_v14, %v1480_v13 }
 0x3b1   : > { %v5829_v15 = vpop.eup %5828 }
 0x3b2   : > { %v1481_v16 = vmul.f32 %v5829_v15, %v1465_v63  ;;  %v1496_v20 = vadd.f32 %v5052_v18, %v1488_v17 }
 0x3b4   : > { %v1489_v19 = vmul.f32 %v5051_v14, %v1481_v16 }
 0x3b6   : > { %v1497_v21 = vadd.f32 %v5052_v18, %v1489_v19 }
 0x3b8   : > { %v1498_v22 = vpack.c.bf16 %v1497_v21, %v1496_v20 }
 0x3ba   : > { %5316 = vmatmul.mubr.msk.bf16.vlgmr.msra.gmra.mxu1 %vm1373_vm1, %v1498_v22 }
 0x3bb   : > { %5321 = vmatprep.mubr.msk.bf16.mxu1 %vm6146_vm3, %v6145_v4 }
 0x47a   : > { %v1554_v23 = vpop.f32.mrf.mxu1 }
 0x47b   : > { %v1555_v27 = vadd.f32 %v5053_v24, %v1554_v23 }
 0x47c   : > { %v5317_v25 = vpop.f32.mrf.mxu1 }
 0x47e   : > { %v1557_v26 = vpop.f32.mrf.mxu1 }
 0x47f   : > { %v1558_v28 = vadd.f32 %v5053_v24, %v1557_v26 }
 0x480   : > { %v5318_v29 = vpop.f32.mrf.mxu1 }
 0x481   : > { %v5786_v30 = vpack.i.bf16 %v1558_v28, %v1555_v27  ;;  %v6442_v31 = vpack.c.bf16 %v1558_v28, %v1555_v27 }
 0x483   : > { %5787 = vrot.lane.b32.xlu1 %v5786_v30, %s6147_s16  ;;  %5782 = vrot.lane.b32.xlu0 %v5786_v30, %s6148_s18  ;;  %s7476_s16 = sld [smem:[#allocation8_spill]] }
 0x484   : > { %s7477_s18 = sld [smem:[#allocation6_spill]] }
 0x487   : > { %5792 = vrot.lane.b32.xlu1 %v5786_v30, %s6149_s22  ;;  %s7478_s22 = sld [smem:[#allocation7_spill]] }
 0x48b   : > { %1586 = vrot.lane.b32.xlu1 %v6442_v31, %s6150_s23 }
 0x4f5   : > { %v5788_v32 = vpop.permute.xlu1 %5787  ;;  %v5783_v33 = vpop.permute.xlu0 %5782 }
 0x4f6   : > { %v5790_v34 = vunpack.i.h.bf16 %v5788_v32  ;;  %v5789_v35 = vunpack.i.l.bf16 %v5788_v32  ;;  %v5785_v36 = vunpack.i.h.bf16 %v5783_v33  ;;  %v5784_v37 = vunpack.i.l.bf16 %v5783_v33 }
 0x4f8   : > { %v6445_v38 = vpack.c.bf16 %v5790_v34, %v5789_v35  ;;  %v6447_v39 = vpack.c.bf16 %v5785_v36, %v5784_v37 }
 0x4f9   : > { %v5793_v40 = vpop.permute.xlu1 %5792 }
 0x4fa   : > { %v5795_v41 = vunpack.i.h.bf16 %v5793_v40  ;;  %v5794_v42 = vunpack.i.l.bf16 %v5793_v40  ;;  %1637 = vrot.lane.b32.xlu0 %v6447_v39, %s6150_s23  ;;  %1687 = vrot.lane.b32.xlu1 %v6445_v38, %s6150_s23 }
 0x4fc   : > { %v6451_v43 = vpack.c.bf16 %v5795_v41, %v5794_v42 }
 0x4fd   : > { %v1587_v44 = vpop.permute.xlu1 %1586 }
 0x4fe   : > { %v1593_v45 = vsel %vm1588_vm4, %v1587_v44, 0  ;;  %1737 = vrot.lane.b32.xlu0 %v6451_v43, %s6150_s23 }
 0x4ff   : > { %5320 = vmatpush3.bf16.xpose.msra.mxu1 %v1593_v45 }
 0x500   : > { %5325 = vmatprep.subr.bf16.mxu1 %v6145_v4 }
 0x506   : > { %5322 = vmatmul.mubr.msk.bf16.vlgmr.msra.gmra.mxu1 %vm1588_vm4, %v6442_v31 }
 0x507   : > { %5327 = vmatprep.mubr.msk.bf16.mxu1 %vm6146_vm3, %v6145_v4 }
 0x56c   : > { %v1638_v46 = vpop.permute.xlu0 %1637  ;;  %v1688_v48 = vpop.permute.xlu1 %1687 }
 0x56d   : > { %v1643_v47 = vsel %vm1588_vm4, %v1638_v46, 0  ;;  %v1693_v49 = vsel %vm1588_vm4, %v1688_v48, 0 }
 0x56e   : > { %5326 = vmatpush3.bf16.xpose.msra.mxu1 %v1643_v47 }
 0x56f   : > { %5331 = vmatprep.subr.bf16.mxu1 %v6145_v4 }
 0x570   : > { %v1738_v50 = vpop.permute.xlu0 %1737 }
 0x571   : > { %v1743_v52 = vsel %vm1588_vm4, %v1738_v50, 0 }
 0x575   : > { %5328 = vmatmul.mubr.msk.bf16.vlgmr.msra.gmra.mxu1 %vm1588_vm4, %v6447_v39 }
 0x576   : > { %5332 = vmatpush3.bf16.xpose.msra.mxu1 %v1693_v49  ;;  %5333 = vmatprep.mubr.msk.bf16.mxu1 %vm6146_vm3, %v6145_v4 }
 0x577   : > { %5337 = vmatprep.subr.bf16.mxu1 %v6145_v4 }
 0x57d   : > { %5334 = vmatmul.mubr.msk.bf16.vlgmr.msra.gmra.mxu1 %vm1588_vm4, %v6445_v38 }
 0x57e   : > { %5338 = vmatpush3.bf16.xpose.msra.mxu1 %v1743_v52  ;;  %5339 = vmatprep.mubr.msk.bf16.mxu1 %vm6146_vm3, %v6145_v4 }
 0x57f   : > { %5343 = vmatprep.subr.bf16.mxu1 %v6145_v4 }
 0x585   : > { %5340 = vmatmul.mubr.msk.bf16.vlgmr.msra.gmra.mxu1 %vm1588_vm4, %v6451_v43 }
 0x586   : > { %5345 = vmatprep.mubr.msk.bf16.mxu1 %vm6146_vm3, %v6145_v4 }
 0x5c6   : > { %v1629_v53 = vpop.f32.mrf.mxu1 }
 0x5c7   : > { %v1786_v56 = vmul.f32 0.35355338, %v1629_v53 }
 0x5c8   : > { %v5323_v57 = vpop.f32.mrf.mxu1 }
 0x5c9   : > { %v1794_v58 = vadd.f32 %v1786_v56, %v1418_v54 }
 0x5ca   : > { %v1632_v59 = vpop.f32.mrf.mxu1 }
 0x5cb   : > { %v1787_v61 = vmul.f32 0.35355338, %v1632_v59  ;;  %v1803_v62 = vsel %vm1802_vm5, %v1794_v58, -inf }
 0x5cc   : > { %1804 = vmax.xlane.f32.xlu1 %v1803_v62  ;;  %v5324_v63 = vpop.f32.mrf.mxu1 }
 0x5cd   : > { %v1795_v0 = vadd.f32 %v1787_v61, %v1419_v60 }
 0x5cf   : > { %v1807_v1 = vsel %vm1806_vm6, %v1795_v0, -inf }
 0x5d0   : > { %1808 = vmax.xlane.f32.xlu0 %v1807_v1 }
 0x635   : > { %v1679_v2 = vpop.f32.mrf.mxu1 }
 0x636   : > { %v1788_v3 = vmul.f32 0.35355338, %v1679_v2 }
 0x637   : > { %v5329_v5 = vpop.f32.mrf.mxu1 }
 0x638   : > { %v1796_v6 = vadd.f32 %v1788_v3, %v1418_v54 }
 0x639   : > { %v1682_v7 = vpop.f32.mrf.mxu1 }
 0x63a   : > { %v1789_v8 = vmul.f32 0.35355338, %v1682_v7  ;;  %v1810_v9 = vsel %vm1802_vm5, %v1796_v6, -inf }
 0x63b   : > { %1811 = vmax.xlane.f32.xlu0 %v1810_v9  ;;  %v5330_v10 = vpop.f32.mrf.mxu1 }
 0x63c   : > { %v1797_v11 = vadd.f32 %v1789_v8, %v1419_v60 }
 0x63d   : > { %v1729_v12 = vpop.f32.mrf.mxu1 }
 0x63e   : > { %v1790_v13 = vmul.f32 0.35355338, %v1729_v12  ;;  %v1813_v14 = vsel %vm1806_vm6, %v1797_v11, -inf }
 0x63f   : > { %1814 = vmax.xlane.f32.xlu0 %v1813_v14  ;;  %v5335_v15 = vpop.f32.mrf.mxu1 }
 0x640   : > { %v1798_v16 = vadd.f32 %v1790_v13, %v1418_v54 }
 0x641   : > { %v1732_v17 = vpop.f32.mrf.mxu1 }
 0x642   : > { %v1791_v18 = vmul.f32 0.35355338, %v1732_v17  ;;  %v1816_v19 = vsel %vm1802_vm5, %v1798_v16, -inf }
 0x643   : > { %1817 = vmax.xlane.f32.xlu1 %v1816_v19  ;;  %v5336_v20 = vpop.f32.mrf.mxu1 }
 0x644   : > { %v1799_v21 = vadd.f32 %v1791_v18, %v1419_v60 }
 0x645   : > { %v1779_v22 = vpop.f32.mrf.mxu1 }
 0x646   : > { %v1792_v23 = vmul.f32 0.35355338, %v1779_v22  ;;  %v1819_v24 = vsel %vm1806_vm6, %v1799_v21, -inf }
 0x647   : > { %1820 = vmax.xlane.f32.xlu0 %v1819_v24  ;;  %v5341_v25 = vpop.f32.mrf.mxu1 }
 0x648   : > { %v1800_v26 = vadd.f32 %v1792_v23, %v1418_v54 }
 0x649   : > { %v1782_v27 = vpop.f32.mrf.mxu1 }
 0x64a   : > { %v1793_v28 = vmul.f32 0.35355338, %v1782_v27  ;;  %v1822_v29 = vsel %vm1802_vm5, %v1800_v26, -inf }
 0x64b   : > { %1823 = vmax.xlane.f32.xlu1 %v1822_v29  ;;  %v5342_v30 = vpop.f32.mrf.mxu1 }
 0x64c   : > { %v1801_v32 = vadd.f32 %v1793_v28, %v1419_v60 }
 0x64e   : > { %v1825_v33 = vsel %vm1806_vm6, %v1801_v32, -inf }
 0x64f   : > { %1826 = vmax.xlane.f32.xlu0 %v1825_v33 }
 0x655   : > { %v1805_v37 = vpop.xlane.xlu1 %1804 }
 0x656   : > { %v1828_v40 = vsub.f32 %v1794_v58, %v1805_v37 }
 0x658   : > { %v1836_v42 = vmul.f32 1.442695, %v1828_v40 }
 0x659   : > { %v1809_v34 = vpop.xlane.xlu0 %1808 }
 0x65a   : > { %v1829_v35 = vsub.f32 %v1795_v0, %v1809_v34 }
 0x65c   : > { %v1838_v36 = vmul.f32 1.442695, %v1829_v35  ;;  %1896 = vrot.lane.b32.xlu1 %v6442_v31, %s6151_s26 }
 0x65e   : > { %5830 = vpow2.f32 %v1838_v36 }
 0x65f   : > { %5832 = vpow2.f32 %v1836_v42 }
 0x66b   : > { %v6490_v41 = vpop.eup %5830 }
 0x66c   : > { %v1855_v44 = vsel %vm1806_vm6, %v6490_v41, 0.0  ;;  %v5833_v45 = vpop.eup %5832 }
 0x66d   : > { %1856 = vadd.xlane.f32.xlu0 %v1855_v44  ;;  %v1852_v46 = vsel %vm1802_vm5, %v5833_v45, 0.0 }
 0x680   : > { %1853 = vadd.xlane.f32.xlu1 %v1852_v46  ;;  %v1427_v46 = vld [vmem:[%s6212_s14] sm:$0xf] }
 0x6c4   : > { %v1812_v47 = vpop.xlane.xlu0 %1811 }
 0x6c5   : > { %v1830_v48 = vsub.f32 %v1796_v6, %v1812_v47 }
 0x6c7   : > { %v1840_v49 = vmul.f32 1.442695, %v1830_v48 }
 0x6c8   : > { %v1815_v50 = vpop.xlane.xlu0 %1814 }
 0x6c9   : > { %5834 = vpow2.f32 %v1840_v49  ;;  %v1831_v31 = vsub.f32 %v1797_v11, %v1815_v50 }
 0x6cb   : > { %v1842_v52 = vmul.f32 1.442695, %v1831_v31 }
 0x6cc   : > { %v1818_v53 = vpop.xlane.xlu1 %1817 }
 0x6cd   : > { %5836 = vpow2.f32 %v1842_v52  ;;  %v1832_v54 = vsub.f32 %v1798_v16, %v1818_v53  ;;  %v2102_v52 = vsel %vm2100_vm8, %v1427_v46, 0 }
 0x6cf   : > { %v1844_v56 = vmul.f32 1.442695, %v1832_v54  ;;  %v1428_v54 = vld [vmem:[%s6212_s14 + $0x4] sm:$0xf] }
 0x6d0   : > { %v1821_v57 = vpop.xlane.xlu0 %1820 }
 0x6d1   : > { %5838 = vpow2.f32 %v1844_v56  ;;  %v1833_v58 = vsub.f32 %v1799_v21, %v1821_v57  ;;  %v2149_v56 = vsel %vm2100_vm8, %v1428_v54, 0 }
 0x6d3   : > { %v1846_v59 = vmul.f32 1.442695, %v1833_v58 }
 0x6d4   : > { %v1824_v60 = vpop.xlane.xlu1 %1823 }
 0x6d5   : > { %5840 = vpow2.f32 %v1846_v59  ;;  %v1834_v61 = vsub.f32 %v1800_v26, %v1824_v60  ;;  %v1429_v59 = vld [vmem:[%s6212_s14 + $0x8] sm:$0xf] }
 0x6d6   : > { %v6495_v62 = vpop.eup %5834 }
 0x6d7   : > { %v1848_v63 = vmul.f32 1.442695, %v1834_v61  ;;  %v1858_v0 = vsel %vm1802_vm5, %v6495_v62, 0.0 }
 0x6d8   : > { %1859 = vadd.xlane.f32.xlu1 %v1858_v0  ;;  %v1897_v1 = vpop.permute.xlu1 %1896  ;;  %v1827_v2 = vpop.xlane.xlu0 %1826 }
 0x6d9   : > { %5842 = vpow2.f32 %v1848_v63  ;;  %v1903_v3 = vsel %vm1901_vm7, %v1897_v1, 0  ;;  %v1835_v5 = vsub.f32 %v1801_v32, %v1827_v2  ;;  %v1430_v2 = vld [vmem:[%s6212_s14 + $0xc] sm:$0xf] }
 0x6da   : > { %v5837_v6 = vpop.eup %5836  ;;  %5344 = vmatpush3.bf16.msra.mxu1 %v1903_v3 }
 0x6db   : > { %v1850_v7 = vmul.f32 1.442695, %v1835_v5  ;;  %v1861_v8 = vsel %vm1806_vm6, %v5837_v6, 0.0  ;;  %5349 = vmatprep.subr.bf16.mxu1 %v6145_v4 }
 0x6dc   : > { %1862 = vadd.xlane.f32.xlu0 %v1861_v8 }
 0x6dd   : > { %5844 = vpow2.f32 %v1850_v7 }
 0x6de   : > { %v6502_v9 = vpop.eup %5838 }
 0x6df   : > { %v1864_v10 = vsel %vm1802_vm5, %v6502_v9, 0.0 }
 0x6e0   : > { %1865 = vadd.xlane.f32.xlu1 %v1864_v10 }
 0x6e2   : > { %v5841_v11 = vpop.eup %5840 }
 0x6e3   : > { %v1867_v12 = vsel %vm1806_vm6, %v5841_v11, 0.0 }
 0x6e4   : > { %1868 = vadd.xlane.f32.xlu0 %v1867_v12 }
 0x6e6   : > { %v5843_v13 = vpop.eup %5842 }
 0x6e7   : > { %v1870_v14 = vsel %vm1802_vm5, %v5843_v13, 0.0 }
 0x6e8   : > { %1871 = vadd.xlane.f32.xlu1 %v1870_v14 }
 0x6ea   : > { %v5845_v15 = vpop.eup %5844 }
 0x6eb   : > { %v1873_v16 = vsel %vm1806_vm6, %v5845_v15, 0.0 }
 0x6ec   : > { %1874 = vadd.xlane.f32.xlu0 %v1873_v16 }
 0x6f6   : > { %v1857_v17 = vpop.xlane.xlu0 %1856 }
 0x6f7   : > { %5846 = vrcp.f32 %v1857_v17 }
 0x6f9   : > { %1995 = vrot.lane.b32.xlu1 %v6445_v38, %s6151_s26 }
 0x6fd   : > { %2044 = vrot.lane.b32.xlu1 %v6451_v43, %s6151_s26 }
 0x702   : > { %1946 = vrot.lane.b32.xlu0 %v6447_v39, %s6151_s26 }
 0x704   : > { %v5847_v19 = vpop.eup %5846 }
 0x705   : > { %v1885_v22 = vmul.f32 %v5847_v19, %v6490_v41 }
 0x709   : > { %v1854_v18 = vpop.xlane.xlu1 %1853 }
 0x70a   : > { %5848 = vrcp.f32 %v1854_v18 }
 0x717   : > { %v5849_v20 = vpop.eup %5848 }
 0x718   : > { %v1884_v21 = vmul.f32 %v5849_v20, %v5833_v45 }
 0x71a   : > { %v1892_v23 = vpack.c.bf16 %v1885_v22, %v1884_v21 }
 0x71c   : > { %5346 = vmatmul.mubr.msk.bf16.vlgmr.msra.gmra.mxu1 %vm1802_vm5, %v1892_v23 }
 0x71d   : > { %5351 = vmatprep.mubr.msk.bf16.mxu1 %vm6146_vm3, %v6145_v4 }
 0x761   : > { %v1860_v43 = vpop.xlane.xlu1 %1859 }
 0x765   : > { %v1863_v38 = vpop.xlane.xlu0 %1862 }
 0x766   : > { %5850 = vrcp.f32 %v1863_v38 }
 0x767   : > { %5852 = vrcp.f32 %v1860_v43 }
 0x769   : > { %v1866_v39 = vpop.xlane.xlu1 %1865 }
 0x76d   : > { %v1869_v24 = vpop.xlane.xlu0 %1868 }
 0x76e   : > { %5854 = vrcp.f32 %v1869_v24 }
 0x76f   : > { %5856 = vrcp.f32 %v1866_v39 }
 0x771   : > { %v1872_v25 = vpop.xlane.xlu1 %1871 }
 0x772   : > { %5858 = vrcp.f32 %v1872_v25 }
 0x773   : > { %v5851_v26 = vpop.eup %5850 }
 0x774   : > { %v5853_v29 = vpop.eup %5852  ;;  %v1887_v30 = vmul.f32 %v5851_v26, %v5837_v6  ;;  %v2243_v6 = vsel %vm2100_vm8, %v1430_v2, 0  ;;  %v5811_v2 = vld [vmem:[%s6232_s6] sm:$0xff]  }
 0x775   : > { %v1996_v27 = vpop.permute.xlu1 %1995  ;;  %v1875_v28 = vpop.xlane.xlu0 %1874  ;;  %v1886_v36 = vmul.f32 %v5853_v29, %v6495_v62  ;;  %v2196_v62 = vsel %vm2100_vm8, %v1429_v59, 0 }
 0x776   : > { %5860 = vrcp.f32 %v1875_v28  ;;  %v2001_v41 = vsel %vm1901_vm7, %v1996_v27, 0 }
 0x777   : > { %v1893_v37 = vpack.c.bf16 %v1887_v30, %v1886_v36 }
 0x779   : > { %v2045_v32 = vpop.permute.xlu1 %2044  ;;  %v1947_v33 = vpop.permute.xlu0 %1946 }
 0x77a   : > { %v2050_v34 = vsel %vm1901_vm7, %v2045_v32, 0  ;;  %v1952_v35 = vsel %vm1901_vm7, %v1947_v33, 0 }
 0x77b   : > { %5350 = vmatpush3.bf16.msra.mxu1 %v1952_v35  ;;  %5362 = vmatpush3.bf16.msra.mxu0 %v2050_v34  ;;  %v5855_v40 = vpop.eup %5854 }
 0x77c   : > { %5355 = vmatprep.subr.bf16.mxu1 %v6145_v4  ;;  %5373 = vmatprep.subr.bf16.mxu0 %v6145_v4  ;;  %v5857_v42 = vpop.eup %5856  ;;  %v1889_v44 = vmul.f32 %v5855_v40, %v5841_v11 }
 0x77d   : > { %v1888_v47 = vmul.f32 %v5857_v42, %v6502_v9  ;;  %v5069_v42 = vld [vmem:[%s6217_s19] ss:$0 sm:$0xff] }
 0x77e   : > { %5352 = vmatmul.mubr.msk.bf16.vlgmr.msra.gmra.mxu1 %vm1802_vm5, %v1893_v37 }
 0x77f   : > { %5356 = vmatpush3.bf16.msra.mxu1 %v2001_v41  ;;  %5357 = vmatprep.mubr.msk.bf16.mxu1 %vm6146_vm3, %v6145_v4  ;;  %v5859_v45 = vpop.eup %5858  ;;  %v1894_v49 = vpack.c.bf16 %v1889_v44, %v1888_v47 }
 0x780   : > { %5367 = vmatprep.subr.bf16.mxu1 %v6145_v4  ;;  %v1890_v50 = vmul.f32 %v5859_v45, %v5843_v13 }
 0x783   : > { %v5861_v48 = vpop.eup %5860 }
 0x784   : > { %v1891_v31 = vmul.f32 %v5861_v48, %v5845_v15 }
 0x786   : > { %5358 = vmatmul.mubr.msk.bf16.vlgmr.msra.gmra.mxu1 %vm1802_vm5, %v1894_v49  ;;  %v1895_v53 = vpack.c.bf16 %v1891_v31, %v1890_v50 }
 0x787   : > { %5368 = vmatpush3.bf16.msra.mxu1 %v2102_v52  ;;  %5369 = vmatprep.mubr.msk.bf16.mxu1 %vm6146_vm3, %v6145_v4 }
 0x788   : > { %5364 = vmatmul.mubr.msk.bf16.vlgmr.msra.gmra.mxu0 %vm1802_vm5, %v1895_v53  ;;  %5379 = vmatprep.subr.bf16.mxu1 %v6145_v4 }
 0x789   : > { %5375 = vmatprep.mubr.msk.bf16.mxu0 %vm6146_vm3, %v6145_v4  ;;  %5374 = vmatpush3.bf16.msra.mxu0 %v2149_v56 }
 0x78a   : > { %5385 = vmatprep.subr.bf16.mxu0 %v6145_v4 }
 0x7dc   : > { %v1939_v57 = vpop.f32.mrf.mxu1 }
 0x7de   : > { %v5347_v58 = vpop.f32.mrf.mxu1 }
 0x7e0   : > { %v1942_v60 = vpop.f32.mrf.mxu1 }
 0x7e1   : > { %v2093_v61 = vpack.c.bf16 %v1942_v60, %v1939_v57 }
 0x7e2   : > { %v5348_v63 = vpop.f32.mrf.mxu1 }
 0x7e3   : > { %5370 = vmatmul.mubr.msk.bf16.vlgmr.msra.gmra.mxu1 %vm1588_vm4, %v2093_v61 }
 0x7e4   : > { %5380 = vmatpush3.bf16.msra.mxu1 %v2196_v62  ;;  %5381 = vmatprep.mubr.msk.bf16.mxu1 %vm6146_vm3, %v6145_v4 }
 0x7e5   : > { %5391 = vmatprep.subr.bf16.mxu1 %v6145_v4 }
 0x83e   : > { %v1988_v0 = vpop.f32.mrf.mxu1 }
 0x840   : > { %v5353_v1 = vpop.f32.mrf.mxu1 }
 0x841   : > { %v5810_v1 = vld [vmem:[%s6232_s6 + $0x8] sm:$0xff]  }
 0x842   : > { %v1991_v3 = vpop.f32.mrf.mxu1 }
 0x843   : > { %v2094_v5 = vpack.c.bf16 %v1991_v3, %v1988_v0 }
 0x844   : > { %v5354_v7 = vpop.f32.mrf.mxu1 }
 0x845   : > { %5376 = vmatmul.mubr.msk.bf16.vlgmr.msra.gmra.mxu0 %vm1588_vm4, %v2094_v5 }
 0x846   : > { %v2037_v8 = vpop.f32.mrf.mxu1  ;;  %5386 = vmatpush3.bf16.msra.mxu0 %v2243_v6  ;;  %5387 = vmatprep.mubr.msk.bf16.mxu0 %vm6146_vm3, %v6145_v4 }
 0x847   : > { %5399 = vmatprep.subr.bf16.mxu0 %v6145_v4 }
 0x848   : > { %v5359_v9 = vpop.f32.mrf.mxu1  ;;  %v2086_v10 = vpop.f32.mrf.mxu0 }
 0x84a   : > { %v2040_v11 = vpop.f32.mrf.mxu1  ;;  %v5365_v12 = vpop.f32.mrf.mxu0 }
 0x84b   : > { %v2095_v13 = vpack.c.bf16 %v2040_v11, %v2037_v8  ;;  %v5070_v12 = vld [vmem:[%s6222_s24] ss:$0 sm:$0xff] }
 0x84c   : > { %v5360_v14 = vpop.f32.mrf.mxu1  ;;  %v2089_v15 = vpop.f32.mrf.mxu0 }
 0x84d   : > { %v2096_v16 = vpack.c.bf16 %v2089_v15, %v2086_v10  ;;  %5382 = vmatmul.mubr.msk.bf16.vlgmr.msra.gmra.mxu1 %vm1588_vm4, %v2095_v13 }
 0x84e   : > { %v5366_v17 = vpop.f32.mrf.mxu0  ;;  %5395 = vmatprep.mubr.msk.bf16.mxu1 %vm6146_vm3, %v6145_v4  ;;  %5392 = vmatpush3.bf16.msra.mxu1 %v5810_v1 }
 0x84f   : > { %5388 = vmatmul.mubr.msk.bf16.vlgmr.msra.gmra.mxu0 %vm1588_vm4, %v2096_v16  ;;  %5393 = vmatprep.subr.bf16.mxu1 %v6145_v4  ;;  %v5071_v16 = vld [vmem:[%s7471_s28] ss:$0 sm:$0xff] }
 0x850   : > { %5415 = vmatprep.mubr.msk.bf16.mxu0 %vm6146_vm3, %v6145_v4 }
 0x852   : > { %5394 = vmatpush3.bf16.msra.mxu1 %v5811_v2 }
 0x853   : > { %5419 = vmatprep.subr.mxu1 %v6145_v4 }
 0x8a3   : > { %v2138_v18 = vpop.f32.mrf.mxu1 }
 0x8a4   : > { %v2286_v24 = vsel %vm1373_vm1, %v2138_v18, 0.0 }
 0x8a5   : > { %v5371_v19 = vpop.f32.mrf.mxu1 }
 0x8a7   : > { %v2141_v20 = vpop.f32.mrf.mxu1 }
 0x8a8   : > { %v2293_v33 = vsel %vm1377_vm2, %v2141_v20, 0.0 }
 0x8a9   : > { %v5372_v21 = vpop.f32.mrf.mxu1 }
 0x8aa   : > { %v5812_v21 = vld [vmem:[%s7472_s1 + $0x38] sm:$0xff]  }
 0x8ab   : > { %5400 = vmatpush3.bf16.msra.mxu0 %v5812_v21 }
 0x8ac   : > { %5401 = vmatprep.subr.bf16.mxu0 %v6145_v4 }
 0x905   : > { %v2185_v22 = vpop.f32.mrf.mxu0 }
 0x906   : > { %v2287_v43 = vsel %vm1373_vm1, %v2185_v22, 0.0  ;;  %v5813_v22 = vld [vmem:[%s7472_s1 + $0x30] sm:$0xff]  }
 0x907   : > { %v5377_v23 = vpop.f32.mrf.mxu0  ;;  %v2288_v25 = vadd.f32 %v2287_v43, %v2286_v24  ;;  %5402 = vmatpush3.bf16.msra.mxu0 %v5813_v22  ;;  %v5816_v43 = vld [vmem:[%s7472_s1 + $0x18] sm:$0xff]   ;;  %v5818_v24 = vld [vmem:[%s7472_s1 + $0x8] sm:$0xff]  }
 0x908   : > { %5403 = vmatprep.subr.bf16.mxu0 %v6145_v4  ;;  %v5814_v23 = vld [vmem:[%s7472_s1 + $0x28] sm:$0xff]  }
 0x909   : > { %v2188_v38 = vpop.f32.mrf.mxu0 }
 0x90a   : > { %v2294_v27 = vsel %vm1377_vm2, %v2188_v38, 0.0  ;;  %v5815_v38 = vld [vmem:[%s7472_s1 + $0x20] sm:$0xff]  }
 0x90b   : > { %v5378_v39 = vpop.f32.mrf.mxu0  ;;  %v2295_v35 = vadd.f32 %v2294_v27, %v2293_v33  ;;  %5404 = vmatpush3.bf16.msra.mxu0 %v5814_v23 }
 0x90c   : > { %5405 = vmatprep.subr.bf16.mxu0 %v6145_v4  ;;  %v5817_v39 = vld [vmem:[%s7472_s1 + $0x10] sm:$0xff]  }
 0x90d   : > { %v2232_v26 = vpop.f32.mrf.mxu1 }
 0x90e   : > { %v2289_v28 = vsel %vm1373_vm1, %v2232_v26, 0.0  ;;  %v5072_v26 = vld [vmem:[%s7473_s2] ss:$0 sm:$0xff] }
 0x90f   : > { %v2290_v29 = vadd.f32 %v2289_v28, %v2288_v25  ;;  %v5383_v30 = vpop.f32.mrf.mxu1  ;;  %v2279_v32 = vpop.f32.mrf.mxu0  ;;  %5406 = vmatpush3.bf16.msra.mxu0 %v5815_v38  ;;  %v5819_v25 = vld [vmem:[%s7472_s1] sm:$0xff]  }
 0x910   : > { %v2291_v34 = vsel %vm1373_vm1, %v2279_v32, 0.0  ;;  %5407 = vmatprep.subr.bf16.mxu0 %v6145_v4 }
 0x911   : > { %v2292_v36 = vadd.f32 %v2291_v34, %v2290_v29  ;;  %v2235_v37 = vpop.f32.mrf.mxu1  ;;  %v5389_v40 = vpop.f32.mrf.mxu0 }
 0x912   : > { %v2296_v41 = vsel %vm1377_vm2, %v2235_v37, 0.0 }
 0x913   : > { %v2300_v44 = vadd.f32 %v2292_v36, %v6414_v51  ;;  %v2297_v45 = vadd.f32 %v2296_v41, %v2295_v35  ;;  %v5384_v46 = vpop.f32.mrf.mxu1  ;;  %v2282_v47 = vpop.f32.mrf.mxu0  ;;  %5408 = vmatpush3.bf16.msra.mxu0 %v5816_v43 }
 0x914   : > { %v2298_v48 = vsel %vm1377_vm2, %v2282_v47, 0.0  ;;  %5409 = vmatprep.subr.bf16.mxu0 %v6145_v4 }
 0x915   : > { %v2299_v49 = vadd.f32 %v2298_v48, %v2297_v45  ;;  %v5390_v50 = vpop.f32.mrf.mxu0  ;;  %v6570_v31 = vadd.f32 %v5069_v42, %v2300_v44 }
 0x917   : > { %v2301_v52 = vadd.f32 %v2299_v49, %v6418_v55  ;;  %v2310_v53 = vsel %vm1373_vm1, %v6570_v31, 0.0  ;;  %5410 = vmatpush3.bf16.msra.mxu0 %v5817_v39 }
 0x918   : > { %2311 = vadd.xlane.f32.xlu1 %v2310_v53  ;;  %5411 = vmatprep.subr.bf16.mxu0 %v6145_v4 }
 0x919   : > { %v6575_v54 = vadd.f32 %v5069_v42, %v2301_v52  ;;  %v5078_v52 = vld [vmem:[%s7474_s0] ss:$0 sm:$0xff] }
 0x91b   : > { %v2313_v51 = vsel %vm1377_vm2, %v6575_v54, 0.0  ;;  %5412 = vmatpush3.bf16.msra.mxu0 %v5818_v24 }
 0x91c   : > { %2314 = vadd.xlane.f32.xlu0 %v2313_v51  ;;  %5413 = vmatprep.subr.bf16.mxu0 %v6145_v4 }
 0x91f   : > { %5414 = vmatpush3.bf16.msra.mxu0 %v5819_v25 }
 0x9a1   : > { %v2312_v56 = vpop.xlane.xlu1 %2311 }
 0x9a2   : > { %v2316_v57 = vmul.f32 0.03125, %v2312_v56 }
 0x9a4   : > { %v2318_v58 = vsub.f32 %v6570_v31, %v2316_v57 }
 0x9a5   : > { %v2315_v59 = vpop.xlane.xlu0 %2314 }
 0x9a6   : > { %v2317_v60 = vmul.f32 0.03125, %v2315_v59  ;;  %v2320_v61 = vmul.f32 %v2318_v58, %v2318_v58 }
 0x9a8   : > { %v2319_v55 = vsub.f32 %v6575_v54, %v2317_v60  ;;  %v2322_v62 = vsel %vm1373_vm1, %v2320_v61, 0.0  ;;  %v2529_v61 = vld [vmem:[%s7475_s11] sm:$0x3] }
 0x9a9   : > { %2323 = vadd.xlane.f32.xlu0 %v2322_v62 }
 0x9aa   : > { %v2321_v63 = vmul.f32 %v2319_v55, %v2319_v55 }
 0x9ac   : > { %v2325_v0 = vsel %vm1377_vm2, %v2321_v63, 0.0 }
 0x9ad   : > { %2326 = vadd.xlane.f32.xlu0 %v2325_v0 }
 0xa32   : > { %v2324_v3 = vpop.xlane.xlu0 %2323 }
 0xa33   : > { %v2328_v5 = vmul.f32 0.03125, %v2324_v3  ;;  %v5820_v3 = vld [vmem:[%s7476_s16 + $0x8] sm:$0xff]  }
 0xa35   : > { %v2330_v6 = vadd.f32 1e-05, %v2328_v5  ;;  %v5821_v5 = vld [vmem:[%s7476_s16] sm:$0xff]  }
 0xa36   : > { %v2327_v7 = vpop.xlane.xlu0 %2326 }
 0xa37   : > { %5862 = vrsqrt.f32 %v2330_v6  ;;  %v2329_v8 = vmul.f32 0.03125, %v2327_v7 }
 0xa39   : > { %v2331_v9 = vadd.f32 1e-05, %v2329_v8 }
 0xa3b   : > { %5864 = vrsqrt.f32 %v2331_v9 }
 0xa44   : > { %v5863_v10 = vpop.eup %5862 }
 0xa45   : > { %v2334_v11 = vmul.f32 %v5863_v10, %v2318_v58  ;;  %v5089_v10 = vld [vmem:[%s7477_s18] ss:$0 sm:$0xff] }
 0xa47   : > { %v2342_v15 = vmul.f32 %v5070_v12, %v2334_v11 }
 0xa48   : > { %v5865_v13 = vpop.eup %5864 }
 0xa49   : > { %v2335_v14 = vmul.f32 %v5865_v13, %v2319_v55  ;;  %v2350_v18 = vadd.f32 %v5071_v16, %v2342_v15 }
 0xa4b   : > { %v2343_v17 = vmul.f32 %v5070_v12, %v2335_v14  ;;  %v5090_v12 = vld [vmem:[%s7478_s22] ss:$0 sm:$0xff] }
 0xa4d   : > { %v2351_v19 = vadd.f32 %v5071_v16, %v2343_v17 }
 0xa4f   : > { %v2352_v20 = vpack.c.bf16 %v2351_v19, %v2350_v18 }
 0xa51   : > { %5396 = vmatmul.mubr.msk.bf16.vlgmr.msra.gmra.mxu1 %vm1373_vm1, %v2352_v20 }
 0xa52   : > { %5423 = vmatprep.mubr.msk.f32.mxu1 %vm6146_vm3, %v6145_v4 }
 0xb11   : > { %v2408_v27 = vpop.f32.mrf.mxu1 }
 0xb12   : > { %v2409_v28 = vadd.f32 %v5072_v26, %v2408_v27 }
 0xb13   : > { %v5397_v29 = vpop.f32.mrf.mxu1 }
 0xb14   : > { %v5076_v30 = vmul.f32 -1.702, %v2409_v28 }
 0xb15   : > { %v2411_v32 = vpop.f32.mrf.mxu1 }
 0xb16   : > { %v2419_v33 = vmul.f32 1.442695, %v5076_v30  ;;  %v2412_v34 = vadd.f32 %v5072_v26, %v2411_v32 }
 0xb17   : > { %v5398_v35 = vpop.f32.mrf.mxu1 }
 0xb18   : > { %5866 = vpow2.f32 %v2419_v33  ;;  %v5077_v36 = vmul.f32 -1.702, %v2412_v34 }
 0xb1a   : > { %v2421_v37 = vmul.f32 1.442695, %v5077_v36 }
 0xb1c   : > { %5868 = vpow2.f32 %v2421_v37 }
 0xb25   : > { %v5867_v40 = vpop.eup %5866 }
 0xb26   : > { %v2423_v41 = vadd.f32 1.0, %v5867_v40 }
 0xb28   : > { %5870 = vrcp.f32 %v2423_v41 }
 0xb29   : > { %v5869_v42 = vpop.eup %5868 }
 0xb2a   : > { %v2424_v44 = vadd.f32 1.0, %v5869_v42 }
 0xb2c   : > { %5872 = vrcp.f32 %v2424_v44 }
 0xb35   : > { %v5871_v45 = vpop.eup %5870 }
 0xb36   : > { %v2429_v47 = vmul.f32 %v5871_v45, %v2409_v28 }
 0xb39   : > { %v5873_v46 = vpop.eup %5872 }
 0xb3a   : > { %v2430_v48 = vmul.f32 %v5873_v46, %v2412_v34 }
 0xb3c   : > { %v2431_v49 = vpack.c.bf16 %v2430_v48, %v2429_v47 }
 0xb3e   : > { %5416 = vmatmul.mubr.bf16.vlgmr.msra.gmra.mxu0 %v2431_v49 }
 0xbfe   : > { %v2520_v50 = vpop.f32.mrf.mxu0 }
 0xbff   : > { %v2521_v56 = vadd.f32 %v5078_v52, %v2520_v50 }
 0xc00   : > { %v5417_v53 = vpop.f32.mrf.mxu0 }
 0xc01   : > { %v2527_v60 = vadd.f32 %v2521_v56, %v6570_v31 }
 0xc02   : > { %v2523_v51 = vpop.f32.mrf.mxu0 }
 0xc03   : > { %v2524_v57 = vadd.f32 %v5078_v52, %v2523_v51 }
 0xc04   : > { %v5418_v58 = vpop.f32.mrf.mxu0 }
 0xc05   : > { %v2528_v59 = vadd.f32 %v2524_v57, %v6575_v54 }
 0xc07   : > { %5420 = vmatpush3.msk.msra.mxu1 %vm2533_vm9, %v2528_v59 }
 0xc08   : > { %5421 = vmatprep.subr.mxu1 %v6145_v4 }
 0xc09   : > { %5422 = vmatpush3.msra.mxu1 %v2527_v60 }
 0xc0a   : > { %5424 = vmatmul.mubr.msk.f32.vlgmr.msra.gmra.mxu1 %vm1802_vm5, %v2529_v61  ;;  %5426 = vmatprep.subr.bf16.mxu1 %v6145_v4 }
 0xc0b   : > { %5430 = vmatprep.mubr.msk.bf16.mxu1 %vm6146_vm3, %v6145_v4  ;;  %5427 = vmatpush3.bf16.msra.mxu1 %v5820_v3 }
 0xc0c   : > { %5428 = vmatprep.subr.bf16.mxu1 %v6145_v4 }
 0xc0f   : > { %5429 = vmatpush3.bf16.msra.mxu1 %v5821_v5 }
 0xcca   : > { %v2603_v55 = vpop.f32.mrf.mxu1 }
 0xccb   : > { %v2609_v62 = vsel %vm1377_vm2, %v2603_v55, 0.0 }
 0xccc   : > { %2610 = vadd.xlane.f32.xlu1 %v2609_v62  ;;  %v5425_v54 = vpop.f32.mrf.mxu1 }
 0xd55   : > { %v2611_v31 = vpop.xlane.xlu1 %2610 }
 0xd56   : > { %v2612_v63 = vmul.f32 0.03125, %v2611_v31 }
 0xd58   : > { %v2613_v0 = vsub.f32 %v2603_v55, %v2612_v63 }
 0xd5a   : > { %v2614_v1 = vmul.f32 %v2613_v0, %v2613_v0 }
 0xd5c   : > { %v2615_v2 = vsel %vm1377_vm2, %v2614_v1, 0.0 }
 0xd5d   : > { %2616 = vadd.xlane.f32.xlu0 %v2615_v2 }
 0xde6   : > { %v2617_v6 = vpop.xlane.xlu0 %2616 }
 0xde7   : > { %v2618_v7 = vmul.f32 0.03125, %v2617_v6 }
 0xde9   : > { %v2619_v8 = vadd.f32 1e-05, %v2618_v7 }
 0xdeb   : > { %5874 = vrsqrt.f32 %v2619_v8 }
 0xdf8   : > { %v5875_v9 = vpop.eup %5874 }
 0xdf9   : > { %v2621_v11 = vmul.f32 %v5875_v9, %v2613_v0 }
 0xdfb   : > { %v2628_v13 = vmul.f32 %v5089_v10, %v2621_v11 }
 0xdfd   : > { %v2635_v14 = vadd.f32 %v5090_v12, %v2628_v13 }
 0xdff   : > { %v2640_v15 = vpack.c.bf16 %v2635_v14, %v2635_v14 }
 0xe01   : > { %5431 = vmatmul.mubr.msk.bf16.vlgmr.msra.gmra.mxu1 %vm1373_vm1, %v2640_v15 }
 0xec1   : > { %v2690_v16 = vpop.f32.mrf.mxu1 }
 0xec2   : > { %v2696_v17 = vmul.f32 %v2690_v16, %v2690_v16 }
 0xec3   : > { %v5432_v18 = vpop.f32.mrf.mxu1 }
 0xec4   : > { %v2697_v19 = vsel %vm1377_vm2, %v2696_v17, 0.0 }
 0xec5   : > { %2698 = vadd.xlane.f32.xlu1 %v2697_v19  ;;  %v2693_v20 = vpop.f32.mrf.mxu1 }
 0xec7   : > { %v5433_v21 = vpop.f32.mrf.mxu1 }
 0xf4e   : > { %v2699_v22 = vpop.xlane.xlu1 %2698 }
 0xf4f   : > { %v2700_v23 = vadd.f32 1e-12, %v2699_v22 }
 0xf51   : > { %5876 = vrsqrt.f32 %v2700_v23 }
 0xf5e   : > { %v5877_v38 = vpop.eup %5876 }
 0xf5f   : > { %v2702_v43 = vmul.f32 %v5877_v38, %v2690_v16 }
 0xf61   : > { %2703 = vst.msk [vmem:[%s6387_s15] sm:$0x3] %vm1377_vm2, %v2702_v43 }
 0xf62 PF: > { %p5094_p5 = scmp.ne.s32.totalorder %s6380_s10, 1 }
 0xf63   : > { %s7479_s23 = sld [smem:[#allocation10_spill]] (!%p5094_p5)  ;;  %s6154_s11 = smov (!%p5094_p5), 120  }
 0xf64   : > { %2709 = sbr.rel (%p5094_p5) target bundleno = 7318 (0x1c96), region = 192  ;;  %s7480_s26 = sld [smem:[#allocation11_spill]] (!%p5094_p5) }
 0xf65   : > { %s7481_s10 = sld [smem:[#allocation14_spill]] (!%p5094_p5)  ;;  %s6155_s18 = smov (!%p5094_p5), 112  }
 0xf66   : > { %s7482_s28 = sld [smem:[#allocation12_spill]] (!%p5094_p5)  ;;  %s6156_s22 = smov (!%p5094_p5), 104  }
 0xf67   : > { %s7483_s2 = sld [smem:[#allocation13_spill]] (!%p5094_p5) }
 0xf68   : > { %s7484_s0 = sld [smem:[#allocation15_spill]] (!%p5094_p5) }
 0xf69   : > { %v2710_v4 = vld [vmem:[%s7479_s23] sm:$0xff]  ;;  %vm2770_vm11 = vcmask 261120   ;;  %v2712_v24 = vld [vmem:[%s7479_s23 + $0x10] sm:$0xff]  ;;  %v2711_v27 = vld [vmem:[%s7479_s23 + $0x8] sm:$0xff]  ;;  %v6152_v17 = vmov 0.0   ;;  %vm6153_vm12 = vmmov 0  }
 0xf6a   : > { %v2716_v39 = vld [vmem:[%s7480_s26] sm:$0xff]  ;;  %v2718_v26 = vld [vmem:[%s7480_s26 + $0x10] sm:$0xff]  ;;  %v2717_v28 = vld [vmem:[%s7480_s26 + $0x8] sm:$0xff]  ;;  %5434 = vmatprep.subr.bf16.mxu0 %v6152_v17  ;;  %5438 = vmatprep.mubr.msk.bf16.mxu0 %vm6153_vm12, %v6152_v17  ;;  %vm3042_vm13 = vcmask 64512   ;;  %vm3418_vm14 = vcmask 392192   ;;  %vm4016_vm15 = vcmask 1043456  }
 0xf6b   : > { %v6634_v25 = vadd.f32 %v2716_v39, %v2710_v4  ;;  %v6639_v29 = vadd.f32 %v2718_v26, %v2712_v24  ;;  %v6641_v30 = vadd.f32 %v2717_v28, %v2711_v27  ;;  %v2713_v32 = vld [vmem:[%s7479_s23 + $0x18] sm:$0xff]  ;;  %v2714_v34 = vld [vmem:[%s7479_s23 + $0x20] sm:$0xff]  ;;  %v2715_v40 = vld [vmem:[%s7479_s23 + $0x28] sm:$0xff]  ;;  %5450 = vmatprep.subr.bf16.mxu1 %v6152_v17  ;;  %5456 = vmatprep.mubr.msk.bf16.mxu1 %vm6153_vm12, %v6152_v17  ;;  %vm4940_vm0 = vcmask 256000  }
 0xf6c   : > { %v2719_v33 = vld [vmem:[%s7480_s26 + $0x18] sm:$0xff]  ;;  %v2720_v37 = vld [vmem:[%s7480_s26 + $0x20] sm:$0xff]  ;;  %v2721_v41 = vld [vmem:[%s7480_s26 + $0x28] sm:$0xff] }
 0xf6d   : > { %v2771_v35 = vsel %vm2770_vm11, %v6634_v25, 0.0  ;;  %v6648_v36 = vadd.f32 %v2719_v33, %v2713_v32  ;;  %v2777_v42 = vsel %vm2770_vm11, %v6639_v29, 0.0  ;;  %v6655_v44 = vadd.f32 %v2720_v37, %v2714_v34  ;;  %v5923_v16 = vld [vmem:[%s7481_s10 + $0x8] sm:$0xff]   ;;  %v5924_v18 = vld [vmem:[%s7481_s10] sm:$0xff]  }
 0xf6e   : > { %2772 = vadd.xlane.f32.xlu0 %v2771_v35  ;;  %v6657_v45 = vadd.f32 %v2721_v41, %v2715_v40  ;;  %2778 = vadd.xlane.f32.xlu1 %v2777_v42  ;;  %v2774_v46 = vsel %vm2770_vm11, %v6641_v30, 0.0  ;;  %v5095_v42 = vld [vmem:[%s7482_s28] ss:$0 sm:$0xff]  ;;  %s6157_s28 = smov 96  }
 0xf6f   : > { %v2780_v47 = vsel %vm2770_vm11, %v6648_v36, 0.0  ;;  %v2783_v48 = vsel %vm2770_vm11, %v6655_v44, 0.0  ;;  %5435 = vmatpush3.bf16.msra.mxu0 %v5923_v16 }
 0xf70   : > { %v2786_v49 = vsel %vm2770_vm11, %v6657_v45, 0.0  ;;  %5436 = vmatprep.subr.bf16.mxu0 %v6152_v17 }
 0xf72   : > { %2775 = vadd.xlane.f32.xlu0 %v2774_v46  ;;  %2781 = vadd.xlane.f32.xlu1 %v2780_v47 }
 0xf73   : > { %5437 = vmatpush3.bf16.msra.mxu0 %v5924_v18 }
 0xf74   : > { %5468 = vmatprep.subr.bf16.mxu0 %v6152_v17 }
 0xf76   : > { %2784 = vadd.xlane.f32.xlu0 %v2783_v48  ;;  %2787 = vadd.xlane.f32.xlu1 %v2786_v49 }
 0xff7   : > { %v2773_v50 = vpop.xlane.xlu0 %2772  ;;  %v2779_v53 = vpop.xlane.xlu1 %2778 }
 0xff8   : > { %v2790_v52 = vmul.f32 0.03125, %v2773_v50  ;;  %v2792_v51 = vmul.f32 0.03125, %v2779_v53  ;;  %v5096_v50 = vld [vmem:[%s7483_s2] ss:$0 sm:$0xff]  ;;  %s6158_s2 = smov 64  }
 0xffa   : > { %v6668_v56 = vsub.f32 %v6634_v25, %v2790_v52  ;;  %v6671_v57 = vsub.f32 %v6639_v29, %v2792_v51 }
 0xffb   : > { %v2776_v58 = vpop.xlane.xlu0 %2775  ;;  %v2782_v60 = vpop.xlane.xlu1 %2781 }
 0xffc   : > { %v2791_v59 = vmul.f32 0.03125, %v2776_v58  ;;  %v2802_v61 = vmul.f32 %v6668_v56, %v6668_v56  ;;  %v2793_v55 = vmul.f32 0.03125, %v2782_v60  ;;  %v2804_v62 = vmul.f32 %v6671_v57, %v6671_v57 }
 0xffe   : > { %v6678_v54 = vsub.f32 %v6641_v30, %v2791_v59  ;;  %v2808_v31 = vsel %vm2770_vm11, %v2802_v61, 0.0  ;;  %v6682_v63 = vsub.f32 %v6648_v36, %v2793_v55  ;;  %v2814_v3 = vsel %vm2770_vm11, %v2804_v62, 0.0 }
 0xfff   : > { %2809 = vadd.xlane.f32.xlu0 %v2808_v31  ;;  %v2785_v0 = vpop.xlane.xlu0 %2784  ;;  %v2788_v2 = vpop.xlane.xlu1 %2787 }
0x1000   : > { %v2794_v1 = vmul.f32 0.03125, %v2785_v0  ;;  %v2803_v5 = vmul.f32 %v6678_v54, %v6678_v54  ;;  %v2795_v6 = vmul.f32 0.03125, %v2788_v2  ;;  %v2805_v7 = vmul.f32 %v6682_v63, %v6682_v63 }
0x1002   : > { %v6690_v8 = vsub.f32 %v6655_v44, %v2794_v1  ;;  %v2811_v9 = vsel %vm2770_vm11, %v2803_v5, 0.0  ;;  %v6694_v10 = vsub.f32 %v6657_v45, %v2795_v6  ;;  %v2817_v11 = vsel %vm2770_vm11, %v2805_v7, 0.0 }
0x1003   : > { %2815 = vadd.xlane.f32.xlu0 %v2814_v3  ;;  %2812 = vadd.xlane.f32.xlu1 %v2811_v9 }
0x1004   : > { %v2806_v12 = vmul.f32 %v6690_v8, %v6690_v8  ;;  %v2807_v13 = vmul.f32 %v6694_v10, %v6694_v10 }
0x1006   : > { %v2820_v14 = vsel %vm2770_vm11, %v2806_v12, 0.0  ;;  %v2823_v15 = vsel %vm2770_vm11, %v2807_v13, 0.0 }
0x1007   : > { %2818 = vadd.xlane.f32.xlu1 %v2817_v11  ;;  %2821 = vadd.xlane.f32.xlu0 %v2820_v14  ;;  %v5097_v14 = vld [vmem:[%s7484_s0] ss:$0 sm:$0xff]  ;;  %s7485_s0 = sld [smem:[#allocation24_spill]] }
0x100b   : > { %2824 = vadd.xlane.f32.xlu1 %v2823_v15 }
0x1088   : > { %v2810_v19 = vpop.xlane.xlu0 %2809 }
0x1089   : > { %v2826_v20 = vmul.f32 0.03125, %v2810_v19 }
0x108b   : > { %v2832_v21 = vadd.f32 1e-05, %v2826_v20 }
0x108c   : > { %v2813_v22 = vpop.xlane.xlu1 %2812  ;;  %v2816_v23 = vpop.xlane.xlu0 %2815 }
0x108d   : > { %5937 = vrsqrt.f32 %v2832_v21  ;;  %v2827_v38 = vmul.f32 0.03125, %v2813_v22  ;;  %v2828_v43 = vmul.f32 0.03125, %v2816_v23 }
0x108f   : > { %v2833_v4 = vadd.f32 1e-05, %v2827_v38  ;;  %v2834_v39 = vadd.f32 1e-05, %v2828_v43 }
0x1090   : > { %v2819_v24 = vpop.xlane.xlu1 %2818  ;;  %v2822_v26 = vpop.xlane.xlu0 %2821 }
0x1091   : > { %5939 = vrsqrt.f32 %v2833_v4  ;;  %v2829_v27 = vmul.f32 0.03125, %v2819_v24  ;;  %v2830_v32 = vmul.f32 0.03125, %v2822_v26 }
0x1092   : > { %5941 = vrsqrt.f32 %v2834_v39 }
0x1093   : > { %v2835_v28 = vadd.f32 1e-05, %v2829_v27  ;;  %v2836_v35 = vadd.f32 1e-05, %v2830_v32 }
0x1094   : > { %v2825_v33 = vpop.xlane.xlu1 %2824 }
0x1095   : > { %5943 = vrsqrt.f32 %v2835_v28  ;;  %v2831_v34 = vmul.f32 0.03125, %v2825_v33 }
0x1097   : > { %v2837_v37 = vadd.f32 1e-05, %v2831_v34 }
0x1099   : > { %5945 = vrsqrt.f32 %v2837_v37 }
0x109a   : > { %v5938_v40 = vpop.eup %5937  ;;  %5947 = vrsqrt.f32 %v2836_v35 }
0x109b   : > { %v2844_v41 = vmul.f32 %v5938_v40, %v6668_v56 }
0x109d   : > { %v2856_v48 = vmul.f32 %v5095_v42, %v2844_v41 }
0x109e   : > { %v5940_v46 = vpop.eup %5939 }
0x109f   : > { %v2845_v47 = vmul.f32 %v5940_v46, %v6678_v54  ;;  %v5942_v49 = vpop.eup %5941  ;;  %v2868_v51 = vadd.f32 %v5096_v50, %v2856_v48 }
0x10a0   : > { %v2846_v59 = vmul.f32 %v5942_v49, %v6671_v57 }
0x10a1   : > { %v2857_v52 = vmul.f32 %v5095_v42, %v2845_v47 }
0x10a2   : > { %v5944_v53 = vpop.eup %5943  ;;  %v2858_v56 = vmul.f32 %v5095_v42, %v2846_v59 }
0x10a3   : > { %v2869_v58 = vadd.f32 %v5096_v50, %v2857_v52  ;;  %v2847_v60 = vmul.f32 %v5944_v53, %v6682_v63 }
0x10a4   : > { %v2870_v1 = vadd.f32 %v5096_v50, %v2858_v56 }
0x10a5   : > { %v2874_v61 = vpack.c.bf16 %v2869_v58, %v2868_v51  ;;  %v2859_v55 = vmul.f32 %v5095_v42, %v2847_v60 }
0x10a6   : > { %v5946_v62 = vpop.eup %5945 }
0x10a7   : > { %5439 = vmatmul.mubr.msk.bf16.vlgmr.msra.gmra.mxu0 %vm2770_vm11, %v2874_v61  ;;  %v5948_v31 = vpop.eup %5947  ;;  %v2871_v54 = vadd.f32 %v5096_v50, %v2859_v55  ;;  %v2849_v0 = vmul.f32 %v5946_v62, %v6694_v10 }
0x10a8   : > { %5442 = vmatprep.mubr.msk.bf16.mxu0 %vm6153_vm12, %v6152_v17  ;;  %v2848_v2 = vmul.f32 %v5948_v31, %v6690_v8 }
0x10a9   : > { %v2875_v3 = vpack.c.bf16 %v2871_v54, %v2870_v1  ;;  %v2861_v57 = vmul.f32 %v5095_v42, %v2849_v0 }
0x10aa   : > { %v2860_v63 = vmul.f32 %v5095_v42, %v2848_v2 }
0x10ab   : > { %v2873_v5 = vadd.f32 %v5096_v50, %v2861_v57 }
0x10ac   : > { %v2872_v6 = vadd.f32 %v5096_v50, %v2860_v63 }
0x10ae   : > { %v2876_v7 = vpack.c.bf16 %v2873_v5, %v2872_v6 }
0x10af   : > { %5443 = vmatmul.mubr.msk.bf16.gmra.mxu0 %vm2770_vm11, %v2875_v3 }
0x10b0   : > { %5446 = vmatprep.mubr.msk.bf16.mxu0 %vm6153_vm12, %v6152_v17 }
0x10b7   : > { %5447 = vmatmul.mubr.msk.bf16.gmra.mxu0 %vm2770_vm11, %v2876_v7 }
0x10b8   : > { %5474 = vmatprep.mubr.msk.bf16.mxu0 %vm6153_vm12, %v6152_v17 }
0x1167   : > { %v2938_v9 = vpop.f32.mrf.mxu0 }
0x1168   : > { %v2939_v23 = vadd.f32 %v5097_v14, %v2938_v9 }
0x1169   : > { %v5440_v10 = vpop.f32.mrf.mxu0 }
0x116b   : > { %v2941_v8 = vpop.f32.mrf.mxu0 }
0x116c   : > { %v2942_v20 = vadd.f32 %v5097_v14, %v2941_v8 }
0x116d   : > { %v5441_v11 = vpop.f32.mrf.mxu0 }
0x116e   : > { %v5888_v43 = vpack.i.bf16 %v2942_v20, %v2939_v23  ;;  %v6739_v33 = vpack.c.bf16 %v2942_v20, %v2939_v23 }
0x116f   : > { %v2946_v12 = vpop.f32.mrf.mxu0 }
0x1170   : > { %v2947_v16 = vadd.f32 %v5097_v14, %v2946_v12 }
0x1171   : > { %v5444_v13 = vpop.f32.mrf.mxu0 }
0x1173   : > { %v2949_v15 = vpop.f32.mrf.mxu0 }
0x1174   : > { %v2950_v18 = vadd.f32 %v5097_v14, %v2949_v15 }
0x1175   : > { %v5445_v19 = vpop.f32.mrf.mxu0 }
0x1176   : > { %v5883_v21 = vpack.i.bf16 %v2950_v18, %v2947_v16  ;;  %v6735_v32 = vpack.c.bf16 %v2950_v18, %v2947_v16 }
0x1177   : > { %v2954_v22 = vpop.f32.mrf.mxu0 }
0x1178   : > { %5884 = vrot.lane.b32.xlu1 %v5883_v21, %s6154_s11  ;;  %v2955_v39 = vadd.f32 %v5097_v14, %v2954_v22 }
0x1179   : > { %v5448_v38 = vpop.f32.mrf.mxu0 }
0x117b   : > { %v2957_v4 = vpop.f32.mrf.mxu0 }
0x117c   : > { %v2958_v24 = vadd.f32 %v5097_v14, %v2957_v4  ;;  %5889 = vrot.lane.b32.xlu1 %v5888_v43, %s6154_s11 }
0x117d   : > { %v5449_v26 = vpop.f32.mrf.mxu0 }
0x117e   : > { %v5893_v27 = vpack.i.bf16 %v2958_v24, %v2955_v39  ;;  %v6731_v28 = vpack.c.bf16 %v2958_v24, %v2955_v39 }
0x1180   : > { %5894 = vrot.lane.b32.xlu1 %v5893_v27, %s6155_s18  ;;  %5879 = vrot.lane.b32.xlu0 %v5893_v27, %s6154_s11  ;;  %s7486_s11 = sld [smem:[#allocation16_spill]] }
0x1184   : > { %5904 = vrot.lane.b32.xlu1 %v5883_v21, %s6155_s18  ;;  %5899 = vrot.lane.b32.xlu0 %v5893_v27, %s6156_s22 }
0x1188   : > { %5914 = vrot.lane.b32.xlu1 %v5888_v43, %s6155_s18  ;;  %5909 = vrot.lane.b32.xlu0 %v5883_v21, %s6156_s22  ;;  %s7487_s18 = sld [smem:[#allocation17_spill]] }
0x118c   : > { %5919 = vrot.lane.b32.xlu0 %v5888_v43, %s6156_s22  ;;  %3040 = vrot.lane.b32.xlu1 %v6731_v28, %s6157_s28  ;;  %s7488_s22 = sld [smem:[#allocation20_spill]] }
0x1190   : > { %3038 = vrot.lane.b32.xlu1 %v6735_v32, %s6157_s28 }
0x1194   : > { %3036 = vrot.lane.b32.xlu1 %v6739_v33, %s6157_s28 }
0x11ea   : > { %v5885_v34 = vpop.permute.xlu1 %5884 }
0x11eb   : > { %v5887_v48 = vunpack.i.h.bf16 %v5885_v34  ;;  %v5886_v49 = vunpack.i.l.bf16 %v5885_v34 }
0x11ed   : > { %v6751_v55 = vpack.c.bf16 %v5887_v48, %v5886_v49 }
0x11ee   : > { %v5890_v35 = vpop.permute.xlu1 %5889 }
0x11ef   : > { %v5892_v60 = vunpack.i.h.bf16 %v5890_v35  ;;  %v5891_v61 = vunpack.i.l.bf16 %v5890_v35 }
0x11f1   : > { %v6761_v57 = vpack.c.bf16 %v5892_v60, %v5891_v61 }
0x11f2   : > { %v5895_v37 = vpop.permute.xlu1 %5894  ;;  %v5880_v40 = vpop.permute.xlu0 %5879 }
0x11f3   : > { %v5897_v41 = vunpack.i.h.bf16 %v5895_v37  ;;  %v5896_v42 = vunpack.i.l.bf16 %v5895_v37  ;;  %v5882_v46 = vunpack.i.h.bf16 %v5880_v40  ;;  %v5881_v47 = vunpack.i.l.bf16 %v5880_v40 }
0x11f5   : > { %v6743_v50 = vpack.c.bf16 %v5882_v46, %v5881_v47  ;;  %v6745_v52 = vpack.c.bf16 %v5897_v41, %v5896_v42 }
0x11f6   : > { %v5905_v53 = vpop.permute.xlu1 %5904  ;;  %v5900_v51 = vpop.permute.xlu0 %5899 }
0x11f7   : > { %v5907_v58 = vunpack.i.h.bf16 %v5905_v53  ;;  %v5906_v59 = vunpack.i.l.bf16 %v5905_v53  ;;  %3125 = vrot.lane.b32.xlu0 %v6743_v50, %s6157_s28  ;;  %3209 = vrot.lane.b32.xlu1 %v6745_v52, %s6157_s28  ;;  %v5902_v1 = vunpack.i.h.bf16 %v5900_v51  ;;  %v5901_v2 = vunpack.i.l.bf16 %v5900_v51 }
0x11f9   : > { %v6753_v62 = vpack.c.bf16 %v5907_v58, %v5906_v59  ;;  %v6768_v9 = vpack.c.bf16 %v5902_v1, %v5901_v2  ;;  %v6878_v59 = vld [vmem:[%s7485_s0 + $0x8] sm:$0xff] }
0x11fa   : > { %v5915_v56 = vpop.permute.xlu1 %5914  ;;  %v5910_v0 = vpop.permute.xlu0 %5909 }
0x11fb   : > { %v5917_v31 = vunpack.i.h.bf16 %v5915_v56  ;;  %v5916_v54 = vunpack.i.l.bf16 %v5915_v56  ;;  %3123 = vrot.lane.b32.xlu0 %v6751_v55, %s6157_s28  ;;  %3207 = vrot.lane.b32.xlu1 %v6753_v62, %s6157_s28  ;;  %v5912_v6 = vunpack.i.h.bf16 %v5910_v0  ;;  %v5911_v7 = vunpack.i.l.bf16 %v5910_v0 }
0x11fd   : > { %v6759_v3 = vpack.c.bf16 %v5917_v31, %v5916_v54  ;;  %v6775_v13 = vpack.c.bf16 %v5912_v6, %v5911_v7  ;;  %v6886_v54 = vld [vmem:[%s7485_s0 + $0x10] sm:$0xff] }
0x11fe   : > { %v3041_v63 = vpop.permute.xlu1 %3040  ;;  %v5920_v10 = vpop.permute.xlu0 %5919 }
0x11ff   : > { %3121 = vrot.lane.b32.xlu0 %v6761_v57, %s6157_s28  ;;  %3205 = vrot.lane.b32.xlu1 %v6759_v3, %s6157_s28  ;;  %v3059_v5 = vsel %vm3042_vm13, %v3041_v63, 0  ;;  %v5922_v11 = vunpack.i.h.bf16 %v5920_v10  ;;  %v5921_v12 = vunpack.i.l.bf16 %v5920_v10 }
0x1200   : > { %5451 = vmatpush3.bf16.xpose.msra.mxu1 %v3059_v5  ;;  %v6894_v5 = vld [vmem:[%s7485_s0 + $0x18] sm:$0xff] }
0x1201   : > { %5452 = vmatprep.subr.bf16.mxu1 %v6152_v17  ;;  %v6782_v15 = vpack.c.bf16 %v5922_v11, %v5921_v12  ;;  %v6902_v12 = vld [vmem:[%s7485_s0 + $0x20] sm:$0xff] }
0x1202   : > { %v3039_v8 = vpop.permute.xlu1 %3038 }
0x1203   : > { %3293 = vrot.lane.b32.xlu0 %v6768_v9, %s6157_s28  ;;  %3699 = vrot.lane.b32.xlu1 %v6731_v28, %s6158_s2  ;;  %v3056_v14 = vsel %vm3042_vm13, %v3039_v8, 0 }
0x1206   : > { %v3037_v16 = vpop.permute.xlu1 %3036 }
0x1207   : > { %3291 = vrot.lane.b32.xlu0 %v6775_v13, %s6157_s28  ;;  %3697 = vrot.lane.b32.xlu1 %v6735_v32, %s6158_s2  ;;  %v3053_v18 = vsel %vm3042_vm13, %v3037_v16, 0 }
0x1208   : > { %5453 = vmatpush3.bf16.xpose.msra.mxu1 %v3056_v14 }
0x1209   : > { %5454 = vmatprep.subr.bf16.mxu1 %v6152_v17 }
0x120b   : > { %3289 = vrot.lane.b32.xlu0 %v6782_v15, %s6157_s28  ;;  %3695 = vrot.lane.b32.xlu1 %v6739_v33, %s6158_s2  ;;  %s7489_s28 = sld [smem:[#allocation18_spill]] }
0x120f   : > { %3772 = vrot.lane.b32.xlu0 %v6751_v55, %s6158_s2  ;;  %3849 = vrot.lane.b32.xlu1 %v6745_v52, %s6158_s2 }
0x1210   : > { %5455 = vmatpush3.bf16.xpose.msra.mxu1 %v3053_v18 }
0x1211   : > { %5486 = vmatprep.subr.bf16.mxu1 %v6152_v17 }
0x1213   : > { %3770 = vrot.lane.b32.xlu0 %v6761_v57, %s6158_s2 }
0x1217   : > { %3774 = vrot.lane.b32.xlu0 %v6743_v50, %s6158_s2  ;;  %5457 = vmatmul.mubr.msk.bf16.vlgmr.msra.gmra.mxu1 %vm3042_vm13, %v6739_v33 }
0x1218   : > { %5460 = vmatprep.mubr.msk.bf16.mxu1 %vm6153_vm12, %v6152_v17 }
0x121f   : > { %5461 = vmatmul.mubr.msk.bf16.gmra.mxu1 %vm3042_vm13, %v6735_v32 }
0x1220   : > { %5464 = vmatprep.mubr.msk.bf16.mxu1 %vm6153_vm12, %v6152_v17 }
0x1227   : > { %5465 = vmatmul.mubr.msk.bf16.gmra.mxu1 %vm3042_vm13, %v6731_v28 }
0x1228   : > { %5492 = vmatprep.mubr.msk.bf16.mxu1 %vm6153_vm12, %v6152_v17 }
0x1269   : > { %v3126_v19 = vpop.permute.xlu0 %3125  ;;  %v3210_v20 = vpop.permute.xlu1 %3209 }
0x126a   : > { %v3143_v21 = vsel %vm3042_vm13, %v3126_v19, 0  ;;  %v3227_v22 = vsel %vm3042_vm13, %v3210_v20, 0 }
0x126b   : > { %5469 = vmatpush3.bf16.xpose.msra.mxu0 %v3143_v21  ;;  %5487 = vmatpush3.bf16.xpose.msra.mxu1 %v3227_v22  ;;  %v6910_v21 = vld [vmem:[%s7485_s0 + $0x28] sm:$0xff] }
0x126c   : > { %5470 = vmatprep.subr.bf16.mxu0 %v6152_v17  ;;  %5488 = vmatprep.subr.bf16.mxu1 %v6152_v17 }
0x126d   : > { %v3124_v23 = vpop.permute.xlu0 %3123  ;;  %v3208_v38 = vpop.permute.xlu1 %3207 }
0x126e   : > { %v3140_v43 = vsel %vm3042_vm13, %v3124_v23, 0  ;;  %v3224_v4 = vsel %vm3042_vm13, %v3208_v38, 0 }
0x1271   : > { %v3122_v39 = vpop.permute.xlu0 %3121  ;;  %v3206_v24 = vpop.permute.xlu1 %3205 }
0x1272   : > { %v3137_v26 = vsel %vm3042_vm13, %v3122_v39, 0  ;;  %v3221_v27 = vsel %vm3042_vm13, %v3206_v24, 0 }
0x1273   : > { %5471 = vmatpush3.bf16.xpose.msra.mxu0 %v3140_v43  ;;  %5489 = vmatpush3.bf16.xpose.msra.mxu1 %v3224_v4 }
0x1274   : > { %5472 = vmatprep.subr.bf16.mxu0 %v6152_v17  ;;  %5490 = vmatprep.subr.bf16.mxu1 %v6152_v17 }
0x1275   : > { %v3294_v28 = vpop.permute.xlu0 %3293  ;;  %v3700_v32 = vpop.permute.xlu1 %3699 }
0x1276   : > { %v3311_v33 = vsel %vm3042_vm13, %v3294_v28, 0 }
0x1279   : > { %v3292_v34 = vpop.permute.xlu0 %3291  ;;  %v3698_v35 = vpop.permute.xlu1 %3697 }
0x127a   : > { %v3308_v40 = vsel %vm3042_vm13, %v3292_v34, 0 }
0x127b   : > { %5473 = vmatpush3.bf16.xpose.msra.mxu0 %v3137_v26  ;;  %5491 = vmatpush3.bf16.xpose.msra.mxu1 %v3221_v27 }
0x127c   : > { %5504 = vmatprep.subr.bf16.mxu0 %v6152_v17  ;;  %5522 = vmatprep.subr.bf16.mxu1 %v6152_v17 }
0x127d   : > { %v3290_v37 = vpop.permute.xlu0 %3289  ;;  %v3696_v41 = vpop.permute.xlu1 %3695 }
0x127e   : > { %v3305_v46 = vsel %vm3042_vm13, %v3290_v37, 0 }
0x1281   : > { %v3773_v42 = vpop.permute.xlu0 %3772 }
0x1282   : > { %5475 = vmatmul.mubr.msk.bf16.vlgmr.msra.gmra.mxu0 %vm3042_vm13, %v6761_v57  ;;  %5493 = vmatmul.mubr.msk.bf16.vlgmr.msra.gmra.mxu1 %vm3042_vm13, %v6759_v3 }
0x1283   : > { %5505 = vmatpush3.bf16.xpose.msra.mxu0 %v3311_v33  ;;  %5523 = vmatpush3.bf16.msra.mxu1 %v3700_v32 }
0x1284   : > { %5524 = vmatprep.subr.bf16.mxu1 %v6152_v17  ;;  %5478 = vmatprep.mubr.msk.bf16.mxu0 %vm6153_vm12, %v6152_v17 }
0x1285   : > { %5496 = vmatprep.mubr.msk.bf16.mxu1 %vm6153_vm12, %v6152_v17  ;;  %5506 = vmatprep.subr.bf16.mxu0 %v6152_v17  ;;  %v3771_v47 = vpop.permute.xlu0 %3770 }
0x1287   : > { %5525 = vmatpush3.bf16.msra.mxu1 %v3698_v35 }
0x1288   : > { %5526 = vmatprep.subr.bf16.mxu1 %v6152_v17 }
0x1289   : > { %v3775_v48 = vpop.permute.xlu0 %3774 }
0x128a   : > { %5479 = vmatmul.mubr.msk.bf16.gmra.mxu0 %vm3042_vm13, %v6751_v55  ;;  %5497 = vmatmul.mubr.msk.bf16.gmra.mxu1 %vm3042_vm13, %v6753_v62 }
0x128b   : > { %5507 = vmatpush3.bf16.xpose.msra.mxu0 %v3308_v40  ;;  %5527 = vmatpush3.bf16.msra.mxu1 %v3696_v41 }
0x128c   : > { %5482 = vmatprep.mubr.msk.bf16.mxu0 %vm6153_vm12, %v6152_v17  ;;  %5500 = vmatprep.mubr.msk.bf16.mxu1 %vm6153_vm12, %v6152_v17 }
0x128d   : > { %5508 = vmatprep.subr.bf16.mxu0 %v6152_v17  ;;  %5558 = vmatprep.subr.bf16.mxu1 %v6152_v17 }
0x1292   : > { %5483 = vmatmul.mubr.msk.bf16.gmra.mxu0 %vm3042_vm13, %v6743_v50  ;;  %5501 = vmatmul.mubr.msk.bf16.gmra.mxu1 %vm3042_vm13, %v6745_v52  ;;  %v6872_v50 = vld [vmem:[%s7485_s0] sm:$0xff] }
0x1293   : > { %5509 = vmatpush3.bf16.xpose.msra.mxu0 %v3305_v46  ;;  %5510 = vmatprep.mubr.msk.bf16.mxu0 %vm6153_vm12, %v6152_v17 }
0x1294   : > { %5540 = vmatprep.subr.bf16.mxu0 %v6152_v17  ;;  %5528 = vmatprep.mubr.msk.bf16.mxu1 %vm6153_vm12, %v6152_v17 }
0x129a   : > { %5511 = vmatmul.mubr.msk.bf16.vlgmr.msra.gmra.mxu0 %vm3042_vm13, %v6782_v15 }
0x129b   : > { %5541 = vmatpush3.bf16.msra.mxu0 %v3775_v48  ;;  %5514 = vmatprep.mubr.msk.bf16.mxu0 %vm6153_vm12, %v6152_v17 }
0x129c   : > { %5542 = vmatprep.subr.bf16.mxu0 %v6152_v17 }
0x129f   : > { %5543 = vmatpush3.bf16.msra.mxu0 %v3773_v42 }
0x12a0   : > { %5544 = vmatprep.subr.bf16.mxu0 %v6152_v17 }
0x12a2   : > { %5515 = vmatmul.mubr.msk.bf16.gmra.mxu0 %vm3042_vm13, %v6775_v13 }
0x12a3   : > { %5545 = vmatpush3.bf16.msra.mxu0 %v3771_v47  ;;  %5518 = vmatprep.mubr.msk.bf16.mxu0 %vm6153_vm12, %v6152_v17 }
0x12a4   : > { %5576 = vmatprep.subr.bf16.mxu0 %v6152_v17 }
0x12aa   : > { %5519 = vmatmul.mubr.msk.bf16.gmra.mxu0 %vm3042_vm13, %v6768_v9 }
0x12ab   : > { %5546 = vmatprep.mubr.msk.bf16.mxu0 %vm6153_vm12, %v6152_v17 }
0x12d7   : > { %v3095_v49 = vpop.f32.mrf.mxu1 }
0x12d8   : > { %v3370_v52 = vmul.f32 0.35355338, %v3095_v49 }
0x12d9   : > { %v5458_v53 = vpop.f32.mrf.mxu1 }
0x12da   : > { %v6875_v51 = vadd.f32 %v3370_v52, %v6872_v50 }
0x12db   : > { %v3098_v58 = vpop.f32.mrf.mxu1 }
0x12dc   : > { %v3371_v60 = vmul.f32 0.35355338, %v3098_v58  ;;  %v3419_v61 = vsel %vm3418_vm14, %v6875_v51, -inf }
0x12dd   : > { %3420 = vmax.xlane.f32.xlu1 %v3419_v61  ;;  %v5459_v55 = vpop.f32.mrf.mxu1 }
0x12de   : > { %v6883_v56 = vadd.f32 %v3371_v60, %v6878_v59 }
0x12df   : > { %v3103_v31 = vpop.f32.mrf.mxu1 }
0x12e0   : > { %v3372_v0 = vmul.f32 0.35355338, %v3103_v31  ;;  %v3422_v1 = vsel %vm3418_vm14, %v6883_v56, -inf }
0x12e1   : > { %3423 = vmax.xlane.f32.xlu0 %v3422_v1  ;;  %v5462_v2 = vpop.f32.mrf.mxu1 }
0x12e2   : > { %v6891_v57 = vadd.f32 %v3372_v0, %v6886_v54 }
0x12e3   : > { %v3106_v63 = vpop.f32.mrf.mxu1 }
0x12e4   : > { %v3373_v6 = vmul.f32 0.35355338, %v3106_v63  ;;  %v3425_v7 = vsel %vm3418_vm14, %v6891_v57, -inf }
0x12e5   : > { %3426 = vmax.xlane.f32.xlu1 %v3425_v7  ;;  %v5463_v10 = vpop.f32.mrf.mxu1 }
0x12e6   : > { %v6899_v8 = vadd.f32 %v3373_v6, %v6894_v5 }
0x12e7   : > { %v3111_v11 = vpop.f32.mrf.mxu1 }
0x12e8   : > { %v3374_v14 = vmul.f32 0.35355338, %v3111_v11  ;;  %v3428_v16 = vsel %vm3418_vm14, %v6899_v8, -inf }
0x12e9   : > { %3429 = vmax.xlane.f32.xlu0 %v3428_v16  ;;  %v5466_v18 = vpop.f32.mrf.mxu1 }
0x12ea   : > { %v6907_v19 = vadd.f32 %v3374_v14, %v6902_v12 }
0x12eb   : > { %v3114_v20 = vpop.f32.mrf.mxu1 }
0x12ec   : > { %v3375_v22 = vmul.f32 0.35355338, %v3114_v20  ;;  %v3431_v23 = vsel %vm3418_vm14, %v6907_v19, -inf }
0x12ed   : > { %3432 = vmax.xlane.f32.xlu1 %v3431_v23  ;;  %v5467_v38 = vpop.f32.mrf.mxu1 }
0x12ee   : > { %v6915_v43 = vadd.f32 %v3375_v22, %v6910_v21 }
0x12f0   : > { %v3434_v4 = vsel %vm3418_vm14, %v6915_v43, -inf }
0x12f1   : > { %3435 = vmax.xlane.f32.xlu0 %v3434_v4 }
0x1342   : > { %v3179_v39 = vpop.f32.mrf.mxu0  ;;  %v3263_v24 = vpop.f32.mrf.mxu1 }
0x1343   : > { %v3376_v26 = vmul.f32 0.35355338, %v3179_v39  ;;  %v3382_v27 = vmul.f32 0.35355338, %v3263_v24 }
0x1344   : > { %v5476_v28 = vpop.f32.mrf.mxu0  ;;  %v5494_v32 = vpop.f32.mrf.mxu1 }
0x1345   : > { %v6920_v33 = vadd.f32 %v3382_v27, %v6872_v50  ;;  %v6923_v34 = vadd.f32 %v3376_v26, %v6872_v50 }
0x1346   : > { %v3182_v35 = vpop.f32.mrf.mxu0  ;;  %v3266_v37 = vpop.f32.mrf.mxu1 }
0x1347   : > { %v3377_v40 = vmul.f32 0.35355338, %v3182_v35  ;;  %v3383_v41 = vmul.f32 0.35355338, %v3266_v37  ;;  %v3455_v42 = vsel %vm3418_vm14, %v6920_v33, -inf  ;;  %v3437_v46 = vsel %vm3418_vm14, %v6923_v34, -inf }
0x1348   : > { %3456 = vmax.xlane.f32.xlu1 %v3455_v42  ;;  %v5495_v47 = vpop.f32.mrf.mxu1  ;;  %3438 = vmax.xlane.f32.xlu0 %v3437_v46  ;;  %v5477_v48 = vpop.f32.mrf.mxu0 }
0x1349   : > { %v6930_v49 = vadd.f32 %v3377_v40, %v6878_v59  ;;  %v6933_v58 = vadd.f32 %v3383_v41, %v6878_v59 }
0x134a   : > { %v3187_v52 = vpop.f32.mrf.mxu0  ;;  %v3271_v53 = vpop.f32.mrf.mxu1 }
0x134b   : > { %v3378_v60 = vmul.f32 0.35355338, %v3187_v52  ;;  %v3384_v61 = vmul.f32 0.35355338, %v3271_v53  ;;  %v3440_v55 = vsel %vm3418_vm14, %v6930_v49, -inf  ;;  %v3458_v6 = vsel %vm3418_vm14, %v6933_v58, -inf }
0x134c   : > { %v5498_v31 = vpop.f32.mrf.mxu1  ;;  %3441 = vmax.xlane.f32.xlu0 %v3440_v55  ;;  %v5480_v0 = vpop.f32.mrf.mxu0 }
0x134d   : > { %v6938_v1 = vadd.f32 %v3378_v60, %v6886_v54  ;;  %v6945_v14 = vadd.f32 %v3384_v61, %v6886_v54 }
0x134e   : > { %v3190_v2 = vpop.f32.mrf.mxu0  ;;  %v3274_v63 = vpop.f32.mrf.mxu1 }
0x134f   : > { %v3379_v7 = vmul.f32 0.35355338, %v3190_v2  ;;  %v3385_v10 = vmul.f32 0.35355338, %v3274_v63  ;;  %v3443_v11 = vsel %vm3418_vm14, %v6938_v1, -inf  ;;  %v3461_v24 = vsel %vm3418_vm14, %v6945_v14, -inf }
0x1350   : > { %v5499_v16 = vpop.f32.mrf.mxu1  ;;  %3459 = vmax.xlane.f32.xlu0 %v3458_v6  ;;  %3444 = vmax.xlane.f32.xlu1 %v3443_v11  ;;  %v5481_v18 = vpop.f32.mrf.mxu0 }
0x1351   : > { %v6948_v20 = vadd.f32 %v3379_v7, %v6894_v5  ;;  %v6951_v38 = vadd.f32 %v3385_v10, %v6894_v5 }
0x1352   : > { %v3195_v22 = vpop.f32.mrf.mxu0  ;;  %v3279_v23 = vpop.f32.mrf.mxu1 }
0x1353   : > { %v3380_v4 = vmul.f32 0.35355338, %v3195_v22  ;;  %v3386_v39 = vmul.f32 0.35355338, %v3279_v23  ;;  %v3446_v26 = vsel %vm3418_vm14, %v6948_v20, -inf  ;;  %v3464_v40 = vsel %vm3418_vm14, %v6951_v38, -inf  ;;  %v6987_v22 = vpop.permute.xlu1 %3849 }
0x1354   : > { %v5502_v27 = vpop.f32.mrf.mxu1  ;;  %3462 = vmax.xlane.f32.xlu1 %v3461_v24  ;;  %3447 = vmax.xlane.f32.xlu0 %v3446_v26  ;;  %v5484_v28 = vpop.f32.mrf.mxu0 }
0x1355   : > { %v6958_v32 = vadd.f32 %v3380_v4, %v6902_v12  ;;  %v6965_v47 = vadd.f32 %v3386_v39, %v6902_v12 }
0x1356   : > { %v3198_v35 = vpop.f32.mrf.mxu0  ;;  %v3282_v37 = vpop.f32.mrf.mxu1 }
0x1357   : > { %v3381_v41 = vmul.f32 0.35355338, %v3198_v35  ;;  %v3387_v42 = vmul.f32 0.35355338, %v3282_v37  ;;  %v3449_v46 = vsel %vm3418_vm14, %v6958_v32, -inf  ;;  %v3467_v55 = vsel %vm3418_vm14, %v6965_v47, -inf }
0x1358   : > { %v5503_v48 = vpop.f32.mrf.mxu1  ;;  %3465 = vmax.xlane.f32.xlu0 %v3464_v40  ;;  %3450 = vmax.xlane.f32.xlu1 %v3449_v46  ;;  %v5485_v52 = vpop.f32.mrf.mxu0 }
0x1359   : > { %v6968_v53 = vadd.f32 %v3381_v41, %v6910_v21  ;;  %v6975_v0 = vadd.f32 %v3387_v42, %v6910_v21 }
0x135a   : > { %v3347_v60 = vpop.f32.mrf.mxu0 }
0x135b   : > { %v3388_v61 = vmul.f32 0.35355338, %v3347_v60  ;;  %v3452_v31 = vsel %vm3418_vm14, %v6968_v53, -inf  ;;  %v3470_v10 = vsel %vm3418_vm14, %v6975_v0, -inf }
0x135c   : > { %3468 = vmax.xlane.f32.xlu1 %v3467_v55  ;;  %3453 = vmax.xlane.f32.xlu0 %v3452_v31  ;;  %v5512_v2 = vpop.f32.mrf.mxu0 }
0x135d   : > { %v6978_v63 = vadd.f32 %v3388_v61, %v6872_v50 }
0x135e   : > { %v3350_v6 = vpop.f32.mrf.mxu0 }
0x135f   : > { %v3389_v7 = vmul.f32 0.35355338, %v3350_v6  ;;  %v3473_v11 = vsel %vm3418_vm14, %v6978_v63, -inf }
0x1360   : > { %3471 = vmax.xlane.f32.xlu0 %v3470_v10  ;;  %3474 = vmax.xlane.f32.xlu1 %v3473_v11  ;;  %v5513_v16 = vpop.f32.mrf.mxu0 }
0x1361   : > { %v6985_v18 = vadd.f32 %v3389_v7, %v6878_v59 }
0x1362   : > { %v3355_v23 = vpop.f32.mrf.mxu0 }
0x1363   : > { %v3390_v4 = vmul.f32 0.35355338, %v3355_v23  ;;  %v3476_v50 = vsel %vm3418_vm14, %v6985_v18, -inf }
0x1364   : > { %3477 = vmax.xlane.f32.xlu0 %v3476_v50  ;;  %v5516_v39 = vpop.f32.mrf.mxu0 }
0x1365   : > { %v6992_v24 = vadd.f32 %v3390_v4, %v6886_v54 }
0x1366   : > { %v3421_v26 = vpop.xlane.xlu1 %3420  ;;  %v3358_v27 = vpop.f32.mrf.mxu0 }
0x1367   : > { %v3491_v28 = vsub.f32 %v6875_v51, %v3421_v26  ;;  %v3391_v35 = vmul.f32 0.35355338, %v3358_v27  ;;  %v3479_v59 = vsel %vm3418_vm14, %v6992_v24, -inf }
0x1368   : > { %3480 = vmax.xlane.f32.xlu1 %v3479_v59  ;;  %v5517_v37 = vpop.f32.mrf.mxu0 }
0x1369   : > { %v3515_v40 = vmul.f32 1.442695, %v3491_v28  ;;  %v6998_v41 = vadd.f32 %v3391_v35, %v6894_v5 }
0x136a   : > { %v3363_v42 = vpop.f32.mrf.mxu0  ;;  %v3424_v6 = vpop.xlane.xlu0 %3423 }
0x136b   : > { %5949 = vpow2.f32 %v3515_v40  ;;  %v3392_v46 = vmul.f32 0.35355338, %v3363_v42  ;;  %v3482_v54 = vsel %vm3418_vm14, %v6998_v41, -inf }
0x136c   : > { %3483 = vmax.xlane.f32.xlu0 %v3482_v54  ;;  %v5520_v48 = vpop.f32.mrf.mxu0 }
0x136d   : > { %v7003_v51 = vadd.f32 %v3392_v46, %v6902_v12 }
0x136e   : > { %v3366_v52 = vpop.f32.mrf.mxu0  ;;  %v3427_v23 = vpop.xlane.xlu1 %3426 }
0x136f   : > { %v3393_v60 = vmul.f32 0.35355338, %v3366_v52  ;;  %v3485_v61 = vsel %vm3418_vm14, %v7003_v51, -inf }
0x1370   : > { %3486 = vmax.xlane.f32.xlu1 %v3485_v61  ;;  %v5521_v55 = vpop.f32.mrf.mxu0 }
0x1371   : > { %v7008_v5 = vadd.f32 %v3393_v60, %v6910_v21  ;;  %v3492_v21 = vsub.f32 %v6883_v56, %v3424_v6 }
0x1372   : > { %v3430_v7 = vpop.xlane.xlu0 %3429 }
0x1373   : > { %v3488_v31 = vsel %vm3418_vm14, %v7008_v5, -inf  ;;  %v3517_v10 = vmul.f32 1.442695, %v3492_v21  ;;  %v3494_v11 = vsub.f32 %v6899_v8, %v3430_v7 }
0x1374   : > { %3489 = vmax.xlane.f32.xlu0 %v3488_v31 }
0x1375   : > { %5951 = vpow2.f32 %v3517_v10  ;;  %v3521_v4 = vmul.f32 1.442695, %v3494_v11 }
0x1376   : > { %v3433_v39 = vpop.xlane.xlu1 %3432 }
0x1377   : > { %5953 = vpow2.f32 %v3521_v4 }
0x1378   : > { %v7012_v2 = vpop.eup %5949 }
0x1379   : > { %v3563_v12 = vsel %vm3418_vm14, %v7012_v2, 0.0 }
0x137a   : > { %3564 = vadd.xlane.f32.xlu1 %v3563_v12  ;;  %v3436_v16 = vpop.xlane.xlu0 %3435 }
0x137b   : > { %v3496_v50 = vsub.f32 %v6915_v43, %v3436_v16 }
0x1382   : > { %v7027_v27 = vpop.eup %5951 }
0x1383   : > { %v3566_v8 = vsel %vm3418_vm14, %v7027_v27, 0.0 }
0x1384   : > { %v7031_v28 = vpop.eup %5953 }
0x138a   : > { %3924 = vrot.lane.b32.xlu0 %v6768_v9, %s6158_s2  ;;  %v3493_v9 = vsub.f32 %v6891_v57, %v3427_v23  ;;  %v3572_v57 = vsel %vm3418_vm14, %v7031_v28, 0.0 }
0x138b   : > { %3847 = vrot.lane.b32.xlu1 %v6753_v62, %s6158_s2  ;;  %v3525_v62 = vmul.f32 1.442695, %v3496_v50 }
0x138c   : > { %v3519_v26 = vmul.f32 1.442695, %v3493_v9 }
0x138d   : > { %5955 = vpow2.f32 %v3525_v62 }
0x138e   : > { %5957 = vpow2.f32 %v3519_v26 }
0x138f   : > { %3922 = vrot.lane.b32.xlu1 %v6775_v13, %s6158_s2  ;;  %v3495_v13 = vsub.f32 %v6907_v19, %v3433_v39 }
0x1391   : > { %v3523_v56 = vmul.f32 1.442695, %v3495_v13 }
0x1393   : > { %5959 = vpow2.f32 %v3523_v56 }
0x139a   : > { %v7035_v43 = vpop.eup %5955 }
0x139b   : > { %v7037_v35 = vpop.eup %5957  ;;  %v3578_v19 = vsel %vm3418_vm14, %v7035_v43, 0.0 }
0x139c   : > { %v3569_v59 = vsel %vm3418_vm14, %v7037_v35, 0.0 }
0x13a0   : > { %v7043_v37 = vpop.eup %5959 }
0x13a1   : > { %v3575_v40 = vsel %vm3418_vm14, %v7043_v37, 0.0 }
0x13a9   : > { %3567 = vadd.xlane.f32.xlu0 %v3566_v8 }
0x13ad   : > { %3573 = vadd.xlane.f32.xlu0 %v3572_v57 }
0x13b1   : > { %3579 = vadd.xlane.f32.xlu0 %v3578_v19 }
0x13b3   : > { %3570 = vadd.xlane.f32.xlu1 %v3569_v59 }
0x13b7   : > { %3576 = vadd.xlane.f32.xlu1 %v3575_v40 }
0x13d1   : > { %v3457_v42 = vpop.xlane.xlu1 %3456  ;;  %v3439_v46 = vpop.xlane.xlu0 %3438 }
0x13d2   : > { %v3503_v54 = vsub.f32 %v6920_v33, %v3457_v42  ;;  %v3497_v48 = vsub.f32 %v6923_v34, %v3439_v46 }
0x13d4   : > { %v3527_v52 = vmul.f32 1.442695, %v3497_v48  ;;  %v3539_v60 = vmul.f32 1.442695, %v3503_v54 }
0x13d5   : > { %v3442_v61 = vpop.xlane.xlu0 %3441 }
0x13d6   : > { %v3498_v55 = vsub.f32 %v6930_v49, %v3442_v61  ;;  %5961 = vpow2.f32 %v3527_v52 }
0x13d7   : > { %5963 = vpow2.f32 %v3539_v60 }
0x13d8   : > { %v3529_v31 = vmul.f32 1.442695, %v3498_v55 }
0x13d9   : > { %v3460_v12 = vpop.xlane.xlu0 %3459  ;;  %v3445_v6 = vpop.xlane.xlu1 %3444 }
0x13da   : > { %5965 = vpow2.f32 %v3529_v31  ;;  %v3504_v21 = vsub.f32 %v6933_v58, %v3460_v12  ;;  %v3499_v7 = vsub.f32 %v6938_v1, %v3445_v6 }
0x13dc   : > { %v3541_v10 = vmul.f32 1.442695, %v3504_v21  ;;  %v3531_v11 = vmul.f32 1.442695, %v3499_v7 }
0x13dd   : > { %v3463_v33 = vpop.xlane.xlu1 %3462  ;;  %v3448_v16 = vpop.xlane.xlu0 %3447 }
0x13de   : > { %5967 = vpow2.f32 %v3541_v10  ;;  %v3505_v34 = vsub.f32 %v6945_v14, %v3463_v33  ;;  %v3500_v23 = vsub.f32 %v6948_v20, %v3448_v16 }
0x13df   : > { %5969 = vpow2.f32 %v3531_v11 }
0x13e0   : > { %v3543_v49 = vmul.f32 1.442695, %v3505_v34  ;;  %v3533_v4 = vmul.f32 1.442695, %v3500_v23 }
0x13e1   : > { %v3466_v50 = vpop.xlane.xlu0 %3465  ;;  %v3451_v9 = vpop.xlane.xlu1 %3450 }
0x13e2   : > { %5971 = vpow2.f32 %v3543_v49  ;;  %v3506_v39 = vsub.f32 %v6951_v38, %v3466_v50  ;;  %v3501_v58 = vsub.f32 %v6958_v32, %v3451_v9 }
0x13e3   : > { %5973 = vpow2.f32 %v3533_v4  ;;  %v7056_v1 = vpop.eup %5961 }
0x13e4   : > { %v3545_v62 = vmul.f32 1.442695, %v3506_v39  ;;  %v3535_v26 = vmul.f32 1.442695, %v3501_v58  ;;  %v3581_v14 = vsel %vm3418_vm14, %v7056_v1, 0.0  ;;  %v7060_v20 = vpop.eup %5963 }
0x13e5   : > { %v3469_v13 = vpop.xlane.xlu1 %3468  ;;  %v3454_v56 = vpop.xlane.xlu0 %3453  ;;  %3582 = vadd.xlane.f32.xlu1 %v3581_v14  ;;  %v3599_v46 = vsel %vm3418_vm14, %v7060_v20, 0.0 }
0x13e6   : > { %5975 = vpow2.f32 %v3545_v62  ;;  %v3507_v8 = vsub.f32 %v6965_v47, %v3469_v13  ;;  %v3502_v57 = vsub.f32 %v6968_v53, %v3454_v56 }
0x13e7   : > { %v7064_v38 = vpop.eup %5965  ;;  %5977 = vpow2.f32 %v3535_v26 }
0x13e8   : > { %v3547_v32 = vmul.f32 1.442695, %v3507_v8  ;;  %v3537_v19 = vmul.f32 1.442695, %v3502_v57  ;;  %v3584_v59 = vsel %vm3418_vm14, %v7064_v38, 0.0 }
0x13e9   : > { %v3472_v40 = vpop.xlane.xlu0 %3471  ;;  %v3475_v42 = vpop.xlane.xlu1 %3474  ;;  %3585 = vadd.xlane.f32.xlu0 %v3584_v59  ;;  %3600 = vadd.xlane.f32.xlu1 %v3599_v46 }
0x13ea   : > { %5979 = vpow2.f32 %v3547_v32  ;;  %v3508_v47 = vsub.f32 %v6975_v0, %v3472_v40  ;;  %v3509_v53 = vsub.f32 %v6978_v63, %v3475_v42 }
0x13eb   : > { %v7072_v54 = vpop.eup %5967  ;;  %5981 = vpow2.f32 %v3537_v19 }
0x13ec   : > { %v7074_v48 = vpop.eup %5969  ;;  %v3549_v52 = vmul.f32 1.442695, %v3508_v47  ;;  %v3551_v60 = vmul.f32 1.442695, %v3509_v53  ;;  %v3602_v61 = vsel %vm3418_vm14, %v7072_v54, 0.0 }
0x13ed   : > { %v3478_v55 = vpop.xlane.xlu0 %3477  ;;  %v3587_v31 = vsel %vm3418_vm14, %v7074_v48, 0.0  ;;  %3603 = vadd.xlane.f32.xlu0 %v3602_v61 }
0x13ee   : > { %5983 = vpow2.f32 %v3549_v52  ;;  %v3510_v0 = vsub.f32 %v6985_v18, %v3478_v55  ;;  %3588 = vadd.xlane.f32.xlu1 %v3587_v31 }
0x13ef   : > { %v7081_v63 = vpop.eup %5971  ;;  %5985 = vpow2.f32 %v3551_v60 }
0x13f0   : > { %v7083_v12 = vpop.eup %5973  ;;  %v3553_v6 = vmul.f32 1.442695, %v3510_v0  ;;  %v3605_v21 = vsel %vm3418_vm14, %v7081_v63, 0.0 }
0x13f1   : > { %v3481_v7 = vpop.xlane.xlu1 %3480  ;;  %v3590_v10 = vsel %vm3418_vm14, %v7083_v12, 0.0 }
0x13f2   : > { %5987 = vpow2.f32 %v3553_v6  ;;  %v3511_v11 = vsub.f32 %v6992_v24, %v3481_v7  ;;  %3606 = vadd.xlane.f32.xlu1 %v3605_v21  ;;  %3591 = vadd.xlane.f32.xlu0 %v3590_v10 }
0x13f3   : > { %v7090_v18 = vpop.eup %5975 }
0x13f4   : > { %v7092_v33 = vpop.eup %5977  ;;  %v3555_v16 = vmul.f32 1.442695, %v3511_v11  ;;  %v3608_v34 = vsel %vm3418_vm14, %v7090_v18, 0.0 }
0x13f5   : > { %v3484_v23 = vpop.xlane.xlu0 %3483  ;;  %v3593_v49 = vsel %vm3418_vm14, %v7092_v33, 0.0 }
0x13f6   : > { %5989 = vpow2.f32 %v3555_v16  ;;  %v3512_v4 = vsub.f32 %v6998_v41, %v3484_v23  ;;  %3594 = vadd.xlane.f32.xlu1 %v3593_v49  ;;  %3609 = vadd.xlane.f32.xlu0 %v3608_v34 }
0x13f7   : > { %v7099_v24 = vpop.eup %5979 }
0x13f8   : > { %v7101_v50 = vpop.eup %5981  ;;  %v3557_v9 = vmul.f32 1.442695, %v3512_v4  ;;  %v3611_v39 = vsel %vm3418_vm14, %v7099_v24, 0.0 }
0x13f9   : > { %v3487_v58 = vpop.xlane.xlu1 %3486  ;;  %v3596_v62 = vsel %vm3418_vm14, %v7101_v50, 0.0 }
0x13fa   : > { %5991 = vpow2.f32 %v3557_v9  ;;  %3612 = vadd.xlane.f32.xlu1 %v3611_v39  ;;  %v3513_v26 = vsub.f32 %v7003_v51, %v3487_v58  ;;  %3597 = vadd.xlane.f32.xlu0 %v3596_v62 }
0x13fb   : > { %v7108_v41 = vpop.eup %5983 }
0x13fc   : > { %v7110_v13 = vpop.eup %5985  ;;  %v3559_v56 = vmul.f32 1.442695, %v3513_v26  ;;  %v3614_v14 = vsel %vm3418_vm14, %v7108_v41, 0.0 }
0x13fd   : > { %v3617_v8 = vsel %vm3418_vm14, %v7110_v13, 0.0  ;;  %v3490_v57 = vpop.xlane.xlu0 %3489 }
0x13fe   : > { %5993 = vpow2.f32 %v3559_v56  ;;  %3618 = vadd.xlane.f32.xlu1 %v3617_v8  ;;  %3615 = vadd.xlane.f32.xlu0 %v3614_v14  ;;  %v3514_v32 = vsub.f32 %v7008_v5, %v3490_v57 }
0x13ff   : > { %v7117_v19 = vpop.eup %5987 }
0x1400   : > { %v3561_v51 = vmul.f32 1.442695, %v3514_v32  ;;  %v3620_v59 = vsel %vm3418_vm14, %v7117_v19, 0.0 }
0x1401   : > { %v3925_v55 = vpop.permute.xlu0 %3924 }
0x1402   : > { %5995 = vpow2.f32 %v3561_v51  ;;  %3621 = vadd.xlane.f32.xlu1 %v3620_v59 }
0x1403   : > { %v7121_v40 = vpop.eup %5989  ;;  %v3565_v61 = vpop.xlane.xlu1 %3564 }
0x1404   : > { %v3623_v42 = vsel %vm3418_vm14, %v7121_v40, 0.0  ;;  %5997 = vrcp.f32 %v3565_v61 }
0x1405   : > { %3624 = vadd.xlane.f32.xlu0 %v3623_v42 }
0x1407   : > { %v7125_v46 = vpop.eup %5991  ;;  %v3848_v31 = vpop.permute.xlu1 %3847 }
0x1408   : > { %v3626_v47 = vsel %vm3418_vm14, %v7125_v46, 0.0 }
0x1409   : > { %3627 = vadd.xlane.f32.xlu0 %v3626_v47 }
0x140b   : > { %v7129_v5 = vpop.eup %5993  ;;  %v7141_v6 = vpop.permute.xlu1 %3922 }
0x140c   : > { %v3629_v53 = vsel %vm3418_vm14, %v7129_v5, 0.0 }
0x140d   : > { %3630 = vadd.xlane.f32.xlu1 %v3629_v53 }
0x140f   : > { %v7133_v52 = vpop.eup %5995 }
0x1410   : > { %v3632_v60 = vsel %vm3418_vm14, %v7133_v52, 0.0 }
0x1411   : > { %3633 = vadd.xlane.f32.xlu0 %v3632_v60  ;;  %v5998_v10 = vpop.eup %5997 }
0x141e   : > { %3845 = vrot.lane.b32.xlu1 %v6759_v3, %s6158_s2  ;;  %v3659_v3 = vmul.f32 %v5998_v10, %v7012_v2 }
0x1427   : > { %3920 = vrot.lane.b32.xlu0 %v6782_v15, %s6158_s2  ;;  %s7490_s2 = sld [smem:[#allocation19_spill]] }
0x1432   : > { %v3568_v0 = vpop.xlane.xlu0 %3567 }
0x1433   : > { %5999 = vrcp.f32 %v3568_v0 }
0x1436   : > { %v3574_v21 = vpop.xlane.xlu0 %3573 }
0x1437   : > { %6001 = vrcp.f32 %v3574_v21 }
0x143a   : > { %v3580_v16 = vpop.xlane.xlu0 %3579 }
0x143c   : > { %v3571_v7 = vpop.xlane.xlu1 %3570 }
0x143d   : > { %6003 = vrcp.f32 %v3571_v7 }
0x1440   : > { %v6000_v11 = vpop.eup %5999  ;;  %v3577_v34 = vpop.xlane.xlu1 %3576 }
0x1441   : > { %v3660_v15 = vmul.f32 %v6000_v11, %v7027_v27  ;;  %6005 = vrcp.f32 %v3577_v34 }
0x1442   : > { %6007 = vrcp.f32 %v3580_v16 }
0x1443   : > { %v3683_v23 = vpack.c.bf16 %v3660_v15, %v3659_v3 }
0x1444   : > { %v6002_v49 = vpop.eup %6001 }
0x1445   : > { %5529 = vmatmul.mubr.msk.bf16.vlgmr.msra.gmra.mxu1 %vm3418_vm14, %v3683_v23  ;;  %v3662_v2 = vmul.f32 %v6002_v49, %v7031_v28 }
0x1446   : > { %5559 = vmatpush3.bf16.msra.mxu1 %v6987_v22  ;;  %5532 = vmatprep.mubr.msk.bf16.mxu1 %vm6153_vm12, %v6152_v17 }
0x1447   : > { %5560 = vmatprep.subr.bf16.mxu1 %v6152_v17 }
0x144a   : > { %v6004_v4 = vpop.eup %6003  ;;  %5561 = vmatpush3.bf16.msra.mxu1 %v3848_v31 }
0x144b   : > { %v3661_v9 = vmul.f32 %v6004_v4, %v7037_v35  ;;  %5562 = vmatprep.subr.bf16.mxu1 %v6152_v17 }
0x144d   : > { %v3684_v27 = vpack.c.bf16 %v3662_v2, %v3661_v9 }
0x144e   : > { %v6006_v39 = vpop.eup %6005 }
0x144f   : > { %5533 = vmatmul.mubr.msk.bf16.gmra.mxu1 %vm3418_vm14, %v3684_v27  ;;  %v6008_v58 = vpop.eup %6007  ;;  %v3663_v22 = vmul.f32 %v6006_v39, %v7043_v37  ;;  %v2741_v27 = vld [vmem:[%s7486_s11] sm:$0xf] }
0x1450   : > { %5536 = vmatprep.mubr.msk.bf16.mxu1 %vm6153_vm12, %v6152_v17  ;;  %v3664_v62 = vmul.f32 %v6008_v58, %v7035_v43 }
0x1452   : > { %v3685_v26 = vpack.c.bf16 %v3664_v62, %v3663_v22  ;;  %v4018_v62 = vsel %vm4016_vm15, %v2741_v27, 0 }
0x1457   : > { %5537 = vmatmul.mubr.msk.bf16.gmra.mxu1 %vm3418_vm14, %v3685_v26 }
0x1458   : > { %5564 = vmatprep.mubr.msk.bf16.mxu1 %vm6153_vm12, %v6152_v17 }
0x146e   : > { %v3583_v28 = vpop.xlane.xlu1 %3582 }
0x146f   : > { %6009 = vrcp.f32 %v3583_v28 }
0x1472   : > { %v3586_v35 = vpop.xlane.xlu0 %3585  ;;  %v3601_v56 = vpop.xlane.xlu1 %3600 }
0x1473   : > { %6011 = vrcp.f32 %v3586_v35 }
0x1476   : > { %v3604_v14 = vpop.xlane.xlu0 %3603 }
0x1477   : > { %v3589_v8 = vpop.xlane.xlu1 %3588 }
0x1478   : > { %6013 = vrcp.f32 %v3589_v8 }
0x147b   : > { %v3607_v57 = vpop.xlane.xlu1 %3606  ;;  %v3592_v32 = vpop.xlane.xlu0 %3591 }
0x147c   : > { %6015 = vrcp.f32 %v3592_v32  ;;  %v6010_v37 = vpop.eup %6009 }
0x147d   : > { %v3665_v42 = vmul.f32 %v6010_v37, %v7056_v1 }
0x147f   : > { %v3595_v51 = vpop.xlane.xlu1 %3594  ;;  %v3610_v43 = vpop.xlane.xlu0 %3609 }
0x1480   : > { %v6012_v59 = vpop.eup %6011  ;;  %6017 = vrcp.f32 %v3595_v51 }
0x1481   : > { %v3666_v47 = vmul.f32 %v6012_v59, %v7064_v38 }
0x1483   : > { %v3686_v53 = vpack.c.bf16 %v3666_v47, %v3665_v42  ;;  %v3613_v60 = vpop.xlane.xlu1 %3612  ;;  %v3598_v61 = vpop.xlane.xlu0 %3597 }
0x1484   : > { %6019 = vrcp.f32 %v3598_v61  ;;  %v2743_v61 = vld [vmem:[%s7486_s11 + $0x8] sm:$0xf] }
0x1485   : > { %5547 = vmatmul.mubr.msk.bf16.vlgmr.msra.gmra.mxu0 %vm3418_vm14, %v3686_v53  ;;  %v6014_v0 = vpop.eup %6013  ;;  %6021 = vrcp.f32 %v3604_v14 }
0x1486   : > { %5577 = vmatpush3.bf16.msra.mxu0 %v3925_v55  ;;  %5550 = vmatprep.mubr.msk.bf16.mxu0 %vm6153_vm12, %v6152_v17  ;;  %6023 = vrcp.f32 %v3601_v56  ;;  %v3667_v7 = vmul.f32 %v6014_v0, %v7074_v48  ;;  %v4156_v0 = vsel %vm4016_vm15, %v2743_v61, 0 }
0x1487   : > { %v3619_v31 = vpop.xlane.xlu1 %3618  ;;  %5578 = vmatprep.subr.bf16.mxu0 %v6152_v17  ;;  %v3616_v1 = vpop.xlane.xlu0 %3615 }
0x1489   : > { %v6016_v21 = vpop.eup %6015 }
0x148a   : > { %5579 = vmatpush3.bf16.msra.mxu0 %v7141_v6  ;;  %v3668_v10 = vmul.f32 %v6016_v21, %v7083_v12 }
0x148b   : > { %v3622_v38 = vpop.xlane.xlu1 %3621  ;;  %5580 = vmatprep.subr.bf16.mxu0 %v6152_v17 }
0x148c   : > { %6025 = vrcp.f32 %v3622_v38  ;;  %v3687_v55 = vpack.c.bf16 %v3668_v10, %v3667_v7 }
0x148d   : > { %6027 = vrcp.f32 %v3619_v31  ;;  %v6018_v16 = vpop.eup %6017 }
0x148e   : > { %v3625_v11 = vpop.xlane.xlu0 %3624  ;;  %5551 = vmatmul.mubr.msk.bf16.gmra.mxu0 %vm3418_vm14, %v3687_v55  ;;  %6029 = vrcp.f32 %v3610_v43  ;;  %v3669_v48 = vmul.f32 %v6018_v16, %v7092_v33 }
0x148f   : > { %5554 = vmatprep.mubr.msk.bf16.mxu0 %vm6153_vm12, %v6152_v17  ;;  %6031 = vrcp.f32 %v3607_v57 }
0x1491   : > { %v6020_v34 = vpop.eup %6019 }
0x1492   : > { %v3628_v6 = vpop.xlane.xlu0 %3627  ;;  %v3670_v12 = vmul.f32 %v6020_v34, %v7101_v50  ;;  %v6022_v3 = vpop.eup %6021 }
0x1493   : > { %6033 = vrcp.f32 %v3628_v6  ;;  %v6024_v49 = vpop.eup %6023  ;;  %v3672_v4 = vmul.f32 %v6022_v3, %v7072_v54 }
0x1494   : > { %v3688_v15 = vpack.c.bf16 %v3670_v12, %v3669_v48  ;;  %6035 = vrcp.f32 %v3625_v11  ;;  %v3671_v33 = vmul.f32 %v6024_v49, %v7060_v20 }
0x1495   : > { %6037 = vrcp.f32 %v3616_v1 }
0x1496   : > { %v3631_v23 = vpop.xlane.xlu1 %3630  ;;  %5555 = vmatmul.mubr.msk.bf16.gmra.mxu0 %vm3418_vm14, %v3688_v15  ;;  %6039 = vrcp.f32 %v3613_v60  ;;  %v3689_v58 = vpack.c.bf16 %v3672_v4, %v3671_v33  ;;  %v2744_v15 = vld [vmem:[%s7486_s11 + $0xc] sm:$0xf] }
0x1497   : > { %5582 = vmatprep.mubr.msk.bf16.mxu0 %vm6153_vm12, %v6152_v17  ;;  %v4225_v4 = vsel %vm4016_vm15, %v2744_v15, 0 }
0x1499   : > { %v6026_v9 = vpop.eup %6025 }
0x149a   : > { %v3846_v50 = vpop.permute.xlu1 %3845  ;;  %v3634_v2 = vpop.xlane.xlu0 %3633  ;;  %v3678_v22 = vmul.f32 %v6026_v9, %v7117_v19 }
0x149b   : > { %v6028_v39 = vpop.eup %6027  ;;  %5563 = vmatpush3.bf16.msra.mxu1 %v3846_v50  ;;  %6041 = vrcp.f32 %v3634_v2 }
0x149c   : > { %5594 = vmatprep.subr.bf16.mxu1 %v6152_v17  ;;  %v6030_v54 = vpop.eup %6029  ;;  %v3677_v26 = vmul.f32 %v6028_v39, %v7110_v13  ;;  %6043 = vrcp.f32 %v3631_v23 }
0x149d   : > { %v6032_v28 = vpop.eup %6031  ;;  %v3674_v19 = vmul.f32 %v6030_v54, %v7090_v18 }
0x149e   : > { %5565 = vmatmul.mubr.msk.bf16.vlgmr.msra.gmra.mxu1 %vm3418_vm14, %v3689_v58  ;;  %v3921_v20 = vpop.permute.xlu0 %3920  ;;  %v3692_v35 = vpack.c.bf16 %v3678_v22, %v3677_v26  ;;  %v3673_v13 = vmul.f32 %v6032_v28, %v7081_v63 }
0x149f   : > { %5581 = vmatpush3.bf16.msra.mxu0 %v3921_v20  ;;  %5568 = vmatprep.mubr.msk.bf16.mxu1 %vm6153_vm12, %v6152_v17 }
0x14a0   : > { %5595 = vmatpush3.bf16.msra.mxu1 %v4018_v62  ;;  %5608 = vmatprep.subr.bf16.mxu0 %v6152_v17  ;;  %v6034_v56 = vpop.eup %6033  ;;  %v3690_v8 = vpack.c.bf16 %v3674_v19, %v3673_v13 }
0x14a1   : > { %5622 = vmatprep.subr.bf16.mxu1 %v6152_v17  ;;  %v6036_v14 = vpop.eup %6035  ;;  %v3680_v57 = vmul.f32 %v6034_v56, %v7125_v46 }
0x14a2   : > { %5583 = vmatmul.mubr.msk.bf16.vlgmr.msra.gmra.mxu0 %vm3418_vm14, %v3692_v35  ;;  %v6038_v32 = vpop.eup %6037  ;;  %v3679_v18 = vmul.f32 %v6036_v14, %v7121_v40 }
0x14a3   : > { %5586 = vmatprep.mubr.msk.bf16.mxu0 %vm6153_vm12, %v6152_v17  ;;  %v6040_v37 = vpop.eup %6039  ;;  %v3676_v63 = vmul.f32 %v6038_v32, %v7108_v41 }
0x14a4   : > { %v3693_v51 = vpack.c.bf16 %v3680_v57, %v3679_v18  ;;  %v3675_v59 = vmul.f32 %v6040_v37, %v7099_v24  ;;  %v2742_v24 = vld [vmem:[%s7486_s11 + $0x4] sm:$0xf] }
0x14a5   : > { %v4087_v53 = vsel %vm4016_vm15, %v2742_v24, 0 }
0x14a6   : > { %5569 = vmatmul.mubr.msk.bf16.gmra.mxu1 %vm3418_vm14, %v3690_v8  ;;  %v3691_v46 = vpack.c.bf16 %v3676_v63, %v3675_v59  ;;  %5609 = vmatpush3.bf16.msra.mxu0 %v4087_v53 }
0x14a7   : > { %5572 = vmatprep.mubr.msk.bf16.mxu1 %vm6153_vm12, %v6152_v17  ;;  %5636 = vmatprep.subr.bf16.mxu0 %v6152_v17 }
0x14a8   : > { %v6042_v43 = vpop.eup %6041 }
0x14a9   : > { %v6044_v42 = vpop.eup %6043  ;;  %v3682_v40 = vmul.f32 %v6042_v43, %v7133_v52 }
0x14aa   : > { %5587 = vmatmul.mubr.msk.bf16.gmra.mxu0 %vm3418_vm14, %v3693_v51  ;;  %v3681_v47 = vmul.f32 %v6044_v42, %v7129_v5 }
0x14ab   : > { %5590 = vmatprep.mubr.msk.bf16.mxu0 %vm6153_vm12, %v6152_v17 }
0x14ac   : > { %v3694_v41 = vpack.c.bf16 %v3682_v40, %v3681_v47 }
0x14ae   : > { %5573 = vmatmul.mubr.msk.bf16.gmra.mxu1 %vm3418_vm14, %v3691_v46 }
0x14af   : > { %5596 = vmatprep.mubr.msk.bf16.mxu1 %vm6153_vm12, %v6152_v17 }
0x14b2   : > { %5591 = vmatmul.mubr.msk.bf16.gmra.mxu0 %vm3418_vm14, %v3694_v41 }
0x14b3   : > { %5610 = vmatprep.mubr.msk.bf16.mxu0 %vm6153_vm12, %v6152_v17 }
0x1505   : > { %v3747_v52 = vpop.f32.mrf.mxu1 }
0x1507   : > { %v5530_v60 = vpop.f32.mrf.mxu1 }
0x1509   : > { %v3750_v31 = vpop.f32.mrf.mxu1 }
0x150a   : > { %v3995_v5 = vpack.c.bf16 %v3750_v31, %v3747_v52 }
0x150b   : > { %v5531_v21 = vpop.f32.mrf.mxu1 }
0x150c   : > { %5597 = vmatmul.mubr.msk.bf16.vlgmr.msra.gmra.mxu1 %vm3042_vm13, %v3995_v5 }
0x150d   : > { %5600 = vmatprep.mubr.msk.bf16.mxu1 %vm6153_vm12, %v6152_v17  ;;  %5623 = vmatpush3.bf16.msra.mxu1 %v4156_v0 }
0x150e   : > { %5650 = vmatprep.subr.bf16.mxu1 %v6152_v17 }
0x150f   : > { %v3755_v1 = vpop.f32.mrf.mxu1 }
0x1511   : > { %v5534_v38 = vpop.f32.mrf.mxu1 }
0x1513   : > { %v3758_v7 = vpop.f32.mrf.mxu1 }
0x1514   : > { %v3996_v10 = vpack.c.bf16 %v3758_v7, %v3755_v1 }
0x1515   : > { %v5535_v55 = vpop.f32.mrf.mxu1 }
0x1516   : > { %5601 = vmatmul.mubr.msk.bf16.gmra.mxu1 %vm3042_vm13, %v3996_v10 }
0x1517   : > { %v3763_v11 = vpop.f32.mrf.mxu1  ;;  %5604 = vmatprep.mubr.msk.bf16.mxu1 %vm6153_vm12, %v6152_v17 }
0x1519   : > { %v5538_v16 = vpop.f32.mrf.mxu1 }
0x151b   : > { %v3766_v34 = vpop.f32.mrf.mxu1 }
0x151c   : > { %v3997_v6 = vpack.c.bf16 %v3766_v34, %v3763_v11 }
0x151d   : > { %v5539_v48 = vpop.f32.mrf.mxu1 }
0x151e   : > { %5605 = vmatmul.mubr.msk.bf16.gmra.mxu1 %vm3042_vm13, %v3997_v6 }
0x151f   : > { %5624 = vmatprep.mubr.msk.bf16.mxu1 %vm6153_vm12, %v6152_v17 }
0x1545   : > { %v3822_v12 = vpop.f32.mrf.mxu0 }
0x1547   : > { %v5548_v3 = vpop.f32.mrf.mxu0 }
0x1549   : > { %v3825_v23 = vpop.f32.mrf.mxu0 }
0x154a   : > { %v3998_v49 = vpack.c.bf16 %v3825_v23, %v3822_v12 }
0x154b   : > { %v5549_v9 = vpop.f32.mrf.mxu0 }
0x154c   : > { %5611 = vmatmul.mubr.msk.bf16.vlgmr.msra.gmra.mxu0 %vm3042_vm13, %v3998_v49 }
0x154d   : > { %5614 = vmatprep.mubr.msk.bf16.mxu0 %vm6153_vm12, %v6152_v17  ;;  %5637 = vmatpush3.bf16.msra.mxu0 %v4225_v4 }
0x154e   : > { %5666 = vmatprep.subr.bf16.mxu0 %v6152_v17  ;;  %v3830_v33 = vpop.f32.mrf.mxu0 }
0x1550   : > { %v5552_v50 = vpop.f32.mrf.mxu0 }
0x1552   : > { %v3833_v2 = vpop.f32.mrf.mxu0 }
0x1553   : > { %v3999_v27 = vpack.c.bf16 %v3833_v2, %v3830_v33 }
0x1554   : > { %v5553_v39 = vpop.f32.mrf.mxu0 }
0x1555   : > { %5615 = vmatmul.mubr.msk.bf16.gmra.mxu0 %vm3042_vm13, %v3999_v27 }
0x1556   : > { %v3838_v58 = vpop.f32.mrf.mxu0  ;;  %5618 = vmatprep.mubr.msk.bf16.mxu0 %vm6153_vm12, %v6152_v17 }
0x1558   : > { %v5556_v22 = vpop.f32.mrf.mxu0 }
0x155a   : > { %v3841_v54 = vpop.f32.mrf.mxu0 }
0x155b   : > { %v4000_v62 = vpack.c.bf16 %v3841_v54, %v3838_v58 }
0x155c   : > { %v5557_v26 = vpop.f32.mrf.mxu0 }
0x155d   : > { %5619 = vmatmul.mubr.msk.bf16.gmra.mxu0 %vm3042_vm13, %v4000_v62 }
0x155e   : > { %v3897_v20 = vpop.f32.mrf.mxu1  ;;  %5638 = vmatprep.mubr.msk.bf16.mxu0 %vm6153_vm12, %v6152_v17 }
0x1560   : > { %v5566_v28 = vpop.f32.mrf.mxu1 }
0x1562   : > { %v3900_v35 = vpop.f32.mrf.mxu1  ;;  %v3972_v19 = vpop.f32.mrf.mxu0 }
0x1563   : > { %v4001_v56 = vpack.c.bf16 %v3900_v35, %v3897_v20 }
0x1564   : > { %v5567_v13 = vpop.f32.mrf.mxu1  ;;  %v5584_v14 = vpop.f32.mrf.mxu0 }
0x1565   : > { %5625 = vmatmul.mubr.msk.bf16.vlgmr.msra.gmra.mxu1 %vm3042_vm13, %v4001_v56 }
0x1566   : > { %v3905_v8 = vpop.f32.mrf.mxu1  ;;  %v3975_v57 = vpop.f32.mrf.mxu0  ;;  %5628 = vmatprep.mubr.msk.bf16.mxu1 %vm6153_vm12, %v6152_v17 }
0x1567   : > { %v4004_v32 = vpack.c.bf16 %v3975_v57, %v3972_v19 }
0x1568   : > { %v5570_v18 = vpop.f32.mrf.mxu1  ;;  %v5585_v37 = vpop.f32.mrf.mxu0 }
0x1569   : > { %5639 = vmatmul.mubr.msk.bf16.vlgmr.msra.gmra.mxu0 %vm3042_vm13, %v4004_v32 }
0x156a   : > { %v3908_v51 = vpop.f32.mrf.mxu1  ;;  %v3980_v63 = vpop.f32.mrf.mxu0  ;;  %5642 = vmatprep.mubr.msk.bf16.mxu0 %vm6153_vm12, %v6152_v17 }
0x156b   : > { %v4002_v43 = vpack.c.bf16 %v3908_v51, %v3905_v8 }
0x156c   : > { %v5571_v59 = vpop.f32.mrf.mxu1  ;;  %v5588_v42 = vpop.f32.mrf.mxu0 }
0x156d   : > { %5629 = vmatmul.mubr.msk.bf16.gmra.mxu1 %vm3042_vm13, %v4002_v43  ;;  %v7274_v59 = vld [vmem:[%s7487_s18] ss:$0 sm:$0xff]  ;;  %s7491_s18 = sld [smem:[#allocation22_spill]] }
0x156e   : > { %v3913_v46 = vpop.f32.mrf.mxu1  ;;  %v3983_v40 = vpop.f32.mrf.mxu0  ;;  %5632 = vmatprep.mubr.msk.bf16.mxu1 %vm6153_vm12, %v6152_v17 }
0x156f   : > { %v4005_v47 = vpack.c.bf16 %v3983_v40, %v3980_v63 }
0x1570   : > { %v5574_v41 = vpop.f32.mrf.mxu1  ;;  %v5589_v24 = vpop.f32.mrf.mxu0 }
0x1571   : > { %5643 = vmatmul.mubr.msk.bf16.gmra.mxu0 %vm3042_vm13, %v4005_v47 }
0x1572   : > { %v3916_v53 = vpop.f32.mrf.mxu1  ;;  %v3988_v52 = vpop.f32.mrf.mxu0  ;;  %5646 = vmatprep.mubr.msk.bf16.mxu0 %vm6153_vm12, %v6152_v17 }
0x1573   : > { %v4003_v60 = vpack.c.bf16 %v3916_v53, %v3913_v46 }
0x1574   : > { %v5575_v61 = vpop.f32.mrf.mxu1  ;;  %v5592_v31 = vpop.f32.mrf.mxu0 }
0x1575   : > { %5633 = vmatmul.mubr.msk.bf16.gmra.mxu1 %vm3042_vm13, %v4003_v60 }
0x1576   : > { %v3991_v5 = vpop.f32.mrf.mxu0  ;;  %5654 = vmatprep.mubr.msk.bf16.mxu1 %vm6153_vm12, %v6152_v17 }
0x1577   : > { %v4006_v0 = vpack.c.bf16 %v3991_v5, %v3988_v52 }
0x1578   : > { %v5593_v21 = vpop.f32.mrf.mxu0 }
0x1579   : > { %5647 = vmatmul.mubr.msk.bf16.gmra.mxu0 %vm3042_vm13, %v4006_v0 }
0x157a   : > { %5682 = vmatprep.mubr.msk.bf16.mxu0 %vm6153_vm12, %v6152_v17 }
0x15cc   : > { %v4054_v1 = vpop.f32.mrf.mxu1 }
0x15cd   : > { %v4284_v26 = vsel %vm2770_vm11, %v4054_v1, 0.0 }
0x15ce   : > { %v5598_v38 = vpop.f32.mrf.mxu1 }
0x15d0   : > { %v4057_v7 = vpop.f32.mrf.mxu1 }
0x15d1   : > { %v4291_v8 = vsel %vm2770_vm11, %v4057_v7, 0.0 }
0x15d2   : > { %v5599_v10 = vpop.f32.mrf.mxu1 }
0x15d6   : > { %v4062_v55 = vpop.f32.mrf.mxu1 }
0x15d7   : > { %v4298_v41 = vsel %vm2770_vm11, %v4062_v55, 0.0 }
0x15d8   : > { %v5602_v11 = vpop.f32.mrf.mxu1 }
0x15da   : > { %v4065_v16 = vpop.f32.mrf.mxu1 }
0x15db   : > { %v4305_v10 = vsel %vm2770_vm11, %v4065_v16, 0.0 }
0x15dc   : > { %v5603_v34 = vpop.f32.mrf.mxu1 }
0x15de   : > { %v7259_v6 = vpop.f32.mrf.mxu1 }
0x15e0   : > { %v5606_v48 = vpop.f32.mrf.mxu1 }
0x15e2   : > { %v7261_v12 = vpop.f32.mrf.mxu1 }
0x15e4   : > { %v5607_v3 = vpop.f32.mrf.mxu1 }
0x160c   : > { %v4123_v15 = vpop.f32.mrf.mxu0 }
0x160d   : > { %v4285_v22 = vsel %vm2770_vm11, %v4123_v15, 0.0 }
0x160e   : > { %v5612_v23 = vpop.f32.mrf.mxu0  ;;  %v4286_v28 = vadd.f32 %v4285_v22, %v4284_v26 }
0x1610   : > { %v4126_v49 = vpop.f32.mrf.mxu0 }
0x1611   : > { %v4292_v19 = vsel %vm2770_vm11, %v4126_v49, 0.0 }
0x1612   : > { %v5613_v4 = vpop.f32.mrf.mxu0  ;;  %v4293_v18 = vadd.f32 %v4292_v19, %v4291_v8 }
0x1615   : > { %v4131_v9 = vpop.f32.mrf.mxu0 }
0x1616   : > { %v4299_v43 = vsel %vm2770_vm11, %v4131_v9, 0.0 }
0x1617   : > { %v5616_v33 = vpop.f32.mrf.mxu0  ;;  %v4300_v52 = vadd.f32 %v4299_v43, %v4298_v41 }
0x1619   : > { %v4134_v50 = vpop.f32.mrf.mxu0 }
0x161a   : > { %v4306_v0 = vsel %vm2770_vm11, %v4134_v50, 0.0  ;;  %v4312_v50 = vsel %vm2770_vm11, %v7259_v6, 0.0 }
0x161b   : > { %v5617_v2 = vpop.f32.mrf.mxu0  ;;  %v4307_v34 = vadd.f32 %v4306_v0, %v4305_v10 }
0x161d   : > { %v4139_v27 = vpop.f32.mrf.mxu0 }
0x161f   : > { %v5620_v39 = vpop.f32.mrf.mxu0 }
0x1621   : > { %v7263_v58 = vpop.f32.mrf.mxu0 }
0x1623   : > { %v5621_v54 = vpop.f32.mrf.mxu0 }
0x1625   : > { %v4192_v62 = vpop.f32.mrf.mxu1 }
0x1626   : > { %v4287_v20 = vsel %vm2770_vm11, %v4192_v62, 0.0 }
0x1627   : > { %v5626_v35 = vpop.f32.mrf.mxu1  ;;  %v4288_v56 = vadd.f32 %v4287_v20, %v4286_v28 }
0x1629   : > { %v4195_v13 = vpop.f32.mrf.mxu1  ;;  %v4261_v14 = vpop.f32.mrf.mxu0 }
0x162a   : > { %v4294_v57 = vsel %vm2770_vm11, %v4195_v13, 0.0  ;;  %v4289_v32 = vsel %vm2770_vm11, %v4261_v14, 0.0 }
0x162b   : > { %v4290_v37 = vadd.f32 %v4289_v32, %v4288_v56  ;;  %v5627_v51 = vpop.f32.mrf.mxu1  ;;  %v5640_v63 = vpop.f32.mrf.mxu0  ;;  %v4295_v42 = vadd.f32 %v4294_v57, %v4293_v18  ;;  %v4319_v56 = vsel %vm2770_vm11, %v7261_v12, 0.0 }
0x162d   : > { %v4326_v46 = vadd.f32 %v4290_v37, %v6634_v25  ;;  %v4200_v40 = vpop.f32.mrf.mxu1  ;;  %v4264_v47 = vpop.f32.mrf.mxu0 }
0x162e   : > { %v4301_v24 = vsel %vm2770_vm11, %v4200_v40, 0.0  ;;  %v4296_v53 = vsel %vm2770_vm11, %v4264_v47, 0.0 }
0x162f   : > { %v4297_v60 = vadd.f32 %v4296_v53, %v4295_v42  ;;  %v5630_v61 = vpop.f32.mrf.mxu1  ;;  %v5641_v31 = vpop.f32.mrf.mxu0  ;;  %v7281_v5 = vadd.f32 %v7274_v59, %v4326_v46  ;;  %v4302_v21 = vadd.f32 %v4301_v24, %v4300_v52 }
0x1631   : > { %v4327_v25 = vadd.f32 %v4297_v60, %v6641_v30  ;;  %v4203_v1 = vpop.f32.mrf.mxu1  ;;  %v4269_v38 = vpop.f32.mrf.mxu0  ;;  %v4344_v7 = vsel %vm2770_vm11, %v7281_v5, 0.0  ;;  %v4313_v30 = vsel %vm2770_vm11, %v4139_v27, 0.0 }
0x1632   : > { %v4308_v55 = vsel %vm2770_vm11, %v4203_v1, 0.0  ;;  %v4303_v11 = vsel %vm2770_vm11, %v4269_v38, 0.0  ;;  %4345 = vadd.xlane.f32.xlu1 %v4344_v7  ;;  %v4314_v22 = vadd.f32 %v4313_v30, %v4312_v50 }
0x1633   : > { %v4304_v48 = vadd.f32 %v4303_v11, %v4302_v21  ;;  %v5631_v3 = vpop.f32.mrf.mxu1  ;;  %v5644_v15 = vpop.f32.mrf.mxu0  ;;  %v7291_v23 = vadd.f32 %v7274_v59, %v4327_v25  ;;  %v4309_v49 = vadd.f32 %v4308_v55, %v4307_v34 }
0x1635   : > { %v4328_v4 = vadd.f32 %v4304_v48, %v6639_v29  ;;  %v4208_v9 = vpop.f32.mrf.mxu1  ;;  %v4272_v33 = vpop.f32.mrf.mxu0  ;;  %v4347_v16 = vsel %vm2770_vm11, %v7291_v23, 0.0  ;;  %v4320_v29 = vsel %vm2770_vm11, %v7263_v58, 0.0 }
0x1636   : > { %v4315_v2 = vsel %vm2770_vm11, %v4208_v9, 0.0  ;;  %v4310_v39 = vsel %vm2770_vm11, %v4272_v33, 0.0  ;;  %4348 = vadd.xlane.f32.xlu0 %v4347_v16  ;;  %v4321_v8 = vadd.f32 %v4320_v29, %v4319_v56 }
0x1637   : > { %v4311_v54 = vadd.f32 %v4310_v39, %v4309_v49  ;;  %v5634_v62 = vpop.f32.mrf.mxu1  ;;  %v5645_v27 = vpop.f32.mrf.mxu0  ;;  %v7302_v26 = vadd.f32 %v7274_v59, %v4328_v4  ;;  %v4316_v20 = vadd.f32 %v4315_v2, %v4314_v22  ;;  %v5925_v22 = vld [vmem:[%s7488_s22 + $0x8] sm:$0xff]  }
0x1638   : > { %5651 = vmatpush3.bf16.msra.mxu1 %v5925_v22 }
0x1639   : > { %v4329_v28 = vadd.f32 %v4311_v54, %v6648_v36  ;;  %v4211_v35 = vpop.f32.mrf.mxu1  ;;  %v4277_v6 = vpop.f32.mrf.mxu0  ;;  %v4350_v19 = vsel %vm2770_vm11, %v7302_v26, 0.0  ;;  %v5926_v54 = vld [vmem:[%s7488_s22] sm:$0xff]   ;;  %5652 = vmatprep.subr.bf16.mxu1 %v6152_v17 }
0x163a   : > { %v4322_v13 = vsel %vm2770_vm11, %v4211_v35, 0.0  ;;  %v4317_v14 = vsel %vm2770_vm11, %v4277_v6, 0.0  ;;  %4351 = vadd.xlane.f32.xlu0 %v4350_v19 }
0x163b   : > { %v4318_v57 = vadd.f32 %v4317_v14, %v4316_v20  ;;  %v5635_v32 = vpop.f32.mrf.mxu1  ;;  %v5648_v58 = vpop.f32.mrf.mxu0  ;;  %v7314_v18 = vadd.f32 %v7274_v59, %v4329_v28  ;;  %v4323_v36 = vadd.f32 %v4322_v13, %v4321_v8 }
0x163c   : > { %5653 = vmatpush3.bf16.msra.mxu1 %v5926_v54 }
0x163d   : > { %v4330_v37 = vadd.f32 %v4318_v57, %v6655_v44  ;;  %v4280_v51 = vpop.f32.mrf.mxu0  ;;  %v4353_v63 = vsel %vm2770_vm11, %v7314_v18, 0.0  ;;  %5694 = vmatprep.subr.mxu1 %v6152_v17 }
0x163e   : > { %v4324_v12 = vsel %vm2770_vm11, %v4280_v51, 0.0  ;;  %4354 = vadd.xlane.f32.xlu0 %v4353_v63  ;;  %v5140_v51 = vld [vmem:[%s7489_s28] ss:$0 sm:$0xff]  ;;  %s7492_s28 = sld [smem:[#allocation21_spill]] }
0x163f   : > { %v4325_v43 = vadd.f32 %v4324_v12, %v4323_v36  ;;  %v5649_v42 = vpop.f32.mrf.mxu0  ;;  %v7321_v46 = vadd.f32 %v7274_v59, %v4330_v37 }
0x1641   : > { %v4331_v40 = vadd.f32 %v4325_v43, %v6657_v45  ;;  %v4356_v47 = vsel %vm2770_vm11, %v7321_v46, 0.0 }
0x1642   : > { %4357 = vadd.xlane.f32.xlu1 %v4356_v47 }
0x1643   : > { %v7327_v44 = vadd.f32 %v7274_v59, %v4331_v40 }
0x1644   : > { %v5142_v22 = vld [vmem:[%s7492_s28] ss:$0 sm:$0xff]  ;;  %s7494_s28 = sld [smem:[#allocation25_spill]] }
0x1645   : > { %v4359_v41 = vsel %vm2770_vm11, %v7327_v44, 0.0 }
0x1646   : > { %4360 = vadd.xlane.f32.xlu0 %v4359_v41  ;;  %v5141_v41 = vld [vmem:[%s7490_s2] ss:$0 sm:$0xff]  ;;  %s7493_s2 = sld [smem:[#allocation23_spill]] }
0x16bb   : > { %v4346_v24 = vpop.xlane.xlu1 %4345 }
0x16bc   : > { %v4362_v53 = vmul.f32 0.03125, %v4346_v24 }
0x16be   : > { %v4368_v52 = vsub.f32 %v7281_v5, %v4362_v53 }
0x16bf   : > { %v4349_v60 = vpop.xlane.xlu0 %4348 }
0x16c0   : > { %v4363_v61 = vmul.f32 0.03125, %v4349_v60  ;;  %v4374_v31 = vmul.f32 %v4368_v52, %v4368_v52 }
0x16c2   : > { %v7333_v45 = vsub.f32 %v7291_v23, %v4363_v61  ;;  %v4380_v0 = vsel %vm2770_vm11, %v4374_v31, 0.0 }
0x16c3   : > { %v4352_v21 = vpop.xlane.xlu0 %4351  ;;  %4381 = vadd.xlane.f32.xlu1 %v4380_v0 }
0x16c4   : > { %v4364_v59 = vmul.f32 0.03125, %v4352_v21  ;;  %v4375_v25 = vmul.f32 %v7333_v45, %v7333_v45 }
0x16c6   : > { %v7339_v1 = vsub.f32 %v7302_v26, %v4364_v59  ;;  %v4383_v38 = vsel %vm2770_vm11, %v4375_v25, 0.0 }
0x16c7   : > { %v4355_v7 = vpop.xlane.xlu0 %4354  ;;  %4384 = vadd.xlane.f32.xlu0 %v4383_v38 }
0x16c8   : > { %v4365_v10 = vmul.f32 0.03125, %v4355_v7  ;;  %v4376_v55 = vmul.f32 %v7339_v1, %v7339_v1 }
0x16ca   : > { %v7345_v11 = vsub.f32 %v7314_v18, %v4365_v10  ;;  %v4386_v34 = vsel %vm2770_vm11, %v4376_v55, 0.0 }
0x16cb   : > { %4387 = vadd.xlane.f32.xlu1 %v4386_v34  ;;  %v4358_v48 = vpop.xlane.xlu1 %4357 }
0x16cc   : > { %v4366_v3 = vmul.f32 0.03125, %v4358_v48  ;;  %v4377_v15 = vmul.f32 %v7345_v11, %v7345_v11 }
0x16ce   : > { %v7351_v30 = vsub.f32 %v7321_v46, %v4366_v3  ;;  %v4389_v49 = vsel %vm2770_vm11, %v4377_v15, 0.0 }
0x16cf   : > { %4390 = vadd.xlane.f32.xlu0 %v4389_v49  ;;  %v4361_v4 = vpop.xlane.xlu0 %4360 }
0x16d0   : > { %v4367_v9 = vmul.f32 0.03125, %v4361_v4  ;;  %v4378_v33 = vmul.f32 %v7351_v30, %v7351_v30  ;;  %v5928_v4 = vld [vmem:[%s7491_s18 + $0x30] sm:$0xff]  }
0x16d2   : > { %v4373_v16 = vsub.f32 %v7327_v44, %v4367_v9  ;;  %v4392_v50 = vsel %vm2770_vm11, %v4378_v33, 0.0  ;;  %v5929_v9 = vld [vmem:[%s7491_s18 + $0x28] sm:$0xff]   ;;  %v5930_v33 = vld [vmem:[%s7491_s18 + $0x20] sm:$0xff]  }
0x16d3   : > { %4393 = vadd.xlane.f32.xlu1 %v4392_v50  ;;  %v5932_v50 = vld [vmem:[%s7491_s18 + $0x10] sm:$0xff]  }
0x16d4   : > { %v4379_v2 = vmul.f32 %v4373_v16, %v4373_v16 }
0x16d6   : > { %v4395_v39 = vsel %vm2770_vm11, %v4379_v2, 0.0  ;;  %v5933_v2 = vld [vmem:[%s7491_s18 + $0x8] sm:$0xff]  }
0x16d7   : > { %4396 = vadd.xlane.f32.xlu0 %v4395_v39  ;;  %v5934_v39 = vld [vmem:[%s7491_s18] sm:$0xff]  }
0x174c   : > { %v4382_v62 = vpop.xlane.xlu1 %4381 }
0x174d   : > { %v4398_v27 = vmul.f32 0.03125, %v4382_v62 }
0x174f   : > { %v4404_v29 = vadd.f32 1e-05, %v4398_v27 }
0x1750   : > { %v4385_v20 = vpop.xlane.xlu0 %4384 }
0x1751   : > { %6045 = vrsqrt.f32 %v4404_v29  ;;  %v4399_v28 = vmul.f32 0.03125, %v4385_v20 }
0x1753   : > { %v4405_v35 = vadd.f32 1e-05, %v4399_v28 }
0x1754   : > { %v4388_v6 = vpop.xlane.xlu1 %4387 }
0x1755   : > { %6047 = vrsqrt.f32 %v4405_v35  ;;  %v4400_v19 = vmul.f32 0.03125, %v4388_v6 }
0x1757   : > { %v4406_v56 = vadd.f32 1e-05, %v4400_v19 }
0x1758   : > { %v4391_v13 = vpop.xlane.xlu0 %4390 }
0x1759   : > { %6049 = vrsqrt.f32 %v4406_v56  ;;  %v4401_v14 = vmul.f32 0.03125, %v4391_v13 }
0x175b   : > { %v4407_v8 = vadd.f32 1e-05, %v4401_v14 }
0x175c   : > { %v4394_v57 = vpop.xlane.xlu1 %4393 }
0x175d   : > { %6051 = vrsqrt.f32 %v4407_v8  ;;  %v4402_v32 = vmul.f32 0.03125, %v4394_v57 }
0x175e   : > { %v6046_v58 = vpop.eup %6045 }
0x175f   : > { %v4416_v36 = vmul.f32 %v6046_v58, %v4368_v52  ;;  %v4408_v37 = vadd.f32 1e-05, %v4402_v32 }
0x1760   : > { %v4397_v63 = vpop.xlane.xlu0 %4396 }
0x1761   : > { %6053 = vrsqrt.f32 %v4408_v37  ;;  %v4403_v12 = vmul.f32 0.03125, %v4397_v63  ;;  %v4428_v42 = vmul.f32 %v5140_v51, %v4416_v36 }
0x1762   : > { %v6048_v43 = vpop.eup %6047 }
0x1763   : > { %v4417_v40 = vmul.f32 %v6048_v43, %v7333_v45  ;;  %v4409_v47 = vadd.f32 1e-05, %v4403_v12  ;;  %v4440_v60 = vadd.f32 %v5141_v41, %v4428_v42 }
0x1765   : > { %v4429_v24 = vmul.f32 %v5140_v51, %v4417_v40  ;;  %6055 = vrsqrt.f32 %v4409_v47 }
0x1766   : > { %v6050_v53 = vpop.eup %6049 }
0x1767   : > { %v4441_v61 = vadd.f32 %v5141_v41, %v4429_v24  ;;  %v4418_v31 = vmul.f32 %v6050_v53, %v7339_v1 }
0x1769   : > { %v4446_v0 = vpack.c.bf16 %v4441_v61, %v4440_v60  ;;  %v4430_v59 = vmul.f32 %v5140_v51, %v4418_v31 }
0x176a   : > { %v6052_v52 = vpop.eup %6051 }
0x176b   : > { %5655 = vmatmul.mubr.msk.bf16.vlgmr.msra.gmra.mxu1 %vm2770_vm11, %v4446_v0  ;;  %v4419_v21 = vmul.f32 %v6052_v52, %v7345_v11  ;;  %v4442_v38 = vadd.f32 %v5141_v41, %v4430_v59 }
0x176c   : > { %5658 = vmatprep.mubr.msk.bf16.mxu1 %vm6153_vm12, %v6152_v17 }
0x176d   : > { %v4431_v45 = vmul.f32 %v5140_v51, %v4419_v21 }
0x176e   : > { %v6054_v25 = vpop.eup %6053 }
0x176f   : > { %v4443_v7 = vadd.f32 %v5141_v41, %v4431_v45  ;;  %v4420_v10 = vmul.f32 %v6054_v25, %v7351_v30  ;;  %v5927_v30 = vld [vmem:[%s7491_s18 + $0x38] sm:$0xff]  }
0x1770   : > { %5667 = vmatpush3.bf16.msra.mxu0 %v5927_v30 }
0x1771   : > { %v4447_v55 = vpack.c.bf16 %v4443_v7, %v4442_v38  ;;  %v4432_v48 = vmul.f32 %v5140_v51, %v4420_v10  ;;  %5668 = vmatprep.subr.bf16.mxu0 %v6152_v17 }
0x1772   : > { %v6056_v1 = vpop.eup %6055 }
0x1773   : > { %5659 = vmatmul.mubr.msk.bf16.gmra.mxu1 %vm2770_vm11, %v4447_v55  ;;  %v4421_v34 = vmul.f32 %v6056_v1, %v4373_v16  ;;  %v4444_v3 = vadd.f32 %v5141_v41, %v4432_v48  ;;  %v5931_v16 = vld [vmem:[%s7491_s18 + $0x18] sm:$0xff]  }
0x1774   : > { %5662 = vmatprep.mubr.msk.bf16.mxu1 %vm6153_vm12, %v6152_v17  ;;  %5669 = vmatpush3.bf16.msra.mxu0 %v5928_v4 }
0x1775   : > { %v4433_v11 = vmul.f32 %v5140_v51, %v4421_v34  ;;  %5670 = vmatprep.subr.bf16.mxu0 %v6152_v17 }
0x1777   : > { %v4445_v15 = vadd.f32 %v5141_v41, %v4433_v11 }
0x1778   : > { %5671 = vmatpush3.bf16.msra.mxu0 %v5929_v9 }
0x1779   : > { %v4448_v49 = vpack.c.bf16 %v4445_v15, %v4444_v3  ;;  %5672 = vmatprep.subr.bf16.mxu0 %v6152_v17 }
0x177b   : > { %5663 = vmatmul.mubr.msk.bf16.gmra.mxu1 %vm2770_vm11, %v4448_v49 }
0x177c   : > { %5706 = vmatprep.mubr.msk.f32.mxu1 %vm6153_vm12, %v6152_v17  ;;  %5673 = vmatpush3.bf16.msra.mxu0 %v5930_v33 }
0x177d   : > { %5674 = vmatprep.subr.bf16.mxu0 %v6152_v17 }
0x1780   : > { %5675 = vmatpush3.bf16.msra.mxu0 %v5931_v16 }
0x1781   : > { %5676 = vmatprep.subr.bf16.mxu0 %v6152_v17 }
0x1784   : > { %5677 = vmatpush3.bf16.msra.mxu0 %v5932_v50 }
0x1785   : > { %5678 = vmatprep.subr.bf16.mxu0 %v6152_v17 }
0x1788   : > { %5679 = vmatpush3.bf16.msra.mxu0 %v5933_v2 }
0x1789   : > { %5680 = vmatprep.subr.bf16.mxu0 %v6152_v17 }
0x178c   : > { %5681 = vmatpush3.bf16.msra.mxu0 %v5934_v39 }
0x182b   : > { %v4510_v54 = vpop.f32.mrf.mxu1 }
0x182c   : > { %v4511_v62 = vadd.f32 %v5142_v22, %v4510_v54 }
0x182d   : > { %v5656_v27 = vpop.f32.mrf.mxu1 }
0x182e   : > { %v5148_v29 = vmul.f32 -1.702, %v4511_v62 }
0x182f   : > { %v4513_v20 = vpop.f32.mrf.mxu1 }
0x1830   : > { %v4545_v28 = vmul.f32 1.442695, %v5148_v29  ;;  %v4514_v35 = vadd.f32 %v5142_v22, %v4513_v20 }
0x1831   : > { %v5657_v6 = vpop.f32.mrf.mxu1 }
0x1832   : > { %6057 = vpow2.f32 %v4545_v28  ;;  %v5149_v19 = vmul.f32 -1.702, %v4514_v35 }
0x1833   : > { %v4518_v56 = vpop.f32.mrf.mxu1 }
0x1834   : > { %v4547_v13 = vmul.f32 1.442695, %v5149_v19  ;;  %v4519_v14 = vadd.f32 %v5142_v22, %v4518_v56  ;;  %v5154_v19 = vld [vmem:[%s7493_s2] ss:$0 sm:$0xff] }
0x1835   : > { %v5660_v8 = vpop.f32.mrf.mxu1 }
0x1836   : > { %6059 = vpow2.f32 %v4547_v13  ;;  %v5150_v57 = vmul.f32 -1.702, %v4519_v14 }
0x1837   : > { %v4521_v32 = vpop.f32.mrf.mxu1 }
0x1838   : > { %v4549_v58 = vmul.f32 1.442695, %v5150_v57  ;;  %v4522_v36 = vadd.f32 %v5142_v22, %v4521_v32 }
0x1839   : > { %v5661_v37 = vpop.f32.mrf.mxu1 }
0x183a   : > { %6061 = vpow2.f32 %v4549_v58  ;;  %v5151_v51 = vmul.f32 -1.702, %v4522_v36 }
0x183b   : > { %v4526_v63 = vpop.f32.mrf.mxu1 }
0x183c   : > { %v4551_v12 = vmul.f32 1.442695, %v5151_v51  ;;  %v4527_v43 = vadd.f32 %v5142_v22, %v4526_v63 }
0x183d   : > { %v5664_v42 = vpop.f32.mrf.mxu1 }
0x183e   : > { %6063 = vpow2.f32 %v4551_v12  ;;  %v5152_v40 = vmul.f32 -1.702, %v4527_v43 }
0x183f   : > { %v6058_v47 = vpop.eup %6057  ;;  %v4529_v41 = vpop.f32.mrf.mxu1 }
0x1840   : > { %v4557_v24 = vadd.f32 1.0, %v6058_v47  ;;  %v4553_v53 = vmul.f32 1.442695, %v5152_v40  ;;  %v4530_v60 = vadd.f32 %v5142_v22, %v4529_v41 }
0x1841   : > { %v5665_v61 = vpop.f32.mrf.mxu1 }
0x1842   : > { %v5153_v31 = vmul.f32 -1.702, %v4530_v60  ;;  %6065 = vpow2.f32 %v4553_v53 }
0x1843   : > { %v6060_v0 = vpop.eup %6059  ;;  %6067 = vrcp.f32 %v4557_v24 }
0x1844   : > { %v4558_v52 = vadd.f32 1.0, %v6060_v0  ;;  %v4555_v21 = vmul.f32 1.442695, %v5153_v31 }
0x1846   : > { %6069 = vrcp.f32 %v4558_v52 }
0x1847   : > { %v6062_v59 = vpop.eup %6061  ;;  %6071 = vpow2.f32 %v4555_v21 }
0x1848   : > { %v4559_v45 = vadd.f32 1.0, %v6062_v59 }
0x184a   : > { %6073 = vrcp.f32 %v4559_v45 }
0x184b   : > { %v6064_v25 = vpop.eup %6063 }
0x184c   : > { %v4560_v38 = vadd.f32 1.0, %v6064_v25 }
0x184e   : > { %6075 = vrcp.f32 %v4560_v38 }
0x184f   : > { %v6066_v7 = vpop.eup %6065 }
0x1850   : > { %v6068_v10 = vpop.eup %6067  ;;  %v4561_v55 = vadd.f32 1.0, %v6066_v7 }
0x1851   : > { %v4575_v48 = vmul.f32 %v6068_v10, %v4511_v62 }
0x1852   : > { %6077 = vrcp.f32 %v4561_v55 }
0x1853   : > { %v6070_v1 = vpop.eup %6069 }
0x1854   : > { %v6072_v34 = vpop.eup %6071  ;;  %v4576_v11 = vmul.f32 %v6070_v1, %v4514_v35 }
0x1855   : > { %v4562_v3 = vadd.f32 1.0, %v6072_v34 }
0x1856   : > { %v4581_v15 = vpack.c.bf16 %v4576_v11, %v4575_v48 }
0x1857   : > { %6079 = vrcp.f32 %v4562_v3  ;;  %v6074_v49 = vpop.eup %6073 }
0x1858   : > { %5683 = vmatmul.mubr.bf16.vlgmr.msra.gmra.mxu0 %v4581_v15  ;;  %v4577_v4 = vmul.f32 %v6074_v49, %v4519_v14 }
0x1859   : > { %5686 = vmatprep.mubr.msk.bf16.mxu0 %vm6153_vm12, %v6152_v17 }
0x185b   : > { %v6076_v30 = vpop.eup %6075 }
0x185c   : > { %v4578_v9 = vmul.f32 %v6076_v30, %v4522_v36 }
0x185e   : > { %v4582_v33 = vpack.c.bf16 %v4578_v9, %v4577_v4 }
0x185f   : > { %v6078_v16 = vpop.eup %6077 }
0x1860   : > { %5687 = vmatmul.mubr.bf16.gmra.mxu0 %v4582_v33  ;;  %v4579_v2 = vmul.f32 %v6078_v16, %v4527_v43 }
0x1861   : > { %5690 = vmatprep.mubr.msk.bf16.mxu0 %vm6153_vm12, %v6152_v17 }
0x1864   : > { %v6080_v50 = vpop.eup %6079 }
0x1865   : > { %v4580_v39 = vmul.f32 %v6080_v50, %v4530_v60 }
0x1867   : > { %v4583_v22 = vpack.c.bf16 %v4580_v39, %v4579_v2 }
0x1869   : > { %5691 = vmatmul.mubr.bf16.gmra.mxu0 %v4583_v22 }
0x1918   : > { %v4672_v54 = vpop.f32.mrf.mxu0 }
0x1919   : > { %v4673_v32 = vadd.f32 %v5154_v19, %v4672_v54 }
0x191a   : > { %v5684_v62 = vpop.f32.mrf.mxu0 }
0x191b   : > { %v4695_v42 = vadd.f32 %v4673_v32, %v7281_v5 }
0x191c   : > { %v4675_v27 = vpop.f32.mrf.mxu0 }
0x191d   : > { %v4676_v40 = vadd.f32 %v5154_v19, %v4675_v27  ;;  %v4703_v24 = vsel %vm2770_vm11, %v4695_v42, 0.0 }
0x191e   : > { %v5685_v29 = vpop.f32.mrf.mxu0 }
0x1920   : > { %v4680_v20 = vpop.f32.mrf.mxu0 }
0x1921   : > { %v4681_v13 = vadd.f32 %v5154_v19, %v4680_v20 }
0x1922   : > { %v5688_v28 = vpop.f32.mrf.mxu0 }
0x1923   : > { %v4697_v36 = vadd.f32 %v4681_v13, %v7302_v26  ;;  %v4696_v26 = vadd.f32 %v4676_v40, %v7291_v23 }
0x1924   : > { %v4683_v35 = vpop.f32.mrf.mxu0 }
0x1925   : > { %v4684_v37 = vadd.f32 %v5154_v19, %v4683_v35  ;;  %v4709_v41 = vsel %vm2770_vm11, %v4697_v36, 0.0 }
0x1926   : > { %v5689_v6 = vpop.f32.mrf.mxu0 }
0x1927   : > { %v4698_v47 = vadd.f32 %v4684_v37, %v7314_v18 }
0x1929   : > { %v4688_v56 = vpop.f32.mrf.mxu0  ;;  %v4712_v53 = vsel %vm2770_vm11, %v4698_v47, 0.0 }
0x192a   : > { %v4689_v14 = vadd.f32 %v5154_v19, %v4688_v56 }
0x192b   : > { %v5692_v8 = vpop.f32.mrf.mxu0 }
0x192c   : > { %v4699_v57 = vadd.f32 %v4689_v14, %v7321_v46 }
0x192d   : > { %v4691_v58 = vpop.f32.mrf.mxu0 }
0x192e   : > { %v4692_v51 = vadd.f32 %v5154_v19, %v4691_v58  ;;  %v4715_v63 = vsel %vm2770_vm11, %v4699_v57, 0.0 }
0x192f   : > { %4716 = vadd.xlane.f32.xlu0 %v4715_v63  ;;  %v5693_v12 = vpop.f32.mrf.mxu0 }
0x1930   : > { %v4700_v43 = vadd.f32 %v4692_v51, %v7327_v44  ;;  %v4706_v44 = vsel %vm2770_vm11, %v4696_v26, 0.0  ;;  %v5163_v12 = vld [vmem:[%s7494_s28] ss:$0 sm:$0xff] }
0x1932   : > { %v4718_v46 = vsel %vm2770_vm11, %v4700_v43, 0.0 }
0x1933   : > { %4710 = vadd.xlane.f32.xlu0 %v4709_v41  ;;  %4719 = vadd.xlane.f32.xlu1 %v4718_v46 }
0x1937   : > { %4704 = vadd.xlane.f32.xlu0 %v4703_v24  ;;  %4713 = vadd.xlane.f32.xlu1 %v4712_v53 }
0x193b   : > { %4707 = vadd.xlane.f32.xlu1 %v4706_v44 }
0x19b8   : > { %v4717_v5 = vpop.xlane.xlu0 %4716 }
0x19b9   : > { %v4725_v60 = vmul.f32 0.03125, %v4717_v5 }
0x19bb   : > { %v4731_v18 = vsub.f32 %v4699_v57, %v4725_v60 }
0x19bc   : > { %v4711_v61 = vpop.xlane.xlu0 %4710  ;;  %v4720_v31 = vpop.xlane.xlu1 %4719 }
0x19bd   : > { %v4723_v0 = vmul.f32 0.03125, %v4711_v61  ;;  %v4726_v52 = vmul.f32 0.03125, %v4720_v31  ;;  %v4737_v21 = vmul.f32 %v4731_v18, %v4731_v18 }
0x19bf   : > { %v4729_v59 = vsub.f32 %v4697_v36, %v4723_v0  ;;  %v4732_v45 = vsub.f32 %v4700_v43, %v4726_v52  ;;  %v4751_v23 = vsel %vm2770_vm11, %v4737_v21, 0.0 }
0x19c0   : > { %4752 = vadd.xlane.f32.xlu0 %v4751_v23  ;;  %v4705_v25 = vpop.xlane.xlu0 %4704  ;;  %v4714_v38 = vpop.xlane.xlu1 %4713 }
0x19c1   : > { %v4721_v7 = vmul.f32 0.03125, %v4705_v25  ;;  %v4724_v10 = vmul.f32 0.03125, %v4714_v38  ;;  %v4735_v55 = vmul.f32 %v4729_v59, %v4729_v59  ;;  %v4738_v1 = vmul.f32 %v4732_v45, %v4732_v45  ;;  %v4805_v25 = vld [vmem:[%s6362_s20] sm:$0x7]  ;;  %v5935_v38 = vld [vmem:[%s6367_s27 + $0x8] sm:$0xff]  }
0x19c3   : > { %v4727_v34 = vsub.f32 %v4695_v42, %v4721_v7  ;;  %v4730_v48 = vsub.f32 %v4698_v47, %v4724_v10  ;;  %v4745_v11 = vsel %vm2770_vm11, %v4735_v55, 0.0  ;;  %v4754_v3 = vsel %vm2770_vm11, %v4738_v1, 0.0  ;;  %v5936_v7 = vld [vmem:[%s6367_s27] sm:$0xff]  }
0x19c4   : > { %4746 = vadd.xlane.f32.xlu0 %v4745_v11  ;;  %4755 = vadd.xlane.f32.xlu1 %v4754_v3  ;;  %v4708_v15 = vpop.xlane.xlu1 %4707 }
0x19c5   : > { %v4722_v49 = vmul.f32 0.03125, %v4708_v15  ;;  %v4733_v30 = vmul.f32 %v4727_v34, %v4727_v34  ;;  %v4736_v4 = vmul.f32 %v4730_v48, %v4730_v48 }
0x19c7   : > { %v4728_v9 = vsub.f32 %v4696_v26, %v4722_v49  ;;  %v4739_v33 = vsel %vm2770_vm11, %v4733_v30, 0.0  ;;  %v4748_v16 = vsel %vm2770_vm11, %v4736_v4, 0.0  ;;  %v5164_v26 = vld [vmem:[%s6357_s12] ss:$0 sm:$0xff] }
0x19c8   : > { %4740 = vadd.xlane.f32.xlu0 %v4739_v33  ;;  %4749 = vadd.xlane.f32.xlu1 %v4748_v16 }
0x19c9   : > { %v4734_v50 = vmul.f32 %v4728_v9, %v4728_v9 }
0x19cb   : > { %v4742_v2 = vsel %vm2770_vm11, %v4734_v50, 0.0 }
0x19cc   : > { %4743 = vadd.xlane.f32.xlu1 %v4742_v2 }
0x1a49   : > { %v4753_v39 = vpop.xlane.xlu0 %4752 }
0x1a4a   : > { %v4761_v22 = vmul.f32 0.03125, %v4753_v39 }
0x1a4c   : > { %v4767_v54 = vadd.f32 1e-05, %v4761_v22 }
0x1a4d   : > { %v4747_v62 = vpop.xlane.xlu0 %4746  ;;  %v4756_v27 = vpop.xlane.xlu1 %4755 }
0x1a4e   : > { %v4759_v29 = vmul.f32 0.03125, %v4747_v62  ;;  %v4762_v20 = vmul.f32 0.03125, %v4756_v27  ;;  %6081 = vrsqrt.f32 %v4767_v54 }
0x1a50   : > { %v4765_v28 = vadd.f32 1e-05, %v4759_v29  ;;  %v4768_v35 = vadd.f32 1e-05, %v4762_v20 }
0x1a51   : > { %v4741_v6 = vpop.xlane.xlu0 %4740  ;;  %v4750_v19 = vpop.xlane.xlu1 %4749 }
0x1a52   : > { %6083 = vrsqrt.f32 %v4765_v28  ;;  %v4757_v56 = vmul.f32 0.03125, %v4741_v6  ;;  %v4760_v13 = vmul.f32 0.03125, %v4750_v19 }
0x1a53   : > { %6085 = vrsqrt.f32 %v4768_v35 }
0x1a54   : > { %v4763_v14 = vadd.f32 1e-05, %v4757_v56  ;;  %v4766_v8 = vadd.f32 1e-05, %v4760_v13 }
0x1a55   : > { %v4744_v57 = vpop.xlane.xlu1 %4743 }
0x1a56   : > { %6087 = vrsqrt.f32 %v4763_v14  ;;  %v4758_v32 = vmul.f32 0.03125, %v4744_v57 }
0x1a57   : > { %6089 = vrsqrt.f32 %v4766_v8 }
0x1a58   : > { %v4764_v58 = vadd.f32 1e-05, %v4758_v32 }
0x1a5a   : > { %6091 = vrsqrt.f32 %v4764_v58 }
0x1a5b   : > { %v6082_v36 = vpop.eup %6081 }
0x1a5c   : > { %v4779_v51 = vmul.f32 %v6082_v36, %v4731_v18 }
0x1a5e   : > { %v4791_v47 = vmul.f32 %v5163_v12, %v4779_v51 }
0x1a5f   : > { %v6084_v37 = vpop.eup %6083 }
0x1a60   : > { %v6086_v63 = vpop.eup %6085  ;;  %v4777_v41 = vmul.f32 %v6084_v37, %v4729_v59  ;;  %v4803_v5 = vadd.f32 %v5164_v26, %v4791_v47 }
0x1a61   : > { %v4780_v43 = vmul.f32 %v6086_v63, %v4732_v45 }
0x1a62   : > { %v4789_v61 = vmul.f32 %v5163_v12, %v4777_v41 }
0x1a63   : > { %v6088_v42 = vpop.eup %6087  ;;  %v4792_v40 = vmul.f32 %v5163_v12, %v4780_v43 }
0x1a64   : > { %v6090_v46 = vpop.eup %6089  ;;  %v4775_v31 = vmul.f32 %v6088_v42, %v4727_v34  ;;  %v4801_v21 = vadd.f32 %v5164_v26, %v4789_v61 }
0x1a65   : > { %v4804_v24 = vadd.f32 %v5164_v26, %v4792_v40  ;;  %v4778_v53 = vmul.f32 %v6090_v46, %v4730_v48 }
0x1a66   : > { %v4787_v59 = vmul.f32 %v5163_v12, %v4775_v31 }
0x1a67   : > { %v6092_v44 = vpop.eup %6091  ;;  %5695 = vmatpush3.msra.mxu1 %v4804_v24  ;;  %v4790_v60 = vmul.f32 %v5163_v12, %v4778_v53 }
0x1a68   : > { %5696 = vmatprep.subr.mxu1 %v6152_v17  ;;  %v4776_v18 = vmul.f32 %v6092_v44, %v4728_v9  ;;  %v4799_v23 = vadd.f32 %v5164_v26, %v4787_v59 }
0x1a69   : > { %5697 = vmatpush3.msra.mxu1 %v4803_v5  ;;  %v4802_v0 = vadd.f32 %v5164_v26, %v4790_v60 }
0x1a6a   : > { %5698 = vmatprep.subr.mxu1 %v6152_v17  ;;  %v4788_v52 = vmul.f32 %v5163_v12, %v4776_v18 }
0x1a6b   : > { %5699 = vmatpush3.msra.mxu1 %v4802_v0 }
0x1a6c   : > { %5700 = vmatprep.subr.mxu1 %v6152_v17  ;;  %v4800_v45 = vadd.f32 %v5164_v26, %v4788_v52 }
0x1a6d   : > { %5701 = vmatpush3.msra.mxu1 %v4801_v21 }
0x1a6e   : > { %5702 = vmatprep.subr.mxu1 %v6152_v17 }
0x1a6f   : > { %5703 = vmatpush3.msra.mxu1 %v4800_v45 }
0x1a70   : > { %5704 = vmatprep.subr.mxu1 %v6152_v17 }
0x1a71   : > { %5705 = vmatpush3.msra.mxu1 %v4799_v23 }
0x1a72   : > { %5707 = vmatmul.mubr.msk.f32.vlgmr.msra.gmra.mxu1 %vm3418_vm14, %v4805_v25  ;;  %5709 = vmatprep.subr.bf16.mxu1 %v6152_v17 }
0x1a73   : > { %5710 = vmatpush3.bf16.msra.mxu1 %v5935_v38  ;;  %5713 = vmatprep.mubr.msk.bf16.mxu1 %vm6153_vm12, %v6152_v17 }
0x1a74   : > { %5711 = vmatprep.subr.bf16.mxu1 %v6152_v17 }
0x1a77   : > { %5712 = vmatpush3.bf16.msra.mxu1 %v5936_v7 }
0x1b32   : > { %v4875_v10 = vpop.f32.mrf.mxu1 }
0x1b33   : > { %v4883_v55 = vpack.c.bf16 %v4875_v10, %v4875_v10 }
0x1b34   : > { %v5708_v1 = vpop.f32.mrf.mxu1 }
0x1b35   : > { %5714 = vmatmul.mubr.msk.bf16.vlgmr.msra.gmra.mxu1 %vm2770_vm11, %v4883_v55 }
0x1bf5   : > { %v4933_v34 = vpop.f32.mrf.mxu1 }
0x1bf6   : > { %v4939_v48 = vmul.f32 %v4933_v34, %v4933_v34 }
0x1bf7   : > { %v5715_v11 = vpop.f32.mrf.mxu1 }
0x1bf8   : > { %v4941_v3 = vsel %vm4940_vm0, %v4939_v48, 0.0 }
0x1bf9   : > { %4942 = vadd.xlane.f32.xlu1 %v4941_v3  ;;  %v4936_v15 = vpop.f32.mrf.mxu1 }
0x1bfb   : > { %v5716_v49 = vpop.f32.mrf.mxu1 }
0x1c82   : > { %v4943_v30 = vpop.xlane.xlu1 %4942 }
0x1c83   : > { %v4944_v4 = vadd.f32 1e-12, %v4943_v30 }
0x1c85   : > { %6093 = vrsqrt.f32 %v4944_v4 }
0x1c92   : > { %v6094_v17 = vpop.eup %6093 }
0x1c93   : > { %v4946_v9 = vmul.f32 %v6094_v17, %v4933_v34 }
0x1c95   : > { %4947 = vst.msk [vmem:[%s6387_s15] sm:$0x7] %vm4940_vm0, %v4946_v9 }
0x1c96 PF: > { %s93_s7 = sadd.s32 1, %s6101_s7  }
0x1c97   : > { %p90_p6 = scmp.ge.s32.totalorder %s93_s7, 4  }
0x1c99   :  { %92 = sbr.rel (!%p90_p6) target bundleno = 72 (0x48), region = 260 }

</bundles_post_ra>
